<compile_context>
chip_gen: v5e
topology: v5e:2x2
jax: 0.10.0
libtpu: 0.0.40
codegen_flags: <defaults>
</compile_context>

<pallas_src>
import math
import functools

import jax
import jax.numpy as jnp
from jax import lax
from jax.experimental import pallas as pl
from jax.experimental.pallas import tpu as pltpu

_MASK_VALUE = -1e30  # finite "-inf" for masking padded kv columns


def _round_up(x: int, m: int) -> int:
    return -(-x // m) * m


def _vmem_capacity_bytes() -> int:
    """Best-effort physical VMEM capacity (bytes) of the local TPU core."""
    try:
        cap = getattr(pltpu.get_tpu_info(), "vmem_capacity_bytes", None)
        if cap:
            return int(min(max(int(cap), 32 << 20), 256 << 20))
    except Exception:
        pass
    try:
        kind = jax.devices()[0].device_kind.lower()
        if "v7" in kind:
            return 64 << 20
        return 128 << 20
    except Exception:
        return 64 << 20  # conservative default (v7x per-core size)


def _flash_sdpa_kernel(q_ref, k_ref, vt_ref, o_ref, m_sc, l_sc, qs_sc, *maybe_acc,
                       scale, kv_len, block_k, need_mask, acc_in_out):
    """One (batch-block, q-tile, kv-tile) grid step of flash attention.

    q_ref : (Bb, tq, D)     k_ref : (Bb, tk, D)
    vt_ref: (Bb, tk, Sv)    o_ref : (Bb, tq, Sv)
    m_sc/l_sc: (Bb, tq, 1) f32     qs_sc: (Bb, tq, D) compute dtype
    maybe_acc: (Bb, tq, Sv) f32 scratch, only when the output dtype is not f32.
    """
    acc_ref = o_ref if acc_in_out else maybe_acc[0]
    ki = pl.program_id(2)

    @pl.when(ki == 0)
    def _init():
        m_sc[...] = jnp.full_like(m_sc, -jnp.inf)
        l_sc[...] = jnp.zeros_like(l_sc)
        acc_ref[...] = jnp.zeros_like(acc_ref)
        # Scale q ONCE per (batch, q-tile); q_ref is resident across the kv axis, so
        # doing this per kv step would repeat a (Bb, tq, D) load + multiply.
        qs_sc[...] = q_ref[...] * jnp.asarray(scale, dtype=q_ref.dtype)

    # Scores tile: native-dtype MXU matmul with f32 accumulation.
    s = jnp.einsum('bqd,bkd->bqk', qs_sc[...], k_ref[...],
                   preferred_element_type=jnp.float32)          # (Bb, tq, tk)

    if need_mask:  # compile-time: only emitted when the kv axis was padded
        # Only the last kv tile ever contains padded columns (padding < tk); compare
        # the static lane iota against a scalar remainder (no per-step vector add).
        rem = kv_len - ki * block_k
        col = lax.broadcasted_iota(jnp.int32, s.shape, 2)
        s = jnp.where(col < rem, s, _MASK_VALUE)

    # Online softmax update (all statistics in f32).
    m_prev = m_sc[...]
    m_new = jnp.maximum(m_prev, jnp.max(s, axis=-1, keepdims=True))
    alpha = jnp.exp(m_prev - m_new)
    p = jnp.exp(s - m_new)
    l_sc[...] = alpha * l_sc[...] + jnp.sum(p, axis=-1, keepdims=True)
    pv = jnp.einsum('bqk,bkv->bqv', p.astype(vt_ref.dtype), vt_ref[...],
                    preferred_element_type=jnp.float32)
    acc_ref[...] = alpha * acc_ref[...] + pv
    m_sc[...] = m_new

    @pl.when(ki == pl.num_programs(2) - 1)
    def _finalize():
        # Deferred normalization; reciprocal runs on the EUP slot (effectively free).
        inv_l = pl.reciprocal(l_sc[...], approx=True)
        if acc_in_out:
            o_ref[...] = o_ref[...] * inv_l
        else:
            o_ref[...] = (acc_ref[...] * inv_l).astype(o_ref.dtype)


def scaled_dot_product_attention(q, k, v, mask=None, scale=None, *,
                                 precision="bfloat16"):
    """JAX/Pallas equivalent of ScaledDotProductAttention.forward.

    precision: "bfloat16" (default) streams q/k/v through the MXU in bf16 with f32
    accumulation; "float32" keeps the streams in f32.
    """
    if q.shape != k.shape:
        raise RuntimeError('Query and Key shapes should be identical.')
    if q.shape[-2] != v.shape[-2]:
        raise RuntimeError('Query, Key, and Value shapes should have the same sequence dimension.')
    if mask is not None:
        # TODO(synk): the reference mask check compares an int against a list and
        # therefore raises for every non-None mask; reproduce that behaviour.
        raise RuntimeError('Query, Key, Value, and mask shapes should have the same sequence dimension.')

    *batch, S, D = q.shape
    Dv = v.shape[-1]
    if Dv != S:
        raise RuntimeError('scores @ v.mT requires v.shape[-1] == q.shape[-2].')

    B = math.prod(batch) if batch else 1
    out_dtype = jnp.result_type(q.dtype, k.dtype, v.dtype)
    out_itemsize = jnp.dtype(out_dtype).itemsize
    scale_val = (1.0 / math.sqrt(D)) if scale is None else float(scale)

    q3 = q.reshape(B, S, D)
    k3 = k.reshape(B, S, D)
    v3 = v.reshape(B, S, Dv)

    S_pad = _round_up(S, 128)

    # Tiny problems: tiles would be lane-sparse (<128 lanes) and per-grid-step
    # overhead dominates; the fused XLA path beats anything Pallas can do here.
    if S_pad <= 128:
        scores = jax.nn.softmax(
            scale_val * jnp.einsum('bqd,bkd->bqk',
                                   q3.astype(out_dtype), k3.astype(out_dtype)),
            axis=-1)
        out = jnp.einsum('bqk,bvk->bqv', scores, v3.astype(out_dtype))
        return out.reshape(*batch, S, Dv)

    # Compute dtype for the MXU streams.
    if precision in ("float32", "highest") or out_itemsize < 4:
        compute_dtype = out_dtype
    else:
        compute_dtype = jnp.bfloat16
    cbytes = jnp.dtype(compute_dtype).itemsize

    Sv_pad = S_pad                       # Dv == S; pad the lane axis too (lane-dense)
    acc_in_out = (jnp.dtype(out_dtype) == jnp.float32)

    qc = q3.astype(compute_dtype)
    kc = k3.astype(compute_dtype)
    # Pre-transpose v once in HBM so the in-kernel PV matmul is a standard
    # [tq, tk] @ [tk, Sv] contraction (no XLU transpose per tile).
    vT = jnp.swapaxes(v3, 1, 2).astype(compute_dtype)        # [B, kv(=S), Dv]

    if S_pad != S or Sv_pad != Dv:
        qc = jnp.pad(qc, ((0, 0), (0, S_pad - S), (0, 0)))
        kc = jnp.pad(kc, ((0, 0), (0, S_pad - S), (0, 0)))
        vT = jnp.pad(vT, ((0, 0), (0, S_pad - S), (0, Sv_pad - Dv)))

    # ---- generation-aware VMEM budgeting --------------------------------------
    vmem_cap = _vmem_capacity_bytes()            # ~128 MiB v5e/v6e, ~64 MiB v7x
    usable = int(vmem_cap * 0.70)                # budget for our (double-buffered) tiles
    vmem_limit = int(vmem_cap * 0.85)            # Mosaic scoped-VMEM limit

    def footprint(bb, tq, tk):
        qb = 2 * bb * tq * D * cbytes            # q blocks (double-buffered)
        kb = 2 * bb * tk * D * cbytes
        vb = 2 * bb * tk * Sv_pad * cbytes       # dominant streamed tile
        ob = 2 * bb * tq * Sv_pad * out_itemsize
        accb = 0 if acc_in_out else bb * tq * Sv_pad * 4
        qsb = bb * tq * D * cbytes
        stats = 2 * bb * tq * 4 * 2
        return qb + kb + vb + ob + accb + qsb + stats

    if S_pad <= 512:
        # Whole problem fits in one (q, kv) tile; pack batch elements so tiles are
        # not tiny, but keep >= 4 steps on the (parallel) batch axis so both v7x
        # TensorCores get work and input/output DMA can pipeline.
        tq = tk = S_pad
        Bb = max(1, min(B, usable // max(footprint(1, tq, tk), 1)))
        Bb = min(Bb, max(1, B // 4))
        while B % Bb:
            Bb -= 1
    else:
        Bb = 1
        # tk >= 256 first (halves/quarters accumulator read-modify-write traffic and
        # keeps the PV contraction at the MXU-native 256)...
        tk = next((t for t in (256, 128)
                   if S_pad % t == 0 and footprint(1, 128, t) <= usable), 128)
        # ...then grow tq as much as VMEM allows: K/V are re-streamed S_pad/tq times,
        # so tq is the dominant HBM-traffic lever on every TPU generation.
        tq_cands = sorted({t for t in (S_pad, 2048, 1024, 512, 256, 128)
                           if S_pad % t == 0}, reverse=True)
        tq = next((t for t in tq_cands if footprint(1, t, tk) <= usable), 128)
        # Spend any remaining headroom on a larger kv tile.
        if S_pad % 512 == 0 and footprint(1, tq, 512) <= usable:
            tk = 512

    # Padding never spans a full kv tile (padding < 128 <= tk), so every kv tile has
    # at least one valid column and the running max stays finite.
    assert S_pad - S < tk, (S, S_pad, tk)

    grid = (B // Bb, S_pad // tq, S_pad // tk)

    kernel = functools.partial(
        _flash_sdpa_kernel, scale=scale_val, kv_len=S, block_k=tk,
        need_mask=(S_pad != S), acc_in_out=acc_in_out)

    scratch = [
        pltpu.VMEM((Bb, tq, 1), jnp.float32),       # running max
        pltpu.VMEM((Bb, tq, 1), jnp.float32),       # running sum
        pltpu.VMEM((Bb, tq, D), compute_dtype),     # q * scale (written once per q tile)
    ]
    if not acc_in_out:
        scratch.append(pltpu.VMEM((Bb, tq, Sv_pad), jnp.float32))  # f32 accumulator

    # bytes_accessed includes the S_pad/tq re-streaming of K and V (the wrapper-side
    # v transpose happens outside this custom call and is not counted here).
    n_q_pass = S_pad // tq
    cost = pl.CostEstimate(
        flops=2 * B * S_pad * S_pad * D + 2 * B * S_pad * S_pad * Sv_pad,
        transcendentals=B * S_pad * S_pad,
        bytes_accessed=(B * S_pad * D * cbytes
                        + n_q_pass * B * S_pad * D * cbytes
                        + n_q_pass * B * S_pad * Sv_pad * cbytes
                        + B * S_pad * Sv_pad * out_itemsize))

    out = pl.pallas_call(
        kernel,
        out_shape=jax.ShapeDtypeStruct((B, S_pad, Sv_pad), out_dtype),
        grid_spec=pltpu.PrefetchScalarGridSpec(
            num_scalar_prefetch=0,
            grid=grid,
            in_specs=[
                pl.BlockSpec((Bb, tq, D), lambda b, qi, ki: (b, qi, 0)),
                pl.BlockSpec((Bb, tk, D), lambda b, qi, ki: (b, ki, 0)),
                # TODO(synk): on v5e, if xprof shows exposed DMA on this V stream,
                # add pipeline_mode=pl.Buffered(3) here and sweep.
                pl.BlockSpec((Bb, tk, Sv_pad), lambda b, qi, ki: (b, ki, 0)),
            ],
            out_specs=pl.BlockSpec((Bb, tq, Sv_pad), lambda b, qi, ki: (b, qi, 0)),
            scratch_shapes=scratch,
        ),
        compiler_params=pltpu.CompilerParams(
            dimension_semantics=("parallel", "parallel", "arbitrary"),
            vmem_limit_bytes=vmem_limit,
        ),
        cost_estimate=cost,
    )(qc, kc, vT)

    out = out[:, :S, :Dv]
    return out.reshape(*batch, S, Dv)


def _reference(q, k, v, scale=None):
    # Pure-JAX reference mirroring the PyTorch forward exactly (f32).
    s = (1.0 / math.sqrt(q.shape[-1])) if scale is None else scale
    scores = jax.nn.softmax(s * jnp.einsum('bqd,bkd->bqk', q, k), axis=-1)
    return jnp.einsum('bqk,bvk->bqv', scores, v)  # scores @ v.mT


if __name__ == "__main__":
    key = jax.random.PRNGKey(0)
    # (B, S, D, input dtype, precision flag, tolerance)
    cases = [
        (2, 8,   32, jnp.float32,  "bfloat16", 1e-5),  # tiny -> fused XLA path
        (2, 200, 64, jnp.float32,  "bfloat16", 3e-2),  # Pallas: padded kv + lane axes
        (2, 256, 64, jnp.float32,  "float32",  2e-2),  # Pallas: f32 streams
        (2, 640, 64, jnp.float32,  "bfloat16", 3e-2),  # Pallas: multi kv-tile flash path
        (2, 256, 64, jnp.bfloat16, "bfloat16", 4e-2),  # bf16 in/out -> f32 acc scratch
    ]
    for (B, S, D, dtype, prec, tol) in cases:
        Dv = S  # required by scores @ v.mT in the reference module
        key, kq, kk, kv = jax.random.split(key, 4)
        q = jax.random.normal(kq, (B, S, D), dtype=jnp.float32).astype(dtype)
        k = jax.random.normal(kk, (B, S, D), dtype=jnp.float32).astype(dtype)
        v = jax.random.normal(kv, (B, S, Dv), dtype=jnp.float32).astype(dtype)

        out = jax.block_until_ready(
            scaled_dot_product_attention(q, k, v, precision=prec))
        ref = _reference(q.astype(jnp.float32), k.astype(jnp.float32),
                         v.astype(jnp.float32))
        assert out.shape == (B, S, Dv), out.shape
        assert jnp.allclose(out.astype(jnp.float32), ref, atol=tol, rtol=tol), \
            f"mismatch at {(B, S, D, str(dtype), prec)}"

    print("KERNEL_OK")
</pallas_src>

<mosaic_0001>
module attributes {stable_mosaic.version = 11 : i64} {
  func.func @_flash_sdpa_kernel(%arg0: i32, %arg1: i32, %arg2: i32, %arg3: memref<1x256x64xbf16, #tpu.memory_space<vmem>>, %arg4: memref<1x256x64xbf16, #tpu.memory_space<vmem>>, %arg5: memref<1x256x256xbf16, #tpu.memory_space<vmem>>, %arg6: memref<1x256x256xf32, #tpu.memory_space<vmem>>, %arg7: memref<1x256x1xf32, #tpu.memory_space<vmem>>, %arg8: memref<1x256x1xf32, #tpu.memory_space<vmem>>, %arg9: memref<1x256x64xbf16, #tpu.memory_space<vmem>>) attributes {dimension_semantics = [#tpu.dimension_semantics<parallel>, #tpu.dimension_semantics<parallel>, #tpu.dimension_semantics<arbitrary>], iteration_bounds = array<i64: 2, 1, 1>, scalar_prefetch = 0 : i64, scratch_operands = 3 : i64, tpu.core_type = #tpu.core_type<tc>, window_params = [{transform_indices = @transform_0, window_bounds = array<i64: 1, 256, 64>}, {transform_indices = @transform_1, window_bounds = array<i64: 1, 256, 64>}, {transform_indices = @transform_2, window_bounds = array<i64: 1, 256, 256>}, {transform_indices = @transform_3, window_bounds = array<i64: 1, 256, 256>}]} {
    %c0_i32 = arith.constant 0 : i32
    %0 = arith.cmpi eq, %arg2, %c0_i32 : i32
    %1 = arith.extui %0 : i1 to i32
    %c0_i32_0 = arith.constant 0 : i32
    %2 = arith.cmpi ne, %1, %c0_i32_0 : i32
    scf.if %2 {
      %cst_33 = arith.constant 0xFF800000 : f32
      %40 = vector.broadcast %cst_33 : f32 to vector<1x256x1xf32>
      %c0_34 = arith.constant 0 : index
      %c0_35 = arith.constant 0 : index
      %c0_36 = arith.constant 0 : index
      %41 = vector.load %arg7[%c0_34, %c0_35, %c0_36] : memref<1x256x1xf32, #tpu.memory_space<vmem>>, vector<1x256x1xf32>
      tpu.vector_store %arg7[%c0_34, %c0_35, %c0_36], %40 {strides = array<i32>} : memref<1x256x1xf32, #tpu.memory_space<vmem>>, vector<1x256x1xf32>,
      %cst_37 = arith.constant 0.000000e+00 : f32
      %42 = vector.broadcast %cst_37 : f32 to vector<1x256x1xf32>
      %c0_38 = arith.constant 0 : index
      %c0_39 = arith.constant 0 : index
      %c0_40 = arith.constant 0 : index
      %43 = vector.load %arg8[%c0_38, %c0_39, %c0_40] : memref<1x256x1xf32, #tpu.memory_space<vmem>>, vector<1x256x1xf32>
      tpu.vector_store %arg8[%c0_38, %c0_39, %c0_40], %42 {strides = array<i32>} : memref<1x256x1xf32, #tpu.memory_space<vmem>>, vector<1x256x1xf32>,
      %cst_41 = arith.constant 0.000000e+00 : f32
      %44 = vector.broadcast %cst_41 : f32 to vector<1x256x256xf32>
      %c0_42 = arith.constant 0 : index
      %c0_43 = arith.constant 0 : index
      %c0_44 = arith.constant 0 : index
      %45 = vector.load %arg6[%c0_42, %c0_43, %c0_44] : memref<1x256x256xf32, #tpu.memory_space<vmem>>, vector<1x256x256xf32>
      tpu.vector_store %arg6[%c0_42, %c0_43, %c0_44], %44 {strides = array<i32>} : memref<1x256x256xf32, #tpu.memory_space<vmem>>, vector<1x256x256xf32>,
      %c0_45 = arith.constant 0 : index
      %c0_46 = arith.constant 0 : index
      %c0_47 = arith.constant 0 : index
      %46 = vector.load %arg3[%c0_45, %c0_46, %c0_47] : memref<1x256x64xbf16, #tpu.memory_space<vmem>>, vector<1x256x64xbf16>
      %cst_48 = arith.constant 1.250000e-01 : bf16
      %47 = vector.broadcast %cst_48 : bf16 to vector<1x256x64xbf16>
      %48 = arith.mulf %46, %47 : vector<1x256x64xbf16>
      %c0_49 = arith.constant 0 : index
      %c0_50 = arith.constant 0 : index
      %c0_51 = arith.constant 0 : index
      %49 = vector.load %arg9[%c0_49, %c0_50, %c0_51] : memref<1x256x64xbf16, #tpu.memory_space<vmem>>, vector<1x256x64xbf16>
      tpu.vector_store %arg9[%c0_49, %c0_50, %c0_51], %48 {strides = array<i32>} : memref<1x256x64xbf16, #tpu.memory_space<vmem>>, vector<1x256x64xbf16>,
    } else {
    }
    %c0 = arith.constant 0 : index
    %c0_1 = arith.constant 0 : index
    %c0_2 = arith.constant 0 : index
    %3 = vector.load %arg9[%c0, %c0_1, %c0_2] : memref<1x256x64xbf16, #tpu.memory_space<vmem>>, vector<1x256x64xbf16>
    %c0_3 = arith.constant 0 : index
    %c0_4 = arith.constant 0 : index
    %c0_5 = arith.constant 0 : index
    %4 = vector.load %arg4[%c0_3, %c0_4, %c0_5] : memref<1x256x64xbf16, #tpu.memory_space<vmem>>, vector<1x256x64xbf16>
    "tpu.trace_start"() <{level = 10 : i32, message = "bqd,bkd->bqk"}> : () -> ()
    %cst = arith.constant dense<0.000000e+00> : vector<1x256x256xf32>
    %5 = tpu.matmul %3, %4, %cst {dimension_numbers = #tpu.dot_dimension_numbers<[2], [2], [1], [1], [0, 0, 0, 1, 1, 1], [0], [0]>} : vector<1x256x64xbf16>, vector<1x256x64xbf16>, vector<1x256x256xf32> -> vector<1x256x256xf32>
    "tpu.trace_stop"() : () -> ()
    %c256_i32 = arith.constant 256 : i32
    %6 = arith.muli %arg2, %c256_i32 : i32
    %c200_i32 = arith.constant 200 : i32
    %7 = arith.subi %c200_i32, %6 : i32
    %8 = tpu.iota {dimensions = array<i32: 2>} : vector<1x256x256xi32>
    %9 = vector.broadcast %7 : i32 to vector<1x256x256xi32>
    %10 = arith.cmpi slt, %8, %9 : vector<1x256x256xi32>
    %cst_6 = arith.constant -1.000000e+30 : f32
    %11 = vector.broadcast %cst_6 : f32 to vector<1x256x256xf32>
    %12 = arith.select %10, %5, %11 : vector<1x256x256xi1>, vector<1x256x256xf32>
    %c0_7 = arith.constant 0 : index
    %c0_8 = arith.constant 0 : index
    %c0_9 = arith.constant 0 : index
    %13 = vector.load %arg7[%c0_7, %c0_8, %c0_9] : memref<1x256x1xf32, #tpu.memory_space<vmem>>, vector<1x256x1xf32>
    %cst_10 = arith.constant dense<0xFF800000> : vector<1x256xf32>
    %14 = vector.multi_reduction <maximumf>, %12, %cst_10 [2] : vector<1x256x256xf32> to vector<1x256xf32>
    %15 = vector.shape_cast %14 : vector<1x256xf32> to vector<1x256x1xf32>
    %16 = arith.maximumf %13, %15 : vector<1x256x1xf32>
    %17 = arith.subf %13, %16 : vector<1x256x1xf32>
    %18 = math.exp %17 : vector<1x256x1xf32>
    %19 = vector.broadcast %16 : vector<1x256x1xf32> to vector<1x256x256xf32>
    %20 = arith.subf %12, %19 : vector<1x256x256xf32>
    %21 = math.exp %20 : vector<1x256x256xf32>
    %c0_11 = arith.constant 0 : index
    %c0_12 = arith.constant 0 : index
    %c0_13 = arith.constant 0 : index
    %22 = vector.load %arg8[%c0_11, %c0_12, %c0_13] : memref<1x256x1xf32, #tpu.memory_space<vmem>>, vector<1x256x1xf32>
    %23 = arith.mulf %18, %22 : vector<1x256x1xf32>
    %cst_14 = arith.constant dense<0.000000e+00> : vector<1x256xf32>
    %24 = vector.multi_reduction <add>, %21, %cst_14 [2] : vector<1x256x256xf32> to vector<1x256xf32>
    %25 = vector.shape_cast %24 : vector<1x256xf32> to vector<1x256x1xf32>
    %26 = arith.addf %23, %25 : vector<1x256x1xf32>
    %c0_15 = arith.constant 0 : index
    %c0_16 = arith.constant 0 : index
    %c0_17 = arith.constant 0 : index
    %27 = vector.load %arg8[%c0_15, %c0_16, %c0_17] : memref<1x256x1xf32, #tpu.memory_space<vmem>>, vector<1x256x1xf32>
    tpu.vector_store %arg8[%c0_15, %c0_16, %c0_17], %26 {strides = array<i32>} : memref<1x256x1xf32, #tpu.memory_space<vmem>>, vector<1x256x1xf32>,
    %28 = arith.truncf %21 : vector<1x256x256xf32> to vector<1x256x256xbf16>
    %c0_18 = arith.constant 0 : index
    %c0_19 = arith.constant 0 : index
    %c0_20 = arith.constant 0 : index
    %29 = vector.load %arg5[%c0_18, %c0_19, %c0_20] : memref<1x256x256xbf16, #tpu.memory_space<vmem>>, vector<1x256x256xbf16>
    "tpu.trace_start"() <{level = 10 : i32, message = "bqk,bkv->bqv"}> : () -> ()
    %cst_21 = arith.constant dense<0.000000e+00> : vector<1x256x256xf32>
    %30 = tpu.matmul %28, %29, %cst_21 {dimension_numbers = #tpu.dot_dimension_numbers<[2], [1], [1], [2], [0, 0, 0, 1, 1, 2], [0], [0]>} : vector<1x256x256xbf16>, vector<1x256x256xbf16>, vector<1x256x256xf32> -> vector<1x256x256xf32>
    "tpu.trace_stop"() : () -> ()
    %c0_22 = arith.constant 0 : index
    %c0_23 = arith.constant 0 : index
    %c0_24 = arith.constant 0 : index
    %31 = vector.load %arg6[%c0_22, %c0_23, %c0_24] : memref<1x256x256xf32, #tpu.memory_space<vmem>>, vector<1x256x256xf32>
    %32 = vector.broadcast %18 : vector<1x256x1xf32> to vector<1x256x256xf32>
    %33 = arith.mulf %32, %31 : vector<1x256x256xf32>
    %34 = arith.addf %33, %30 : vector<1x256x256xf32>
    %c0_25 = arith.constant 0 : index
    %c0_26 = arith.constant 0 : index
    %c0_27 = arith.constant 0 : index
    %35 = vector.load %arg6[%c0_25, %c0_26, %c0_27] : memref<1x256x256xf32, #tpu.memory_space<vmem>>, vector<1x256x256xf32>
    tpu.vector_store %arg6[%c0_25, %c0_26, %c0_27], %34 {strides = array<i32>} : memref<1x256x256xf32, #tpu.memory_space<vmem>>, vector<1x256x256xf32>,
    %c0_28 = arith.constant 0 : index
    %c0_29 = arith.constant 0 : index
    %c0_30 = arith.constant 0 : index
    %36 = vector.load %arg7[%c0_28, %c0_29, %c0_30] : memref<1x256x1xf32, #tpu.memory_space<vmem>>, vector<1x256x1xf32>
    tpu.vector_store %arg7[%c0_28, %c0_29, %c0_30], %16 {strides = array<i32>} : memref<1x256x1xf32, #tpu.memory_space<vmem>>, vector<1x256x1xf32>,
    %c0_i32_31 = arith.constant 0 : i32
    %37 = arith.cmpi eq, %arg2, %c0_i32_31 : i32
    %38 = arith.extui %37 : i1 to i32
    %c0_i32_32 = arith.constant 0 : i32
    %39 = arith.cmpi ne, %38, %c0_i32_32 : i32
    scf.if %39 {
      %c0_33 = arith.constant 0 : index
      %c0_34 = arith.constant 0 : index
      %c0_35 = arith.constant 0 : index
      %40 = vector.load %arg8[%c0_33, %c0_34, %c0_35] : memref<1x256x1xf32, #tpu.memory_space<vmem>>, vector<1x256x1xf32>
      %41 = tpu.reciprocal %40 {approx = true} : vector<1x256x1xf32> -> vector<1x256x1xf32>
      %c0_36 = arith.constant 0 : index
      %c0_37 = arith.constant 0 : index
      %c0_38 = arith.constant 0 : index
      %42 = vector.load %arg6[%c0_36, %c0_37, %c0_38] : memref<1x256x256xf32, #tpu.memory_space<vmem>>, vector<1x256x256xf32>
      %43 = vector.broadcast %41 : vector<1x256x1xf32> to vector<1x256x256xf32>
      %44 = arith.mulf %42, %43 : vector<1x256x256xf32>
      %c0_39 = arith.constant 0 : index
      %c0_40 = arith.constant 0 : index
      %c0_41 = arith.constant 0 : index
      %45 = vector.load %arg6[%c0_39, %c0_40, %c0_41] : memref<1x256x256xf32, #tpu.memory_space<vmem>>, vector<1x256x256xf32>
      tpu.vector_store %arg6[%c0_39, %c0_40, %c0_41], %44 {strides = array<i32>} : memref<1x256x256xf32, #tpu.memory_space<vmem>>, vector<1x256x256xf32>,
    } else {
    }
    return
  }
  func.func @transform_0(%arg0: i32, %arg1: i32, %arg2: i32) -> (i32, i32, i32) {
    %c0_i32 = arith.constant 0 : i32
    %c0_i32_0 = arith.constant 0 : i32
    return %arg0, %arg1, %c0_i32 : i32, i32, i32
  }
  func.func @transform_1(%arg0: i32, %arg1: i32, %arg2: i32) -> (i32, i32, i32) {
    %c0_i32 = arith.constant 0 : i32
    %c0_i32_0 = arith.constant 0 : i32
    return %arg0, %arg2, %c0_i32 : i32, i32, i32
  }
  func.func @transform_2(%arg0: i32, %arg1: i32, %arg2: i32) -> (i32, i32, i32) {
    %c0_i32 = arith.constant 0 : i32
    %c0_i32_0 = arith.constant 0 : i32
    return %arg0, %arg2, %c0_i32 : i32, i32, i32
  }
  func.func @transform_3(%arg0: i32, %arg1: i32, %arg2: i32) -> (i32, i32, i32) {
    %c0_i32 = arith.constant 0 : i32
    %c0_i32_0 = arith.constant 0 : i32
    return %arg0, %arg1, %c0_i32 : i32, i32, i32
  }
}

</mosaic_0001>

<bundles_post_ra>
// kernel: tpu_custom_call.1
= control target key start
LH: loop header
LB: loop body
LE: loop exit
PB: predicated region body
PF: predicated region fallthrough
CT: control target
= control target key end

     0   :  { %8 = vsyncpa [#allocation6], 0  ;;  %s6546_s0 = inlined_call_operand.vmem [shape: bf16[2,256,64], index: 0, kind: input, shape index: {}]   ;;  %s6547_s1 = inlined_call_operand.vmem [shape: bf16[2,256,64], index: 1, kind: input, shape index: {}]   ;;  %s6548_s2 = inlined_call_operand.vmem [shape: bf16[2,256,256], index: 2, kind: input, shape index: {}]   ;;  %s6549_s3 = inlined_call_operand.hbm [shape: f32[2,256,256], index: 3, kind: output, shape index: {}]  }
   0x1   :  { %10 = vsyncpa [#allocation6 + $0x1], 0  ;;  %s4619_s12 = smov 0   ;;  %s4621_s13 = smov 0  }
   0x2   :  { %s4623_s14 = smov 0   ;;  %s4625_s15 = smov 0  }
   0x3   :  { %s4627_s16 = smov 0   ;;  %s4629_s17 = smov 0  }
   0x4 LB: > { %s3727_s18 = sadd.s32 4294967295, %s4592_s17   ;;  %s3728_s19 = sadd.s32 4294967294, %s4592_s17   ;;  %s4592_s17 = sphi %s4629_s17, %s16_s17   ;;  %s4588_s16 = sphi %s4627_s16, %s6865_s16   ;;  %s4584_s15 = sphi %s4625_s15, %s6864_s15   ;;  %s4580_s14 = sphi %s4623_s14, %s6863_s14   ;;  %s4576_s13 = sphi %s4621_s13, %s6862_s13   ;;  %s4572_s12 = sphi %s4619_s12, %s6861_s12  }
   0x5   : > { %s35_s20 = sadd.s32 1, %s4588_s16  ;;  %s128_s21 = sadd.s32 1, %s4580_s14 }
   0x6   : > { %p37_p0 = scmp.ge.s32.totalorder %s35_s20, 2  ;;  %p138_p1 = scmp.ne.s32.totalorder %s4580_s14, %s4576_s13 }
   0x7   : > { %p139_p2 = scmp.eq.s32.totalorder %s3727_s18, 1  ;;  %p144_p3 = scmp.ne.s32.totalorder %s4576_s13, %s4572_s12 }
   0x8   : > { %s6867_s20 = smov (%p37_p0, %s35_s20), 0  ;;  %p145_p5 = scmp.eq.s32.totalorder %s3728_s19, 1 }
   0x9   : > { %p4659_p4 = por %p139_p2, %p138_p1  ;;  %s123_s23 = ssub.s32 %s4588_s16, %s6867_s20 }
   0xa   : > { %p3731_p6 = scmp.ge.s32.totalorder %s4592_s17, 1  ;;  %p126_p7 = scmp.eq.s32.totalorder %s123_s23, 0 }
   0xb   : > { %p4666_p8 = por %p145_p5, %p144_p3  ;;  %p203_p9 = scmp.lt.s32.totalorder %s4592_s17, 3 }
   0xc   : > { %s4672_s25 = scalar_select %p126_p7, %s4580_s14, %s128_s21  }
   0xd   : > { %p204_p10 = pnand %p3731_p6, %p203_p9 }
   0xf   : > { %207 = sbr.rel (%p204_p10) target bundleno = 1692 (0x69c), region = 32 }
  0x14   : > { %p251_p11 = scmp.lt.s32.totalorder %s4584_s15, 1  ;;  %vm800_vm0 = vcmask 523264   ;;  %vm543_vm1 = vcmask 519168   ;;  %vm286_vm3 = vcmask 7168   ;;  %s247_s11 = sand.u32 1, %s4576_s13  }
  0x15   : > { %s3732_s18 = sshll.u32 %s247_s11, 9  ;;  %s4099_s21 = sshll.u32 %s4584_s15, 9 }
  0x16   : > { %s4676_s26 = scalar_select %p251_p11, %s4584_s15, 1 }
  0x17   : > { %s5488_s19 = scalar_lea.vmem [#allocation5], %s3732_s18  ;;  %s3588_s15 = scalar_lea.sflag [#allocation6], %s247_s11 }
  0x18   : > { %s4032_s27 = sshll.u32 %s4676_s26, 7  ;;  %s4034_s7 = sshll.u32 %s4676_s26, 8 }
  0x19   : > { %s4682_s30 = scalar_lea.vmem %s6547_s1, %s4032_s27  ;;  %s4697_s6 = scalar_lea.vmem %s6546_s0, %s4032_s27 }
  0x1a   : > { %v4058_v0 = vld [vmem:[%s4682_s30 + $0x38] sm:$0xff]  ;;  %v4057_v4 = vld [vmem:[%s4682_s30 + $0x30] sm:$0xff]  ;;  %v4056_v8 = vld [vmem:[%s4682_s30 + $0x28] sm:$0xff]  ;;  %s5150_s10 = scalar_lea.vmem %s6548_s2, %s4034_s7  ;;  %s3602_s27 = scalar_lea.hbm %s6549_s3, %s4099_s21 }
  0x1b   : > { %v4066_v1 = vld [vmem:[%s4682_s30 + $0x78] sm:$0xff]  ;;  %v871_v2 = vsel %vm800_vm0, %v4058_v0, 0  ;;  %v4065_v5 = vld [vmem:[%s4682_s30 + $0x70] sm:$0xff]  ;;  %v868_v6 = vsel %vm800_vm0, %v4057_v4, 0  ;;  %v4064_v9 = vld [vmem:[%s4682_s30 + $0x68] sm:$0xff]  ;;  %v865_v10 = vsel %vm800_vm0, %v4056_v8, 0 }
  0x1c   : > { %v895_v3 = vsel %vm800_vm0, %v4066_v1, 0  ;;  %897 = vmatpush.bf16.xpose.msra.mxu0 %v871_v2  ;;  %v892_v7 = vsel %vm800_vm0, %v4065_v5, 0  ;;  %v889_v11 = vsel %vm800_vm0, %v4064_v9, 0  ;;  %v4101_v12 = vld [vmem:[%s4697_s6] sm:$0xff]   ;;  %v4054_v23 = vld [vmem:[%s4682_s30 + $0x18] sm:$0xff]  ;;  %v4164_v27 = vld [vmem:[%s4697_s6 + $0x8] sm:$0xff]  }
  0x1d   : > { %986 = vmatpush.bf16.xpose.msra.mxu1 %v895_v3  ;;  %v4102_v13 = vunpack.c.l.bf16 %v4101_v12  ;;  %v4103_v14 = vunpack.c.h.bf16 %v4101_v12  ;;  %v4055_v15 = vld [vmem:[%s4682_s30 + $0x20] sm:$0xff]  ;;  %v4062_v24 = vld [vmem:[%s4682_s30 + $0x58] sm:$0xff]  ;;  %v859_v25 = vsel %vm800_vm0, %v4054_v23, 0  ;;  %v4106_v28 = vunpack.c.l.bf16 %v4164_v27  ;;  %v4053_v30 = vld [vmem:[%s4682_s30 + $0x10] sm:$0xff]  ;;  %s3603_s28 = sshll.u32 %s5488_s19, 4  ;;  %s3605_s29 = sshll.u32 %s3602_s27, 4  ;;  %s3604_s28 = int_to_ptr.vmem [resolvable:$true] %s3603_s28  ;;  %s3606_s29 = int_to_ptr.hbm [resolvable:$true] %s3605_s29 }
  0x1e   : > { %v4063_v16 = vld [vmem:[%s4682_s30 + $0x60] sm:$0xff]  ;;  %v862_v21 = vsel %vm800_vm0, %v4055_v15, 0  ;;  %v883_v26 = vsel %vm800_vm0, %v4062_v24, 0  ;;  %v4107_v29 = vunpack.c.h.bf16 %v4164_v27  ;;  %v4061_v31 = vld [vmem:[%s4682_s30 + $0x50] sm:$0xff]  ;;  %v856_v36 = vsel %vm800_vm0, %v4053_v30, 0  ;;  %v4052_v38 = vld [vmem:[%s4682_s30 + $0x8] sm:$0xff] }
  0x1f   : > { %v479_v17 = vmul.f32 0.125, %v4102_v13  ;;  %v480_v18 = vmul.f32 0.125, %v4103_v14  ;;  %v886_v22 = vsel %vm800_vm0, %v4063_v16, 0  ;;  %v481_v32 = vmul.f32 0.125, %v4106_v28  ;;  %v4060_v39 = vld [vmem:[%s4682_s30 + $0x48] sm:$0xff]  ;;  %v4165_v42 = vld [vmem:[%s4697_s6 + $0x10] sm:$0xff]  }
  0x20   : > { %v482_v33 = vmul.f32 0.125, %v4107_v29  ;;  %v880_v37 = vsel %vm800_vm0, %v4061_v31, 0  ;;  %v853_v40 = vsel %vm800_vm0, %v4052_v38, 0  ;;  %v877_v41 = vsel %vm800_vm0, %v4060_v39, 0  ;;  %v4051_v45 = vld [vmem:[%s4682_s30] sm:$0xff]  ;;  %v4166_v54 = vld [vmem:[%s4697_s6 + $0x18] sm:$0xff]  }
  0x21   : > { %v511_v19 = vpack.c.bf16 %v479_v17, %v479_v17  ;;  %v512_v20 = vpack.c.bf16 %v480_v18, %v480_v18  ;;  %v513_v34 = vpack.c.bf16 %v481_v32, %v481_v32  ;;  %v4110_v43 = vunpack.c.l.bf16 %v4165_v42  ;;  %v4059_v46 = vld [vmem:[%s4682_s30 + $0x40] sm:$0xff]  ;;  %v4169_v14 = vld [vmem:[%s4697_s6 + $0x30] sm:$0xff]   ;;  %s4528_s30 = sshra.s32 %s3606_s29, 4  ;;  %s4534_s7 = scalar_lea.hbm %s6549_s3, 1024  ;;  %s4529_s30 = int_to_ptr.hbm [resolvable:$true] %s4528_s30 }
  0x22   : > { %v514_v35 = vpack.c.bf16 %v482_v33, %v482_v33  ;;  %v4111_v44 = vunpack.c.h.bf16 %v4165_v42  ;;  %v850_v51 = vsel %vm800_vm0, %v4051_v45, 0  ;;  %v874_v52 = vsel %vm800_vm0, %v4059_v46, 0  ;;  %v4167_v62 = vld [vmem:[%s4697_s6 + $0x20] sm:$0xff]   ;;  %s4530_s4 = scalar_lea.hbm %s4529_s30, 512  ;;  %p4535_p1 = scmp.lt.s32.totalorder %s4529_s30, %s6549_s3 }
  0x23   : > { %544 = vst.msk [vmem:[#allocation4] sm:$0xf] %vm543_vm1, %v511_v19  ;;  %v483_v47 = vmul.f32 0.125, %v4110_v43  ;;  %v4114_v55 = vunpack.c.l.bf16 %v4166_v54  ;;  %v4115_v56 = vunpack.c.h.bf16 %v4166_v54  ;;  %v4118_v63 = vunpack.c.l.bf16 %v4167_v62  ;;  %v4171_v30 = vld [vmem:[%s4697_s6 + $0x40] sm:$0xff]   ;;  %p4531_p12 = scmp.ne.s32.totalorder %s4529_s30, %s4530_s4  ;;  %p4536_p2 = scmp.lt.s32.totalorder %s4534_s7, %s4530_s4 }
  0x24   : > { %898 = vmatpush.bf16.xpose.msra.mxu0 %v868_v6  ;;  %545 = vst.msk [vmem:[#allocation4 + $0x4] sm:$0xf] %vm543_vm1, %v512_v20  ;;  %v484_v48 = vmul.f32 0.125, %v4111_v44  ;;  %v4119_v0 = vunpack.c.h.bf16 %v4167_v62  ;;  %v4168_v6 = vld [vmem:[%s4697_s6 + $0x28] sm:$0xff]   ;;  %v4126_v15 = vunpack.c.l.bf16 %v4169_v14  ;;  %v4127_v16 = vunpack.c.h.bf16 %v4169_v14 }
  0x25   : > { %987 = vmatpush.bf16.xpose.msra.mxu1 %v892_v7  ;;  %546 = vst.msk [vmem:[#allocation4 + $0x8] sm:$0xf] %vm543_vm1, %v513_v34  ;;  %v515_v49 = vpack.c.bf16 %v483_v47, %v483_v47  ;;  %v485_v57 = vmul.f32 0.125, %v4114_v55  ;;  %v486_v58 = vmul.f32 0.125, %v4115_v56  ;;  %v487_v1 = vmul.f32 0.125, %v4118_v63  ;;  %p4532_p13 = pnand %p4531_p12, %p4659_p4  ;;  %p4537_p3 = por %p4536_p2, %p4535_p1 }
  0x26   : > { %547 = vst.msk [vmem:[#allocation4 + $0xc] sm:$0xf] %vm543_vm1, %v514_v35  ;;  %v516_v50 = vpack.c.bf16 %v484_v48, %v484_v48  ;;  %v488_v2 = vmul.f32 0.125, %v4119_v0  ;;  %v4122_v7 = vunpack.c.l.bf16 %v4168_v6  ;;  %v4123_v8 = vunpack.c.h.bf16 %v4168_v6 }
  0x27   : > { %548 = vst.msk [vmem:[#allocation4 + $0x10] sm:$0xf] %vm543_vm1, %v515_v49  ;;  %v517_v59 = vpack.c.bf16 %v485_v57, %v485_v57  ;;  %v518_v60 = vpack.c.bf16 %v486_v58, %v486_v58  ;;  %v519_v3 = vpack.c.bf16 %v487_v1, %v487_v1  ;;  %v491_v17 = vmul.f32 0.125, %v4126_v15  ;;  %p4533_p0 = pneg %p4532_p13 }
  0x28   : > { %549 = vst.msk [vmem:[#allocation4 + $0x14] sm:$0xf] %vm543_vm1, %v516_v50  ;;  %v520_v4 = vpack.c.bf16 %v488_v2, %v488_v2  ;;  %v489_v9 = vmul.f32 0.125, %v4122_v7  ;;  %v492_v18 = vmul.f32 0.125, %v4127_v16  ;;  %v4134_v31 = vunpack.c.l.bf16 %v4171_v30  ;;  %v4172_v50 = vld [vmem:[%s4697_s6 + $0x48] sm:$0xff]  }
  0x29   : > { %550 = vst.msk [vmem:[#allocation4 + $0x18] sm:$0xf] %vm543_vm1, %v517_v59  ;;  %v523_v19 = vpack.c.bf16 %v491_v17, %v491_v17  ;;  %v4135_v32 = vunpack.c.h.bf16 %v4171_v30  ;;  %v1077_v39 = vlaneseq  ;;  %p4538_p5 = pnand %p4537_p3, %p4533_p0 }
  0x2a   : > { %551 = vst.msk [vmem:[#allocation4 + $0x1c] sm:$0xf] %vm543_vm1, %v518_v60  ;;  %v524_v20 = vpack.c.bf16 %v492_v18, %v492_v18  ;;  %v495_v33 = vmul.f32 0.125, %v4134_v31 }
  0x2b   : > { %v4035_v53 = vld [vmem:[#allocation4] sm:$0xff]  ;;  %552 = vst.msk [vmem:[#allocation4 + $0x20] sm:$0xf] %vm543_vm1, %v519_v3  ;;  %v496_v34 = vmul.f32 0.125, %v4135_v32 }
  0x2c   : > { %899 = vmatpush.bf16.xpose.msra.mxu0 %v865_v10  ;;  %553 = vst.msk [vmem:[#allocation4 + $0x24] sm:$0xf] %vm543_vm1, %v520_v4  ;;  %v490_v10 = vmul.f32 0.125, %v4123_v8  ;;  %v527_v35 = vpack.c.bf16 %v495_v33, %v495_v33 }
  0x2d   : > { %988 = vmatpush.bf16.xpose.msra.mxu1 %v889_v11  ;;  %v4036_v61 = vld [vmem:[#allocation4 + $0x8] sm:$0xff]  ;;  %v521_v11 = vpack.c.bf16 %v489_v9, %v489_v9  ;;  %556 = vst.msk [vmem:[#allocation4 + $0x30] sm:$0xf] %vm543_vm1, %v523_v19 }
  0x2e   : > { %v522_v12 = vpack.c.bf16 %v490_v10, %v490_v10  ;;  %557 = vst.msk [vmem:[#allocation4 + $0x34] sm:$0xf] %vm543_vm1, %v524_v20 }
  0x2f   : > { %v4037_v5 = vld [vmem:[#allocation4 + $0x10] sm:$0xff]  ;;  %554 = vst.msk [vmem:[#allocation4 + $0x28] sm:$0xf] %vm543_vm1, %v521_v11 }
  0x30   : > { %555 = vst.msk [vmem:[#allocation4 + $0x2c] sm:$0xf] %vm543_vm1, %v522_v12 }
  0x31   : > { %v4038_v13 = vld [vmem:[#allocation4 + $0x18] sm:$0xff]  ;;  %560 = vst.msk [vmem:[#allocation4 + $0x40] sm:$0xf] %vm543_vm1, %v527_v35 }
  0x34   : > { %900 = vmatpush.bf16.xpose.msra.mxu0 %v862_v21  ;;  %v4039_v21 = vld [vmem:[#allocation4 + $0x20] sm:$0xff] }
  0x35   : > { %989 = vmatpush.bf16.xpose.msra.mxu1 %v886_v22  ;;  %v4170_v22 = vld [vmem:[%s4697_s6 + $0x38] sm:$0xff]  }
  0x36   : > { %v4130_v23 = vunpack.c.l.bf16 %v4170_v22  ;;  %v4131_v24 = vunpack.c.h.bf16 %v4170_v22 }
  0x37   : > { %v4040_v29 = vld [vmem:[#allocation4 + $0x28] sm:$0xff] }
  0x3c   : > { %901 = vmatpush.bf16.xpose.msra.mxu0 %v859_v25  ;;  %v493_v25 = vmul.f32 0.125, %v4130_v23  ;;  %v4173_v23 = vld [vmem:[%s4697_s6 + $0x50] sm:$0xff]  }
  0x3d   : > { %990 = vmatpush.bf16.xpose.msra.mxu1 %v883_v26  ;;  %v494_v26 = vmul.f32 0.125, %v4131_v24 }
  0x3e   : > { %v525_v27 = vpack.c.bf16 %v493_v25, %v493_v25 }
  0x3f   : > { %v526_v28 = vpack.c.bf16 %v494_v26, %v494_v26  ;;  %v4142_v26 = vunpack.c.l.bf16 %v4173_v23 }
  0x40   : > { %558 = vst.msk [vmem:[#allocation4 + $0x38] sm:$0xf] %vm543_vm1, %v525_v27  ;;  %v4143_v27 = vunpack.c.h.bf16 %v4173_v23 }
  0x41   : > { %559 = vst.msk [vmem:[#allocation4 + $0x3c] sm:$0xf] %vm543_vm1, %v526_v28  ;;  %v499_v30 = vmul.f32 0.125, %v4142_v26 }
  0x42   : > { %v500_v31 = vmul.f32 0.125, %v4143_v27 }
  0x43   : > { %v531_v32 = vpack.c.bf16 %v499_v30, %v499_v30 }
  0x44   : > { %902 = vmatpush.bf16.xpose.msra.mxu0 %v856_v36  ;;  %v528_v36 = vpack.c.bf16 %v496_v34, %v496_v34  ;;  %v532_v33 = vpack.c.bf16 %v500_v31, %v500_v31 }
  0x45   : > { %991 = vmatpush.bf16.xpose.msra.mxu1 %v880_v37  ;;  %v4041_v37 = vld [vmem:[#allocation4 + $0x30] sm:$0xff]  ;;  %564 = vst.msk [vmem:[#allocation4 + $0x50] sm:$0xf] %vm543_vm1, %v531_v32 }
  0x46   : > { %561 = vst.msk [vmem:[#allocation4 + $0x44] sm:$0xf] %vm543_vm1, %v528_v36  ;;  %v4594_v36 = vmov -inf  }
  0x47   : > { %565 = vst.msk [vmem:[#allocation4 + $0x54] sm:$0xf] %vm543_vm1, %v532_v33 }
  0x48   : > { %v4042_v38 = vld [vmem:[#allocation4 + $0x38] sm:$0xff]  ;;  %287 = vst.msk [vmem:[#allocation2] sm:$0xff] %vm286_vm3, %v4594_v36 }
  0x49   : > { %288 = vst.msk [vmem:[#allocation2 + $0x8] sm:$0xff] %vm286_vm3, %v4594_v36 }
  0x4a   : > { %289 = vst.msk [vmem:[#allocation2 + $0x10] sm:$0xff] %vm286_vm3, %v4594_v36 }
  0x4b   : > { %290 = vst.msk [vmem:[#allocation2 + $0x18] sm:$0xff] %vm286_vm3, %v4594_v36 }
  0x4c   : > { %903 = vmatpush.bf16.xpose.msra.mxu0 %v853_v40  ;;  %v1078_v40 = vand.u32 127, %v1077_v39  ;;  %291 = vst.msk [vmem:[#allocation2 + $0x20] sm:$0xff] %vm286_vm3, %v4594_v36 }
  0x4d   : > { %992 = vmatpush.bf16.xpose.msra.mxu1 %v877_v41  ;;  %v4043_v42 = vld [vmem:[#allocation4 + $0x40] sm:$0xff]  ;;  %292 = vst.msk [vmem:[#allocation2 + $0x28] sm:$0xff] %vm286_vm3, %v4594_v36 }
  0x4e   : > { %v4764_v41 = vadd.s32 128, %v1078_v40  ;;  %v4045_v39 = vld [vmem:[#allocation4 + $0x50] sm:$0xff]  ;;  %293 = vst.msk [vmem:[#allocation2 + $0x30] sm:$0xff] %vm286_vm3, %v4594_v36 }
  0x4f   : > { %294 = vst.msk [vmem:[#allocation2 + $0x38] sm:$0xff] %vm286_vm3, %v4594_v36 }
  0x50   : > { %vm1082_vm2 = vcmp.lt.s32.totalorder %v4764_v41, 200  ;;  %295 = vst.msk [vmem:[#allocation2 + $0x40] sm:$0xff] %vm286_vm3, %v4594_v36 }
  0x51   : > { %296 = vst.msk [vmem:[#allocation2 + $0x48] sm:$0xff] %vm286_vm3, %v4594_v36 }
  0x52   : > { %297 = vst.msk [vmem:[#allocation2 + $0x50] sm:$0xff] %vm286_vm3, %v4594_v36 }
  0x53   : > { %298 = vst.msk [vmem:[#allocation2 + $0x58] sm:$0xff] %vm286_vm3, %v4594_v36 }
  0x54   : > { %904 = vmatpush.bf16.xpose.msra.mxu0 %v850_v51  ;;  %299 = vst.msk [vmem:[#allocation2 + $0x60] sm:$0xff] %vm286_vm3, %v4594_v36 }
  0x55   : > { %993 = vmatpush.bf16.xpose.msra.mxu1 %v874_v52  ;;  %v4138_v52 = vunpack.c.l.bf16 %v4172_v50  ;;  %300 = vst.msk [vmem:[#allocation2 + $0x68] sm:$0xff] %vm286_vm3, %v4594_v36 }
  0x56   : > { %301 = vst.msk [vmem:[#allocation2 + $0x70] sm:$0xff] %vm286_vm3, %v4594_v36 }
  0x57   : > { %v497_v54 = vmul.f32 0.125, %v4138_v52  ;;  %302 = vst.msk [vmem:[#allocation2 + $0x78] sm:$0xff] %vm286_vm3, %v4594_v36 }
  0x58   : > { %303 = vst.msk [vmem:[#allocation2 + $0x80] sm:$0xff] %vm286_vm3, %v4594_v36 }
  0x59   : > { %v529_v56 = vpack.c.bf16 %v497_v54, %v497_v54  ;;  %304 = vst.msk [vmem:[#allocation2 + $0x88] sm:$0xff] %vm286_vm3, %v4594_v36 }
  0x5a   : > { %305 = vst.msk [vmem:[#allocation2 + $0x90] sm:$0xff] %vm286_vm3, %v4594_v36 }
  0x5b   : > { %3867 = vmatmul.msk.bf16.vlgmr.msra.gmra.mxu0 %vm800_vm0, %v4035_v53  ;;  %562 = vst.msk [vmem:[#allocation4 + $0x48] sm:$0xf] %vm543_vm1, %v529_v56 }
  0x5c   : > { %3883 = vmatmul.msk.bf16.vlgmr.msra.gmra.mxu1 %vm800_vm0, %v4035_v53  ;;  %v4139_v53 = vunpack.c.h.bf16 %v4172_v50  ;;  %306 = vst.msk [vmem:[#allocation2 + $0x98] sm:$0xff] %vm286_vm3, %v4594_v36 }
  0x5d   : > { %307 = vst.msk [vmem:[#allocation2 + $0xa0] sm:$0xff] %vm286_vm3, %v4594_v36 }
  0x5e   : > { %v498_v55 = vmul.f32 0.125, %v4139_v53  ;;  %308 = vst.msk [vmem:[#allocation2 + $0xa8] sm:$0xff] %vm286_vm3, %v4594_v36 }
  0x5f   : > { %309 = vst.msk [vmem:[#allocation2 + $0xb0] sm:$0xff] %vm286_vm3, %v4594_v36 }
  0x60   : > { %v530_v57 = vpack.c.bf16 %v498_v55, %v498_v55  ;;  %310 = vst.msk [vmem:[#allocation2 + $0xb8] sm:$0xff] %vm286_vm3, %v4594_v36 }
  0x61   : > { %311 = vst.msk [vmem:[#allocation2 + $0xc0] sm:$0xff] %vm286_vm3, %v4594_v36 }
  0x62   : > { %563 = vst.msk [vmem:[#allocation4 + $0x4c] sm:$0xf] %vm543_vm1, %v530_v57  ;;  %v4595_v57 = vmov 0  }
  0x63   : > { %312 = vst.msk [vmem:[#allocation2 + $0xc8] sm:$0xff] %vm286_vm3, %v4594_v36  ;;  %4255 = vset.pattern.permute.xlu2 %v4595_v57  ;;  %4256 = vset.pattern.permute.xlu0 %v4595_v57 }
  0x64   : > { %313 = vst.msk [vmem:[#allocation2 + $0xd0] sm:$0xff] %vm286_vm3, %v4594_v36  ;;  %4257 = vset.pattern.permute.xlu1 %v4595_v57 }
  0x65   : > { %314 = vst.msk [vmem:[#allocation2 + $0xd8] sm:$0xff] %vm286_vm3, %v4594_v36 }
  0x66   : > { %315 = vst.msk [vmem:[#allocation2 + $0xe0] sm:$0xff] %vm286_vm3, %v4594_v36 }
  0x67   : > { %316 = vst.msk [vmem:[#allocation2 + $0xe8] sm:$0xff] %vm286_vm3, %v4594_v36 }
  0x68   : > { %317 = vst.msk [vmem:[#allocation2 + $0xf0] sm:$0xff] %vm286_vm3, %v4594_v36 }
  0x69   : > { %v4044_v0 = vld [vmem:[#allocation4 + $0x48] sm:$0xff]  ;;  %318 = vst.msk [vmem:[#allocation2 + $0xf8] sm:$0xff] %vm286_vm3, %v4594_v36 }
  0x6b   : > { %3868 = vmatmul.msk.bf16.gmra.mxu0 %vm800_vm0, %v4036_v61 }
  0x6c   : > { %3884 = vmatmul.msk.bf16.gmra.mxu1 %vm800_vm0, %v4036_v61 }
  0x7b   : > { %3869 = vmatmul.msk.bf16.gmra.mxu0 %vm800_vm0, %v4037_v5 }
  0x7c   : > { %3885 = vmatmul.msk.bf16.gmra.mxu1 %vm800_vm0, %v4037_v5 }
  0x8b   : > { %3870 = vmatmul.msk.bf16.gmra.mxu0 %vm800_vm0, %v4038_v13 }
  0x8c   : > { %3886 = vmatmul.msk.bf16.gmra.mxu1 %vm800_vm0, %v4038_v13 }
  0x9b   : > { %3871 = vmatmul.msk.bf16.gmra.mxu0 %vm800_vm0, %v4039_v21 }
  0x9c   : > { %3887 = vmatmul.msk.bf16.gmra.mxu1 %vm800_vm0, %v4039_v21 }
  0xab   : > { %3872 = vmatmul.msk.bf16.gmra.mxu0 %vm800_vm0, %v4040_v29 }
  0xac   : > { %3888 = vmatmul.msk.bf16.gmra.mxu1 %vm800_vm0, %v4040_v29 }
  0xbb   : > { %3873 = vmatmul.msk.bf16.gmra.mxu0 %vm800_vm0, %v4041_v37 }
  0xbc   : > { %3889 = vmatmul.msk.bf16.gmra.mxu1 %vm800_vm0, %v4041_v37 }
  0xcb   : > { %3874 = vmatmul.msk.bf16.gmra.mxu0 %vm800_vm0, %v4042_v38 }
  0xcc   : > { %3890 = vmatmul.msk.bf16.gmra.mxu1 %vm800_vm0, %v4042_v38 }
  0xd8   : > { %v4767_v43 = vpop.f32.mrf.mxu0 }
  0xd9   : > { %v995_v44 = vpop.f32.mrf.mxu1 }
  0xda   : > { %v4771_v45 = vsel %vm1082_vm2, %v995_v44, -1e+30 }
  0xdb   : > { %v1179_v46 = vmax.f32 %v4767_v43, %v4771_v45  ;;  %3875 = vmatmul.msk.bf16.gmra.mxu0 %vm800_vm0, %v4043_v42 }
  0xdc   : > { %3891 = vmatmul.msk.bf16.gmra.mxu1 %vm800_vm0, %v4043_v42 }
  0xdd   : > { %1180 = vmax.xlane.f32.xlu0 %v1179_v46 }
  0xe0   : > { %v4777_v47 = vpop.f32.mrf.mxu0 }
  0xe1   : > { %v997_v48 = vpop.f32.mrf.mxu1 }
  0xe2   : > { %v4781_v49 = vsel %vm1082_vm2, %v997_v48, -1e+30 }
  0xe3   : > { %v1182_v51 = vmax.f32 %v4777_v47, %v4781_v49 }
  0xe5   : > { %1183 = vmax.xlane.f32.xlu0 %v1182_v51 }
  0xe8   : > { %v4786_v58 = vpop.f32.mrf.mxu0 }
  0xe9   : > { %v1000_v59 = vpop.f32.mrf.mxu1 }
  0xea   : > { %v4791_v60 = vsel %vm1082_vm2, %v1000_v59, -1e+30 }
  0xeb   : > { %v1185_v61 = vmax.f32 %v4786_v58, %v4791_v60  ;;  %3876 = vmatmul.msk.bf16.gmra.mxu0 %vm800_vm0, %v4044_v0 }
  0xec   : > { %3892 = vmatmul.msk.bf16.gmra.mxu1 %vm800_vm0, %v4044_v0 }
  0xed   : > { %1186 = vmax.xlane.f32.xlu1 %v1185_v61 }
  0xf0   : > { %v4796_v62 = vpop.f32.mrf.mxu0 }
  0xf1   : > { %v1002_v63 = vpop.f32.mrf.mxu1 }
  0xf2   : > { %v4800_v1 = vsel %vm1082_vm2, %v1002_v63, -1e+30  ;;  %v4596_v63 = vmov 0.0  }
  0xf3   : > { %v1188_v2 = vmax.f32 %v4796_v62, %v4800_v1  ;;  %319 = vst.msk [vmem:[#allocation3] sm:$0xff] %vm286_vm3, %v4596_v63 }
  0xf4   : > { %320 = vst.msk [vmem:[#allocation3 + $0x8] sm:$0xff] %vm286_vm3, %v4596_v63 }
  0xf5   : > { %1189 = vmax.xlane.f32.xlu1 %v1188_v2  ;;  %v4174_v2 = vld [vmem:[%s4697_s6 + $0x58] sm:$0xff]   ;;  %321 = vst.msk [vmem:[#allocation3 + $0x10] sm:$0xff] %vm286_vm3, %v4596_v63 }
  0xf6   : > { %322 = vst.msk [vmem:[#allocation3 + $0x18] sm:$0xff] %vm286_vm3, %v4596_v63 }
  0xf7   : > { %323 = vst.msk [vmem:[#allocation3 + $0x20] sm:$0xff] %vm286_vm3, %v4596_v63 }
  0xf8   : > { %v4806_v3 = vpop.f32.mrf.mxu0  ;;  %324 = vst.msk [vmem:[#allocation3 + $0x28] sm:$0xff] %vm286_vm3, %v4596_v63 }
  0xf9   : > { %v1005_v4 = vpop.f32.mrf.mxu1  ;;  %325 = vst.msk [vmem:[#allocation3 + $0x30] sm:$0xff] %vm286_vm3, %v4596_v63 }
  0xfa   : > { %v4810_v5 = vsel %vm1082_vm2, %v1005_v4, -1e+30  ;;  %326 = vst.msk [vmem:[#allocation3 + $0x38] sm:$0xff] %vm286_vm3, %v4596_v63 }
  0xfb   : > { %v1191_v6 = vmax.f32 %v4806_v3, %v4810_v5  ;;  %3877 = vmatmul.msk.bf16.gmra.mxu0 %vm800_vm0, %v4045_v39  ;;  %327 = vst.msk [vmem:[#allocation3 + $0x40] sm:$0xff] %vm286_vm3, %v4596_v63 }
  0xfc   : > { %3893 = vmatmul.msk.bf16.gmra.mxu1 %vm800_vm0, %v4045_v39  ;;  %328 = vst.msk [vmem:[#allocation3 + $0x48] sm:$0xff] %vm286_vm3, %v4596_v63 }
  0xfd   : > { %1192 = vmax.xlane.f32.xlu2 %v1191_v6  ;;  %v4146_v6 = vunpack.c.l.bf16 %v4174_v2  ;;  %329 = vst.msk [vmem:[#allocation3 + $0x50] sm:$0xff] %vm286_vm3, %v4596_v63 }
  0xfe   : > { %330 = vst.msk [vmem:[#allocation3 + $0x58] sm:$0xff] %vm286_vm3, %v4596_v63 }
  0xff   : > { %331 = vst.msk [vmem:[#allocation3 + $0x60] sm:$0xff] %vm286_vm3, %v4596_v63 }
 0x100   : > { %v4814_v7 = vpop.f32.mrf.mxu0  ;;  %332 = vst.msk [vmem:[#allocation3 + $0x68] sm:$0xff] %vm286_vm3, %v4596_v63 }
 0x101   : > { %v1007_v8 = vpop.f32.mrf.mxu1  ;;  %333 = vst.msk [vmem:[#allocation3 + $0x70] sm:$0xff] %vm286_vm3, %v4596_v63 }
 0x102   : > { %v4818_v9 = vsel %vm1082_vm2, %v1007_v8, -1e+30  ;;  %v4147_v8 = vunpack.c.h.bf16 %v4174_v2  ;;  %334 = vst.msk [vmem:[#allocation3 + $0x78] sm:$0xff] %vm286_vm3, %v4596_v63  ;;  %v5039_v2 = vld [vmem:[#allocation2 + $0x20] sm:$0xff] }
 0x103   : > { %v1194_v10 = vmax.f32 %v4814_v7, %v4818_v9  ;;  %335 = vst.msk [vmem:[#allocation3 + $0x80] sm:$0xff] %vm286_vm3, %v4596_v63 }
 0x104   : > { %336 = vst.msk [vmem:[#allocation3 + $0x88] sm:$0xff] %vm286_vm3, %v4596_v63 }
 0x105   : > { %1195 = vmax.xlane.f32.xlu2 %v1194_v10  ;;  %v501_v10 = vmul.f32 0.125, %v4146_v6  ;;  %337 = vst.msk [vmem:[#allocation3 + $0x90] sm:$0xff] %vm286_vm3, %v4596_v63 }
 0x106   : > { %338 = vst.msk [vmem:[#allocation3 + $0x98] sm:$0xff] %vm286_vm3, %v4596_v63 }
 0x107   : > { %339 = vst.msk [vmem:[#allocation3 + $0xa0] sm:$0xff] %vm286_vm3, %v4596_v63 }
 0x108   : > { %v4822_v11 = vpop.f32.mrf.mxu0  ;;  %340 = vst.msk [vmem:[#allocation3 + $0xa8] sm:$0xff] %vm286_vm3, %v4596_v63 }
 0x109   : > { %v1010_v12 = vpop.f32.mrf.mxu1  ;;  %341 = vst.msk [vmem:[#allocation3 + $0xb0] sm:$0xff] %vm286_vm3, %v4596_v63 }
 0x10a   : > { %v4826_v13 = vsel %vm1082_vm2, %v1010_v12, -1e+30  ;;  %v502_v12 = vmul.f32 0.125, %v4147_v8  ;;  %342 = vst.msk [vmem:[#allocation3 + $0xb8] sm:$0xff] %vm286_vm3, %v4596_v63 }
 0x10b   : > { %v1197_v14 = vmax.f32 %v4822_v11, %v4826_v13  ;;  %343 = vst.msk [vmem:[#allocation3 + $0xc0] sm:$0xff] %vm286_vm3, %v4596_v63 }
 0x10c   : > { %344 = vst.msk [vmem:[#allocation3 + $0xc8] sm:$0xff] %vm286_vm3, %v4596_v63 }
 0x10d   : > { %1198 = vmax.xlane.f32.xlu0 %v1197_v14  ;;  %v1147_v14 = vld [vmem:[#allocation2] sm:$0xff]  ;;  %345 = vst.msk [vmem:[#allocation3 + $0xd0] sm:$0xff] %vm286_vm3, %v4596_v63 }
 0x10e   : > { %346 = vst.msk [vmem:[#allocation3 + $0xd8] sm:$0xff] %vm286_vm3, %v4596_v63 }
 0x10f   : > { %347 = vst.msk [vmem:[#allocation3 + $0xe0] sm:$0xff] %vm286_vm3, %v4596_v63 }
 0x110   : > { %v4830_v15 = vpop.f32.mrf.mxu0  ;;  %348 = vst.msk [vmem:[#allocation3 + $0xe8] sm:$0xff] %vm286_vm3, %v4596_v63 }
 0x111   : > { %v1012_v16 = vpop.f32.mrf.mxu1  ;;  %349 = vst.msk [vmem:[#allocation3 + $0xf0] sm:$0xff] %vm286_vm3, %v4596_v63 }
 0x112   : > { %v4834_v17 = vsel %vm1082_vm2, %v1012_v16, -1e+30  ;;  %v533_v16 = vpack.c.bf16 %v501_v10, %v501_v10  ;;  %350 = vst.msk [vmem:[#allocation3 + $0xf8] sm:$0xff] %vm286_vm3, %v4596_v63  ;;  %v5053_v63 = vld [vmem:[#allocation2 + $0x28] sm:$0xff] }
 0x113   : > { %v1200_v18 = vmax.f32 %v4830_v15, %v4834_v17 }
 0x114   : > { %566 = vst.msk [vmem:[#allocation4 + $0x58] sm:$0xf] %vm543_vm1, %v533_v16 }
 0x115   : > { %1201 = vmax.xlane.f32.xlu1 %v1200_v18  ;;  %v534_v18 = vpack.c.bf16 %v502_v12, %v502_v12 }
 0x117   : > { %567 = vst.msk [vmem:[#allocation4 + $0x5c] sm:$0xf] %vm543_vm1, %v534_v18 }
 0x118   : > { %v4838_v19 = vpop.f32.mrf.mxu0 }
 0x119   : > { %v1015_v20 = vpop.f32.mrf.mxu1 }
 0x11a   : > { %v4842_v21 = vsel %vm1082_vm2, %v1015_v20, -1e+30 }
 0x11b   : > { %v1203_v22 = vmax.f32 %v4838_v19, %v4842_v21 }
 0x11d   : > { %1204 = vmax.xlane.f32.xlu2 %v1203_v22 }
 0x120   : > { %v4847_v24 = vpop.f32.mrf.mxu0 }
 0x121   : > { %v1017_v25 = vpop.f32.mrf.mxu1 }
 0x122   : > { %v4851_v28 = vsel %vm1082_vm2, %v1017_v25, -1e+30 }
 0x123   : > { %v1206_v29 = vmax.f32 %v4847_v24, %v4851_v28 }
 0x125   : > { %1207 = vmax.xlane.f32.xlu0 %v1206_v29  ;;  %v4963_v29 = vld [vmem:[#allocation2 + $0x8] sm:$0xff] }
 0x128   : > { %v4857_v34 = vpop.f32.mrf.mxu0 }
 0x129   : > { %v1020_v35 = vpop.f32.mrf.mxu1 }
 0x12a   : > { %v4862_v37 = vsel %vm1082_vm2, %v1020_v35, -1e+30  ;;  %v4046_v35 = vld [vmem:[#allocation4 + $0x58] sm:$0xff] }
 0x12b   : > { %v1209_v38 = vmax.f32 %v4857_v34, %v4862_v37  ;;  %3894 = vmatmul.msk.bf16.gmra.mxu1 %vm800_vm0, %v4046_v35  ;;  %3878 = vmatmul.msk.bf16.gmra.mxu0 %vm800_vm0, %v4046_v35 }
 0x12d   : > { %1210 = vmax.xlane.f32.xlu1 %v1209_v38 }
 0x130   : > { %v4873_v40 = vpop.f32.mrf.mxu0 }
 0x131   : > { %v1022_v42 = vpop.f32.mrf.mxu1 }
 0x132   : > { %v4880_v44 = vsel %vm1082_vm2, %v1022_v42, -1e+30  ;;  %v4996_v42 = vld [vmem:[#allocation2 + $0x10] sm:$0xff] }
 0x133   : > { %v1212_v46 = vmax.f32 %v4873_v40, %v4880_v44 }
 0x135   : > { %1213 = vmax.xlane.f32.xlu2 %v1212_v46 }
 0x138   : > { %v4891_v48 = vpop.f32.mrf.mxu0 }
 0x139   : > { %6654 = vst [vmem:[#allocation8_spill] sm:$0xff] %v4891_v48  ;;  %v1025_v50 = vpop.f32.mrf.mxu1 }
 0x13a   : > { %v4896_v51 = vsel %vm1082_vm2, %v1025_v50, -1e+30 }
 0x13b   : > { %6655 = vst [vmem:[#allocation9_spill] sm:$0xff] %v4896_v51  ;;  %v1215_v52 = vmax.f32 %v4891_v48, %v4896_v51 }
 0x13d   : > { %1216 = vmax.xlane.f32.xlu0 %v1215_v52  ;;  %v5017_v52 = vld [vmem:[#allocation2 + $0x18] sm:$0xff] }
 0x140   : > { %v4907_v53 = vpop.f32.mrf.mxu0 }
 0x141   : > { %v1027_v54 = vpop.f32.mrf.mxu1 }
 0x142   : > { %v4912_v55 = vsel %vm1082_vm2, %v1027_v54, -1e+30 }
 0x143   : > { %6656 = vst [vmem:[#allocation10_spill] sm:$0xff] %v4912_v55  ;;  %v1218_v56 = vmax.f32 %v4907_v53, %v4912_v55 }
 0x145   : > { %1219 = vmax.xlane.f32.xlu1 %v1218_v56 }
 0x148   : > { %v4923_v59 = vpop.f32.mrf.mxu0 }
 0x149   : > { %6657 = vst [vmem:[#allocation11_spill] sm:$0xff] %v4923_v59  ;;  %v1030_v61 = vpop.f32.mrf.mxu1 }
 0x14a   : > { %v4929_v0 = vsel %vm1082_vm2, %v1030_v61, -1e+30  ;;  %v6729_v41 = vld [vmem:[#allocation10_spill] sm:$0xff] }
 0x14b   : > { %6658 = vst [vmem:[#allocation12_spill] sm:$0xff] %v4929_v0  ;;  %v1221_v4 = vmax.f32 %v4923_v59, %v4929_v0  ;;  %v4078_v0 = vld [vmem:[%s5150_s10 + $0x54] sm:$0xf0] }
 0x14d   : > { %1222 = vmax.xlane.f32.xlu2 %v1221_v4  ;;  %v4175_v4 = vld [vmem:[%s4697_s6 + $0x60] sm:$0xff]  }
 0x14e   : > { %v4150_v6 = vunpack.c.l.bf16 %v4175_v4  ;;  %v4151_v8 = vunpack.c.h.bf16 %v4175_v4 }
 0x150   : > { %v1181_v20 = vpop.xlane.xlu0 %1180  ;;  %v4948_v23 = vpop.f32.mrf.mxu0  ;;  %v504_v16 = vmul.f32 0.125, %v4151_v8 }
 0x151   : > { %v1275_v22 = vmax.f32 %v1147_v14, %v1181_v20  ;;  %6659 = vst [vmem:[#allocation13_spill] sm:$0xff] %v4948_v23  ;;  %v1032_v25 = vpop.f32.mrf.mxu1 }
 0x152   : > { %v4953_v26 = vsel %vm1082_vm2, %v1032_v25, -1e+30  ;;  %v536_v20 = vpack.c.bf16 %v504_v16, %v504_v16 }
 0x153   : > { %6660 = vst [vmem:[#allocation14_spill] sm:$0xff] %v4953_v26  ;;  %v1224_v27 = vmax.f32 %v4948_v23, %v4953_v26  ;;  %v1307_v54 = vsub.f32 %v1147_v14, %v1275_v22  ;;  %v503_v14 = vmul.f32 0.125, %v4150_v6 }
 0x154   : > { %3136 = vst.msk [vmem:[#allocation2] sm:$0xff] %vm286_vm3, %v1275_v22 }
 0x155   : > { %1225 = vmax.xlane.f32.xlu0 %v1224_v27  ;;  %v1339_v61 = vmul.f32 1.442695, %v1307_v54  ;;  %v535_v18 = vpack.c.bf16 %v503_v14, %v503_v14  ;;  %569 = vst.msk [vmem:[#allocation4 + $0x64] sm:$0xf] %vm543_vm1, %v536_v20  ;;  %v5093_v20 = vld [vmem:[#allocation2 + $0x40] sm:$0xff] }
 0x157   : > { %4258 = vpow2.f32 %v1339_v61  ;;  %568 = vst.msk [vmem:[#allocation4 + $0x60] sm:$0xf] %vm543_vm1, %v535_v18  ;;  %v4176_v18 = vld [vmem:[%s4697_s6 + $0x68] sm:$0xff]  }
 0x158   : > { %v1184_v30 = vpop.xlane.xlu0 %1183  ;;  %v4974_v33 = vpop.f32.mrf.mxu0 }
 0x159   : > { %v4972_v31 = vmax.f32 %v4963_v29, %v1184_v30  ;;  %v1035_v32 = vpop.f32.mrf.mxu1  ;;  %6661 = vst [vmem:[#allocation15_spill] sm:$0xff] %v4974_v33 }
 0x15a   : > { %v4980_v36 = vsel %vm1082_vm2, %v1035_v32, -1e+30  ;;  %v5062_v32 = vld [vmem:[#allocation2 + $0x30] sm:$0xff] }
 0x15b   : > { %6662 = vst [vmem:[#allocation16_spill] sm:$0xff] %v4980_v36  ;;  %v1227_v39 = vmax.f32 %v4974_v33, %v4980_v36 }
 0x15c   : > { %3137 = vst.msk [vmem:[#allocation2 + $0x8] sm:$0xff] %vm286_vm3, %v4972_v31 }
 0x15d   : > { %1228 = vmax.xlane.f32.xlu1 %v1227_v39 }
 0x15e   : > { %v4047_v30 = vld [vmem:[#allocation4 + $0x60] sm:$0xff] }
 0x15f   : > { %3895 = vmatmul.msk.bf16.gmra.mxu1 %vm800_vm0, %v4047_v30  ;;  %3879 = vmatmul.msk.bf16.gmra.mxu0 %vm800_vm0, %v4047_v30  ;;  %v4155_v30 = vunpack.c.h.bf16 %v4176_v18 }
 0x160   : > { %v1187_v46 = vpop.xlane.xlu1 %1186  ;;  %v5071_v54 = vpop.f32.mrf.mxu0 }
 0x161   : > { %v5005_v50 = vmax.f32 %v4996_v42, %v1187_v46  ;;  %v1037_v46 = vpop.f32.mrf.mxu1  ;;  %6664 = vst [vmem:[#allocation18_spill] sm:$0xff] %v5071_v54  ;;  %v506_v38 = vmul.f32 0.125, %v4155_v30 }
 0x162   : > { %v5077_v4 = vsel %vm1082_vm2, %v1037_v46, -1e+30 }
 0x163   : > { %3138 = vst.msk [vmem:[#allocation2 + $0x10] sm:$0xff] %vm286_vm3, %v5005_v50 }
 0x164   : > { %6665 = vst [vmem:[#allocation19_spill] sm:$0xff] %v5077_v4 }
 0x165   : > { %1405 = vperm.xlu2 %4255, %v1275_v22   ;;  %v5049_v22 = vpop.eup %4258 }
 0x166   : > { %6663 = vst [vmem:[#allocation17_spill] sm:$0xff] %v5049_v22 }
 0x168   : > { %v1190_v56 = vpop.xlane.xlu1 %1189  ;;  %v5090_v16 = vpop.f32.mrf.mxu0 }
 0x169   : > { %v5026_v57 = vmax.f32 %v5017_v52, %v1190_v56  ;;  %1410 = vperm.xlu0 %4256, %v4972_v31   ;;  %v5073_v56 = vld [vmem:[#allocation2 + $0x38] sm:$0xff]  ;;  %v1040_v8 = vpop.f32.mrf.mxu1  ;;  %6667 = vst [vmem:[#allocation21_spill] sm:$0xff] %v5090_v16 }
 0x16a   : > { %v5088_v14 = vsel %vm1082_vm2, %v1040_v8, -1e+30  ;;  %v538_v8 = vpack.c.bf16 %v506_v38, %v506_v38  ;;  %v6668_v38 = vsub.f32 %v4963_v29, %v4972_v31 }
 0x16b   : > { %3139 = vst.msk [vmem:[#allocation2 + $0x18] sm:$0xff] %vm286_vm3, %v5026_v57 }
 0x16c   : > { %6666 = vst [vmem:[#allocation20_spill] sm:$0xff] %v5088_v14 }
 0x16d   : > { %571 = vst.msk [vmem:[#allocation4 + $0x6c] sm:$0xf] %vm543_vm1, %v538_v8 }
 0x170   : > { %v1193_v10 = vpop.xlane.xlu2 %1192 }
 0x171   : > { %v5045_v12 = vmax.f32 %v5039_v2, %v1193_v10  ;;  %v1230_v10 = vmax.f32 %v5071_v54, %v5077_v4  ;;  %v1042_v8 = vpop.f32.mrf.mxu1 }
 0x173   : > { %3140 = vst.msk [vmem:[#allocation2 + $0x20] sm:$0xff] %vm286_vm3, %v5045_v12  ;;  %v1311_v29 = vsub.f32 %v5039_v2, %v5045_v12 }
 0x176   : > { %2786 = vperm.xlu1 %4257, %v5049_v22   ;;  %v4013_v22 = vld [vmem:[%s5150_s10 + $0xe0] sm:$0xf] }
 0x178   : > { %v1196_v25 = vpop.xlane.xlu2 %1195 }
 0x179   : > { %v5057_v27 = vmax.f32 %v5053_v63, %v1196_v25  ;;  %v4154_v25 = vunpack.c.l.bf16 %v4176_v18  ;;  %v1309_v18 = vsub.f32 %v4996_v42, %v5005_v50  ;;  %v4177_v42 = vld [vmem:[%s4697_s6 + $0x70] sm:$0xff]  }
 0x17b   : > { %3141 = vst.msk [vmem:[#allocation2 + $0x28] sm:$0xff] %vm286_vm3, %v5057_v27 }
 0x17e   : > { %1415 = vperm.xlu1 %4257, %v5005_v50   ;;  %v4158_v50 = vunpack.c.l.bf16 %v4177_v42 }
 0x180   : > { %v1199_v35 = vpop.xlane.xlu0 %1198 }
 0x181   : > { %v5067_v39 = vmax.f32 %v5062_v32, %v1199_v35  ;;  %v1233_v35 = vmax.f32 %v5090_v16, %v5088_v14  ;;  %v5130_v14 = vpop.f32.mrf.mxu0 }
 0x182   : > { %6670 = vst [vmem:[#allocation23_spill] sm:$0xff] %v5130_v14 }
 0x183   : > { %3142 = vst.msk [vmem:[#allocation2 + $0x30] sm:$0xff] %vm286_vm3, %v5067_v39 }
 0x188   : > { %v1202_v61 = vpop.xlane.xlu1 %1201 }
 0x189   : > { %v5080_v6 = vmax.f32 %v5073_v56, %v1202_v61  ;;  %v505_v61 = vmul.f32 0.125, %v4154_v25 }
 0x18b   : > { %3143 = vst.msk [vmem:[#allocation2 + $0x38] sm:$0xff] %vm286_vm3, %v5080_v6  ;;  %v537_v54 = vpack.c.bf16 %v505_v61, %v505_v61  ;;  %v5116_v61 = vld [vmem:[#allocation2 + $0x50] sm:$0xff] }
 0x18d   : > { %570 = vst.msk [vmem:[#allocation4 + $0x68] sm:$0xf] %vm543_vm1, %v537_v54 }
 0x18e   : > { %1231 = vmax.xlane.f32.xlu2 %v1230_v10  ;;  %v5104_v10 = vld [vmem:[#allocation2 + $0x48] sm:$0xff] }
 0x190   : > { %v1205_v46 = vpop.xlane.xlu2 %1204 }
 0x191   : > { %v5098_v4 = vmax.f32 %v5093_v20, %v1205_v46  ;;  %v1341_v46 = vmul.f32 1.442695, %v6668_v38  ;;  %v5128_v38 = vsel %vm1082_vm2, %v1042_v8, -1e+30  ;;  %v5143_v8 = vld [vmem:[#allocation2 + $0x58] sm:$0xff] }
 0x192   : > { %6669 = vst [vmem:[#allocation22_spill] sm:$0xff] %v5128_v38  ;;  %v1236_v2 = vmax.f32 %v5130_v14, %v5128_v38  ;;  %v4178_v38 = vld [vmem:[%s4697_s6 + $0x78] sm:$0xff]  }
 0x193   : > { %3144 = vst.msk [vmem:[#allocation2 + $0x40] sm:$0xff] %vm286_vm3, %v5098_v4  ;;  %1234 = vmax.xlane.f32.xlu0 %v1233_v35  ;;  %v1343_v35 = vmul.f32 1.442695, %v1309_v18  ;;  %4260 = vpow2.f32 %v1341_v46  ;;  %v4162_v14 = vunpack.c.l.bf16 %v4178_v38 }
 0x194   : > { %v4048_v54 = vld [vmem:[#allocation4 + $0x68] sm:$0xff] }
 0x195   : > { %3880 = vmatmul.msk.bf16.gmra.mxu0 %vm800_vm0, %v4048_v54  ;;  %3896 = vmatmul.msk.bf16.gmra.mxu1 %vm800_vm0, %v4048_v54  ;;  %4262 = vpow2.f32 %v1343_v35  ;;  %v507_v54 = vmul.f32 0.125, %v4158_v50 }
 0x197   : > { %v539_v46 = vpack.c.bf16 %v507_v54, %v507_v54  ;;  %v4021_v54 = vld [vmem:[%s5150_s10 + $0xf0] sm:$0xf] }
 0x198   : > { %v1208_v25 = vpop.xlane.xlu0 %1207 }
 0x199   : > { %v5109_v30 = vmax.f32 %v5104_v10, %v1208_v25  ;;  %v4159_v25 = vunpack.c.h.bf16 %v4177_v42  ;;  %v1347_v42 = vmul.f32 1.442695, %v1311_v29  ;;  %v5136_v26 = vpop.eup %4260  ;;  %572 = vst.msk [vmem:[#allocation4 + $0x70] sm:$0xf] %vm543_vm1, %v539_v46  ;;  %v4082_v29 = vld [vmem:[%s5150_s10 + $0x74] sm:$0xf0] }
 0x19a   : > { %6671 = vst [vmem:[#allocation24_spill] sm:$0xff] %v5136_v26 }
 0x19b   : > { %3145 = vst.msk [vmem:[#allocation2 + $0x48] sm:$0xff] %vm286_vm3, %v5109_v30  ;;  %v508_v16 = vmul.f32 0.125, %v4159_v25  ;;  %4264 = vpow2.f32 %v1347_v42  ;;  %v3957_v25 = vld [vmem:[%s5150_s10 + $0x70] sm:$0xf]  ;;  %v4098_v42 = vld [vmem:[%s5150_s10 + $0xf4] sm:$0xf0] }
 0x19d   : > { %v540_v35 = vpack.c.bf16 %v508_v16, %v508_v16 }
 0x19f   : > { %573 = vst.msk [vmem:[#allocation4 + $0x74] sm:$0xf] %vm543_vm1, %v540_v35  ;;  %v3958_v35 = vor.u32 %v4082_v29, %v3957_v25  ;;  %v3949_v25 = vld [vmem:[%s5150_s10 + $0x60] sm:$0xf]  ;;  %v4080_v29 = vld [vmem:[%s5150_s10 + $0x64] sm:$0xf0] }
 0x1a0   : > { %v1211_v31 = vpop.xlane.xlu1 %1210 }
 0x1a1   : > { %v5124_v18 = vmax.f32 %v5116_v61, %v1211_v31  ;;  %v5139_v31 = vpop.eup %4262  ;;  %2364 = vmatpush.bf16.msrb.mxu0 %v3958_v35  ;;  %4179 = vmatpush.bf16.msra.mxu2 %v3958_v35  ;;  %v4076_v35 = vld [vmem:[%s5150_s10 + $0x44] sm:$0xf0] }
 0x1a2   : > { %6672 = vst [vmem:[#allocation25_spill] sm:$0xff] %v5139_v31 }
 0x1a3   : > { %3146 = vst.msk [vmem:[#allocation2 + $0x50] sm:$0xff] %vm286_vm3, %v5124_v18 }
 0x1a6   : > { %2791 = vperm.xlu2 %4255, %v5136_v26   ;;  %v4049_v46 = vld [vmem:[#allocation4 + $0x70] sm:$0xff]  ;;  %v5164_v26 = vld [vmem:[#allocation2 + $0x60] sm:$0xff] }
 0x1a7   : > { %2796 = vperm.xlu0 %4256, %v5139_v31   ;;  %3881 = vmatmul.msk.bf16.gmra.mxu0 %vm800_vm0, %v4049_v46  ;;  %v4163_v31 = vunpack.c.h.bf16 %v4178_v38  ;;  %v1310_v38 = vsub.f32 %v5017_v52, %v5026_v57 }
 0x1a8   : > { %v1214_v16 = vpop.xlane.xlu2 %1213  ;;  %1237 = vmax.xlane.f32.xlu1 %v1236_v2  ;;  %v5161_v2 = vpop.eup %4264  ;;  %3897 = vmatmul.msk.bf16.gmra.mxu1 %vm800_vm0, %v4049_v46 }
 0x1a9   : > { %v5153_v50 = vmax.f32 %v5143_v8, %v1214_v16  ;;  %6673 = vst [vmem:[#allocation26_spill] sm:$0xff] %v5161_v2  ;;  %v4022_v16 = vor.u32 %v4098_v42, %v4021_v54  ;;  %v3950_v54 = vor.u32 %v4080_v29, %v3949_v25  ;;  %v4096_v42 = vld [vmem:[%s5150_s10 + $0xe4] sm:$0xf0]  ;;  %v510_v33 = vmul.f32 0.125, %v4163_v31  ;;  %v4005_v25 = vld [vmem:[%s5150_s10 + $0xd0] sm:$0xf] }
 0x1aa   : > { %v4014_v46 = vor.u32 %v4096_v42, %v4013_v22  ;;  %v4094_v31 = vld [vmem:[%s5150_s10 + $0xd4] sm:$0xf0]  ;;  %v1345_v52 = vmul.f32 1.442695, %v1310_v38  ;;  %v4092_v29 = vld [vmem:[%s5150_s10 + $0xc4] sm:$0xf0] }
 0x1ab   : > { %3147 = vst.msk [vmem:[#allocation2 + $0x58] sm:$0xff] %vm286_vm3, %v5153_v50  ;;  %2453 = vmatpush.bf16.msrb.mxu1 %v4022_v16  ;;  %4187 = vmatpush.bf16.msra.mxu3 %v4022_v16  ;;  %v542_v48 = vpack.c.bf16 %v510_v33, %v510_v33  ;;  %v4006_v22 = vor.u32 %v4094_v31, %v4005_v25  ;;  %v3989_v42 = vld [vmem:[%s5150_s10 + $0xb0] sm:$0xf] }
 0x1ac   : > { %2365 = vmatpush.bf16.msrb.mxu0 %v3950_v54  ;;  %4180 = vmatpush.bf16.msra.mxu2 %v3950_v54  ;;  %4266 = vpow2.f32 %v1345_v52  ;;  %v4074_v54 = vld [vmem:[%s5150_s10 + $0x34] sm:$0xf0] }
 0x1ad   : > { %575 = vst.msk [vmem:[#allocation4 + $0x7c] sm:$0xf] %vm543_vm1, %v542_v48  ;;  %v3925_v48 = vld [vmem:[%s5150_s10 + $0x30] sm:$0xf] }
 0x1ae   : > { %1420 = vperm.xlu2 %4255, %v5026_v57   ;;  %v5186_v57 = vld [vmem:[#allocation2 + $0x68] sm:$0xff]  ;;  %v3926_v38 = vor.u32 %v4074_v54, %v3925_v48  ;;  %v4070_v48 = vld [vmem:[%s5150_s10 + $0x14] sm:$0xf0]  ;;  %v3973_v54 = vld [vmem:[%s5150_s10 + $0x90] sm:$0xf] }
 0x1af   : > { %2806 = vperm.xlu0 %4256, %v5161_v2   ;;  %v509_v2 = vmul.f32 0.125, %v4162_v14  ;;  %2454 = vmatpush.bf16.msrb.mxu1 %v4014_v46 }
 0x1b0   : > { %v1217_v23 = vpop.xlane.xlu0 %1216  ;;  %4188 = vmatpush.bf16.msra.mxu3 %v4014_v46  ;;  %v4090_v46 = vld [vmem:[%s5150_s10 + $0xb4] sm:$0xf0] }
 0x1b1   : > { %v5174_v36 = vmax.f32 %v5164_v26, %v1217_v23  ;;  %v541_v51 = vpack.c.bf16 %v509_v2, %v509_v2  ;;  %v3941_v23 = vld [vmem:[%s5150_s10 + $0x50] sm:$0xf]  ;;  %v3997_v2 = vld [vmem:[%s5150_s10 + $0xc0] sm:$0xf] }
 0x1b2   : > { %v3942_v14 = vor.u32 %v4078_v0, %v3941_v23  ;;  %v3933_v0 = vld [vmem:[%s5150_s10 + $0x40] sm:$0xf]  ;;  %v5203_v23 = vld [vmem:[#allocation2 + $0x70] sm:$0xff]  ;;  %v5205_v31 = vpop.eup %4266 }
 0x1b3   : > { %3148 = vst.msk [vmem:[#allocation2 + $0x60] sm:$0xff] %vm286_vm3, %v5174_v36  ;;  %2455 = vmatpush.bf16.msrb.mxu1 %v4006_v22 }
 0x1b4   : > { %574 = vst.msk [vmem:[#allocation4 + $0x78] sm:$0xf] %vm543_vm1, %v541_v51  ;;  %2366 = vmatpush.bf16.msrb.mxu0 %v3942_v14  ;;  %4181 = vmatpush.bf16.msra.mxu2 %v3942_v14  ;;  %v3998_v51 = vor.u32 %v4092_v29, %v3997_v2  ;;  %v3990_v14 = vor.u32 %v4090_v46, %v3989_v42  ;;  %v1045_v42 = vpop.f32.mrf.mxu1 }
 0x1b5   : > { %4189 = vmatpush.bf16.msra.mxu3 %v4006_v22  ;;  %6674 = vst [vmem:[#allocation27_spill] sm:$0xff] %v5205_v31  ;;  %v3917_v22 = vld [vmem:[%s5150_s10 + $0x20] sm:$0xf] }
 0x1b6   : > { %1425 = vperm.xlu2 %4255, %v5045_v12   ;;  %v3934_v12 = vor.u32 %v4076_v35, %v3933_v0  ;;  %v3981_v0 = vld [vmem:[%s5150_s10 + $0xa0] sm:$0xf] }
 0x1b7   : > { %2456 = vmatpush.bf16.msrb.mxu1 %v3998_v51 }
 0x1b8   : > { %v1220_v33 = vpop.xlane.xlu1 %1219  ;;  %2367 = vmatpush.bf16.msrb.mxu0 %v3934_v12  ;;  %4182 = vmatpush.bf16.msra.mxu2 %v3934_v12  ;;  %v4088_v12 = vld [vmem:[%s5150_s10 + $0xa4] sm:$0xf0] }
 0x1b9   : > { %v5194_v16 = vmax.f32 %v5186_v57, %v1220_v33  ;;  %4190 = vmatpush.bf16.msra.mxu3 %v3998_v51  ;;  %v4072_v33 = vld [vmem:[%s5150_s10 + $0x24] sm:$0xf0]  ;;  %v3982_v29 = vor.u32 %v4088_v12, %v3981_v0  ;;  %v3909_v51 = vld [vmem:[%s5150_s10 + $0x10] sm:$0xf]  ;;  %v3901_v0 = vld [vmem:[%s5150_s10] sm:$0xf] }
 0x1ba   : > { %v3918_v2 = vor.u32 %v4072_v33, %v3917_v22  ;;  %v3910_v46 = vor.u32 %v4070_v48, %v3909_v51  ;;  %v4068_v12 = vld [vmem:[%s5150_s10 + $0x4] sm:$0xf0]  ;;  %v3965_v48 = vld [vmem:[%s5150_s10 + $0x80] sm:$0xf] }
 0x1bb   : > { %3149 = vst.msk [vmem:[#allocation2 + $0x68] sm:$0xff] %vm286_vm3, %v5194_v16  ;;  %v4050_v25 = vld [vmem:[#allocation4 + $0x78] sm:$0xff]  ;;  %2457 = vmatpush.bf16.msrb.mxu1 %v3990_v14 }
 0x1bc   : > { %3882 = vmatmul.msk.bf16.gmra.mxu0 %vm800_vm0, %v4050_v25  ;;  %3898 = vmatmul.msk.bf16.gmra.mxu1 %vm800_vm0, %v4050_v25  ;;  %v4086_v25 = vld [vmem:[%s5150_s10 + $0x94] sm:$0xf0] }
 0x1bd   : > { %2368 = vmatpush.bf16.msrb.mxu0 %v3926_v38  ;;  %4183 = vmatpush.bf16.msra.mxu2 %v3926_v38  ;;  %v3974_v22 = vor.u32 %v4086_v25, %v3973_v54  ;;  %v5225_v38 = vpop.f32.mrf.mxu0  ;;  %v4084_v54 = vld [vmem:[%s5150_s10 + $0x84] sm:$0xf0] }
 0x1be   : > { %4191 = vmatpush.bf16.msra.mxu3 %v3990_v14  ;;  %6676 = vst [vmem:[#allocation29_spill] sm:$0xff] %v5225_v38  ;;  %v3966_v25 = vor.u32 %v4084_v54, %v3965_v48 }
 0x1bf   : > { %2458 = vmatpush.bf16.msrb.mxu1 %v3982_v29 }
 0x1c0   : > { %v1223_v52 = vpop.xlane.xlu2 %1222 }
 0x1c1   : > { %v5213_v35 = vmax.f32 %v5203_v23, %v1223_v52  ;;  %2801 = vperm.xlu1 %4257, %v5205_v31   ;;  %2369 = vmatpush.bf16.msrb.mxu0 %v3918_v2  ;;  %v5223_v52 = vld [vmem:[#allocation2 + $0x78] sm:$0xff] }
 0x1c2   : > { %6675 = vst [vmem:[#allocation28_spill] sm:$0xff] %v5223_v52  ;;  %4184 = vmatpush.bf16.msra.mxu2 %v3918_v2  ;;  %4192 = vmatpush.bf16.msra.mxu3 %v3982_v29  ;;  %v3902_v2 = vor.u32 %v4068_v12, %v3901_v0  ;;  %v5259_v12 = vsel %vm1082_vm2, %v1045_v42, -1e+30 }
 0x1c3   : > { %3150 = vst.msk [vmem:[#allocation2 + $0x70] sm:$0xff] %vm286_vm3, %v5213_v35  ;;  %2459 = vmatpush.bf16.msrb.mxu1 %v3974_v22  ;;  %v1239_v54 = vmax.f32 %v5225_v38, %v5259_v12 }
 0x1c4   : > { %6680 = vst [vmem:[#allocation33_spill] sm:$0xff] %v5259_v12 }
 0x1c5   : > { %2370 = vmatpush.bf16.msrb.mxu0 %v3910_v46 }
 0x1c6   : > { %4185 = vmatpush.bf16.msra.mxu2 %v3910_v46  ;;  %4193 = vmatpush.bf16.msra.mxu3 %v3974_v22 }
 0x1c7   : > { %2460 = vmatpush.bf16.msrb.mxu1 %v3966_v25 }
 0x1c8   : > { %v1406_v14 = vpop.permute.xlu2 %1405  ;;  %v1226_v33 = vpop.xlane.xlu0 %1225 }
 0x1c9   : > { %v1563_v31 = vsub.f32 %v4767_v43, %v1406_v14  ;;  %v1564_v59 = vsub.f32 %v4771_v45, %v1406_v14  ;;  %v5232_v51 = vmax.f32 %v5223_v52, %v1226_v33  ;;  %1430 = vperm.xlu1 %4257, %v5057_v27   ;;  %2371 = vmatpush.bf16.msrb.mxu0 %v3902_v2  ;;  %v5239_v43 = vld [vmem:[#allocation2 + $0x80] sm:$0xff]  ;;  %v1047_v45 = vpop.f32.mrf.mxu1 }
 0x1ca   : > { %6677 = vst [vmem:[#allocation30_spill] sm:$0xff] %v5239_v43  ;;  %4186 = vmatpush.bf16.msra.mxu2 %v3902_v2  ;;  %4194 = vmatpush.bf16.msra.mxu3 %v3966_v25 }
 0x1cb   : > { %v1627_v29 = vmul.f32 1.442695, %v1563_v31  ;;  %v1629_v55 = vmul.f32 1.442695, %v1564_v59  ;;  %3151 = vst.msk [vmem:[#allocation2 + $0x78] sm:$0xff] %vm286_vm3, %v5232_v51  ;;  %v5249_v31 = vpop.f32.mrf.mxu0 }
 0x1cc   : > { %v5247_v59 = vsel %vm1082_vm2, %v1047_v45, -1e+30  ;;  %6679 = vst [vmem:[#allocation32_spill] sm:$0xff] %v5249_v31 }
 0x1cd   : > { %4268 = vpow2.f32 %v1627_v29  ;;  %6678 = vst [vmem:[#allocation31_spill] sm:$0xff] %v5247_v59  ;;  %v1242_v33 = vmax.f32 %v5249_v31, %v5247_v59 }
 0x1ce   : > { %4270 = vpow2.f32 %v1629_v55 }
 0x1d0   : > { %v1229_v14 = vpop.xlane.xlu1 %1228 }
 0x1d1   : > { %1440 = vperm.xlu1 %4257, %v5080_v6   ;;  %v5243_v46 = vmax.f32 %v5239_v43, %v1229_v14  ;;  %v1314_v14 = vsub.f32 %v5073_v56, %v5080_v6  ;;  %v1312_v56 = vsub.f32 %v5053_v63, %v5057_v27 }
 0x1d3   : > { %v4269_v22 = vpop.eup %4268  ;;  %3152 = vst.msk [vmem:[#allocation2 + $0x80] sm:$0xff] %vm286_vm3, %v5243_v46  ;;  %v1353_v12 = vmul.f32 1.442695, %v1314_v14 }
 0x1d4   : > { %v4271_v55 = vpop.eup %4270 }
 0x1d5   : > { %v5255_v0 = vadd.f32 %v4271_v55, %v4269_v22  ;;  %v1980_v42 = vpack.c.bf16 %v4271_v55, %v4269_v22  ;;  %v1050_v22 = vpop.f32.mrf.mxu1 }
 0x1d9   : > { %1243 = vmax.xlane.f32.xlu0 %v1242_v33 }
 0x1db   : > { %v1411_v48 = vpop.permute.xlu0 %1410 }
 0x1dc   : > { %v1565_v2 = vsub.f32 %v4777_v47, %v1411_v48  ;;  %v1566_v25 = vsub.f32 %v4781_v49, %v1411_v48  ;;  %v2076_v47 = vunpack.c.l.b16 %v1980_v42  ;;  %v2077_v49 = vunpack.c.h.b16 %v1980_v42  ;;  %v5299_v42 = vld [vmem:[#allocation2 + $0x88] sm:$0xff] }
 0x1dd   : > { %6687 = vst [vmem:[#allocation40_spill] sm:$0xff] %v5299_v42 }
 0x1de   : > { %v1631_v29 = vmul.f32 1.442695, %v1565_v2  ;;  %v1633_v45 = vmul.f32 1.442695, %v1566_v25 }
 0x1df   : > { %1240 = vmax.xlane.f32.xlu2 %v1239_v54 }
 0x1e0   : > { %4272 = vpow2.f32 %v1631_v29  ;;  %v1349_v29 = vmul.f32 1.442695, %v1312_v56 }
 0x1e1   : > { %4274 = vpow2.f32 %v1633_v45  ;;  %v5288_v45 = vpop.f32.mrf.mxu0 }
 0x1e2   : > { %4276 = vpow2.f32 %v1353_v12  ;;  %v5286_v12 = vsel %vm1082_vm2, %v1050_v22, -1e+30  ;;  %6685 = vst [vmem:[#allocation38_spill] sm:$0xff] %v5288_v45  ;;  %v1052_v22 = vpop.f32.mrf.mxu1 }
 0x1e3   : > { %6684 = vst [vmem:[#allocation37_spill] sm:$0xff] %v5286_v12 }
 0x1e6   : > { %v4273_v52 = vpop.eup %4272 }
 0x1e7   : > { %v4275_v59 = vpop.eup %4274 }
 0x1e8   : > { %v1981_v33 = vpack.c.bf16 %v4275_v59, %v4273_v52  ;;  %v5267_v31 = vpop.permute.xlu1 %2786  ;;  %v5269_v43 = vadd.f32 %v4275_v59, %v4273_v52  ;;  %v5282_v25 = vpop.eup %4276 }
 0x1e9   : > { %6683 = vst [vmem:[#allocation36_spill] sm:$0xff] %v5282_v25 }
 0x1ea   : > { %v2078_v38 = vunpack.c.l.b16 %v1981_v33  ;;  %v2079_v48 = vunpack.c.h.b16 %v1981_v33 }
 0x1ec   : > { %v5271_v2 = vpack.c.b16 %v2078_v38, %v2076_v47  ;;  %v5273_v54 = vpack.c.b16 %v2079_v48, %v2077_v49  ;;  %v5306_v49 = vld [vmem:[#allocation2 + $0x90] sm:$0xff]  ;;  %v1313_v48 = vsub.f32 %v5062_v32, %v5067_v39 }
 0x1ed   : > { %1445 = vperm.xlu0 %4256, %v5098_v4   ;;  %6688 = vst [vmem:[#allocation41_spill] sm:$0xff] %v5306_v49 }
 0x1ee   : > { %6681 = vst [vmem:[#allocation34_spill] sm:$0xff] %v5271_v2  ;;  %2372 = vmatmul.bf16.vlgmr.msrb.gmra.mxu0 %v5271_v2  ;;  %2461 = vmatmul.bf16.vlgmr.msrb.gmra.mxu1 %v5273_v54  ;;  %v5330_v2 = vld [vmem:[#allocation2 + $0x98] sm:$0xff] }
 0x1ef   : > { %6682 = vst [vmem:[#allocation35_spill] sm:$0xff] %v5273_v54 }
 0x1f0   : > { %v1416_v6 = vpop.permute.xlu1 %1415  ;;  %6692 = vst [vmem:[#allocation45_spill] sm:$0xff] %v5330_v2 }
 0x1f1   : > { %v1567_v52 = vsub.f32 %v4786_v58, %v1416_v6  ;;  %v1568_v59 = vsub.f32 %v4791_v60, %v1416_v6  ;;  %v1245_v58 = vmax.f32 %v5288_v45, %v5286_v12 }
 0x1f3   : > { %v1635_v38 = vmul.f32 1.442695, %v1567_v52  ;;  %v1637_v55 = vmul.f32 1.442695, %v1568_v59  ;;  %v1351_v52 = vmul.f32 1.442695, %v1313_v48  ;;  %v1055_v48 = vpop.f32.mrf.mxu1 }
 0x1f5   : > { %4278 = vpow2.f32 %v1635_v38  ;;  %2821 = vperm.xlu0 %4256, %v5282_v25   ;;  %v5317_v38 = vpop.f32.mrf.mxu0 }
 0x1f6   : > { %4280 = vpow2.f32 %v1637_v55 }
 0x1f7   : > { %1435 = vperm.xlu2 %4255, %v5067_v39   ;;  %4282 = vpow2.f32 %v1349_v29 }
 0x1f8   : > { %4284 = vpow2.f32 %v1351_v52 }
 0x1fb   : > { %v4279_v60 = vpop.eup %4278  ;;  %1246 = vmax.xlane.f32.xlu1 %v1245_v58 }
 0x1fc   : > { %v4281_v63 = vpop.eup %4280 }
 0x1fd   : > { %v5294_v27 = vadd.f32 %v4281_v63, %v4279_v60  ;;  %v5296_v14 = vpop.eup %4282  ;;  %v5328_v52 = vpop.f32.mrf.mxu0 }
 0x1fe   : > { %6686 = vst [vmem:[#allocation39_spill] sm:$0xff] %v5296_v14  ;;  %v5321_v32 = vpop.eup %4284 }
 0x1ff   : > { %2811 = vperm.xlu2 %4255, %v5296_v14   ;;  %6689 = vst [vmem:[#allocation42_spill] sm:$0xff] %v5321_v32 }
 0x200   : > { %6691 = vst [vmem:[#allocation44_spill] sm:$0xff] %v5328_v52 }
 0x201   : > { %v1232_v33 = vpop.xlane.xlu2 %1231 }
 0x202   : > { %v5302_v47 = vmax.f32 %v5299_v42, %v1232_v33 }
 0x204   : > { %3153 = vst.msk [vmem:[#allocation2 + $0x88] sm:$0xff] %vm286_vm3, %v5302_v47 }
 0x206   : > { %v1235_v56 = vpop.xlane.xlu0 %1234 }
 0x207   : > { %v5311_v6 = vmax.f32 %v5306_v49, %v1235_v56  ;;  %v5326_v56 = vsel %vm1082_vm2, %v1055_v48, -1e+30  ;;  %v1982_v48 = vpack.c.bf16 %v4281_v63, %v4279_v60  ;;  %v5350_v63 = vsel %vm1082_vm2, %v1052_v22, -1e+30 }
 0x208   : > { %6690 = vst [vmem:[#allocation43_spill] sm:$0xff] %v5326_v56 }
 0x209   : > { %v5313_v59 = vpop.permute.xlu2 %2791  ;;  %3154 = vst.msk [vmem:[#allocation2 + $0x90] sm:$0xff] %vm286_vm3, %v5311_v6 }
 0x20a   : > { %6695 = vst [vmem:[#allocation48_spill] sm:$0xff] %v5350_v63 }
 0x211   : > { %v1421_v55 = vpop.permute.xlu2 %1420 }
 0x212   : > { %v1569_v29 = vsub.f32 %v4796_v62, %v1421_v55  ;;  %v1570_v58 = vsub.f32 %v4800_v1, %v1421_v55  ;;  %v1251_v55 = vmax.f32 %v5328_v52, %v5326_v56 }
 0x214   : > { %v1639_v39 = vmul.f32 1.442695, %v1569_v29  ;;  %v1641_v33 = vmul.f32 1.442695, %v1570_v58  ;;  %2816 = vperm.xlu1 %4257, %v5321_v32  }
 0x216   : > { %4286 = vpow2.f32 %v1639_v39 }
 0x217   : > { %4288 = vpow2.f32 %v1641_v33 }
 0x219   : > { %v1426_v54 = vpop.permute.xlu2 %1425 }
 0x21a   : > { %v1571_v62 = vsub.f32 %v4806_v3, %v1426_v54  ;;  %v1572_v1 = vsub.f32 %v4810_v5, %v1426_v54  ;;  %v2080_v5 = vunpack.c.l.b16 %v1982_v48 }
 0x21b   : > { %v1238_v29 = vpop.xlane.xlu1 %1237 }
 0x21c   : > { %v4287_v58 = vpop.eup %4286  ;;  %v1643_v39 = vmul.f32 1.442695, %v1571_v62  ;;  %v1645_v33 = vmul.f32 1.442695, %v1572_v1  ;;  %1455 = vperm.xlu1 %4257, %v5124_v18   ;;  %v5338_v42 = vmax.f32 %v5330_v2, %v1238_v29  ;;  %v2081_v62 = vunpack.c.h.b16 %v1982_v48 }
 0x21d   : > { %v4289_v49 = vpop.eup %4288 }
 0x21e   : > { %4290 = vpow2.f32 %v1643_v39  ;;  %v1983_v32 = vpack.c.bf16 %v4289_v49, %v4287_v58  ;;  %3155 = vst.msk [vmem:[#allocation2 + $0x98] sm:$0xff] %vm286_vm3, %v5338_v42  ;;  %v5342_v3 = vadd.f32 %v4289_v49, %v4287_v58  ;;  %v5354_v49 = vpop.f32.mrf.mxu0  ;;  %v1057_v58 = vpop.f32.mrf.mxu1 }
 0x21f   : > { %4292 = vpow2.f32 %v1645_v33  ;;  %1252 = vmax.xlane.f32.xlu0 %v1251_v55  ;;  %6696 = vst [vmem:[#allocation49_spill] sm:$0xff] %v5354_v49  ;;  %v1317_v33 = vsub.f32 %v5116_v61, %v5124_v18  ;;  %v5377_v61 = vpop.permute.xlu0 %2796 }
 0x220   : > { %v2082_v54 = vunpack.c.l.b16 %v1983_v32  ;;  %v2083_v1 = vunpack.c.h.b16 %v1983_v32  ;;  %v1248_v32 = vmax.f32 %v5317_v38, %v5350_v63 }
 0x222   : > { %v5344_v56 = vpack.c.b16 %v2082_v54, %v2080_v5  ;;  %v5346_v60 = vpack.c.b16 %v2083_v1, %v2081_v62  ;;  %v1359_v5 = vmul.f32 1.442695, %v1317_v33  ;;  %v1315_v62 = vsub.f32 %v5093_v20, %v5098_v4 }
 0x223   : > { %v5384_v4 = vsel %vm1082_vm2, %v1057_v58, -1e+30 }
 0x224   : > { %6693 = vst [vmem:[#allocation46_spill] sm:$0xff] %v5344_v56  ;;  %v4291_v29 = vpop.eup %4290  ;;  %2377 = vmatmul.bf16.gmra.mxu0 %v5344_v56  ;;  %2466 = vmatmul.bf16.gmra.mxu1 %v5346_v60  ;;  %4294 = vpow2.f32 %v1359_v5  ;;  %v1355_v18 = vmul.f32 1.442695, %v1315_v62  ;;  %v1254_v20 = vmax.f32 %v5354_v49, %v5384_v4 }
 0x225   : > { %6694 = vst [vmem:[#allocation47_spill] sm:$0xff] %v5346_v60  ;;  %v4293_v55 = vpop.eup %4292 }
 0x226   : > { %v5358_v39 = vadd.f32 %v4293_v55, %v4291_v29  ;;  %v5362_v22 = vpop.f32.mrf.mxu0  ;;  %v5364_v48 = vpop.f32.mrf.mxu1  ;;  %4296 = vpow2.f32 %v1355_v18  ;;  %6699 = vst [vmem:[#allocation52_spill] sm:$0xff] %v5384_v4 }
 0x228   : > { %1249 = vmax.xlane.f32.xlu2 %v1248_v32 }
 0x22a   : > { %v5375_v32 = vpop.eup %4294 }
 0x22b   : > { %6698 = vst [vmem:[#allocation51_spill] sm:$0xff] %v5375_v32 }
 0x22c   : > { %v5397_v58 = vpop.eup %4296 }
 0x22d   : > { %6701 = vst [vmem:[#allocation54_spill] sm:$0xff] %v5397_v58 }
 0x22e   : > { %v5371_v1 = vpop.f32.mrf.mxu0  ;;  %v5373_v60 = vpop.f32.mrf.mxu1 }
 0x22f   : > { %6697 = vst [vmem:[#allocation50_spill] sm:$0xff] %v5371_v1 }
 0x233   : > { %v5366_v54 = vpop.permute.xlu1 %2801  ;;  %1460 = vperm.xlu0 %4256, %v5153_v50  }
 0x236   : > { %v5389_v62 = vpop.f32.mrf.mxu0 }
 0x237   : > { %6700 = vst [vmem:[#allocation53_spill] sm:$0xff] %v5389_v62 }
 0x23b   : > { %v1431_v56 = vpop.permute.xlu1 %1430  ;;  %2836 = vperm.xlu0 %4256, %v5375_v32  }
 0x23c   : > { %v1573_v33 = vsub.f32 %v4814_v7, %v1431_v56  ;;  %v1574_v52 = vsub.f32 %v4818_v9, %v1431_v56  ;;  %v5391_v7 = vpop.f32.mrf.mxu1  ;;  %v5393_v9 = vpop.permute.xlu0 %2806 }
 0x23e   : > { %v1647_v5 = vmul.f32 1.442695, %v1573_v33  ;;  %v1649_v2 = vmul.f32 1.442695, %v1574_v52 }
 0x240   : > { %4298 = vpow2.f32 %v1647_v5  ;;  %1450 = vperm.xlu2 %4255, %v5109_v30  }
 0x241   : > { %4300 = vpow2.f32 %v1649_v2  ;;  %v1984_v2 = vpack.c.bf16 %v4293_v55, %v4291_v29 }
 0x243   : > { %v1441_v32 = vpop.permute.xlu1 %1440  ;;  %v2084_v45 = vunpack.c.l.b16 %v1984_v2 }
 0x244   : > { %v1577_v56 = vsub.f32 %v4830_v15, %v1441_v32  ;;  %v1578_v52 = vsub.f32 %v4834_v17, %v1441_v32  ;;  %v2085_v15 = vunpack.c.h.b16 %v1984_v2  ;;  %v5402_v17 = vld [vmem:[#allocation2 + $0xa8] sm:$0xff]  ;;  %v5408_v29 = vpop.f32.mrf.mxu1 }
 0x245   : > { %6702 = vst [vmem:[#allocation55_spill] sm:$0xff] %v5402_v17 }
 0x246   : > { %v4299_v18 = vpop.eup %4298  ;;  %v1655_v33 = vmul.f32 1.442695, %v1577_v56  ;;  %v1657_v5 = vmul.f32 1.442695, %v1578_v52  ;;  %1255 = vmax.xlane.f32.xlu1 %v1254_v20  ;;  %v5413_v52 = vpop.f32.mrf.mxu0 }
 0x247   : > { %v4301_v12 = vpop.eup %4300 }
 0x248   : > { %4302 = vpow2.f32 %v1655_v33  ;;  %2826 = vperm.xlu2 %4255, %v5397_v58   ;;  %v1985_v4 = vpack.c.bf16 %v4301_v12, %v4299_v18  ;;  %v5400_v49 = vadd.f32 %v4301_v12, %v4299_v18 }
 0x249   : > { %4304 = vpow2.f32 %v1657_v5 }
 0x24a   : > { %v2086_v25 = vunpack.c.l.b16 %v1985_v4  ;;  %v2087_v14 = vunpack.c.h.b16 %v1985_v4 }
 0x24c   : > { %v5404_v32 = vpack.c.b16 %v2086_v25, %v2084_v45  ;;  %v5406_v56 = vpack.c.b16 %v2087_v14, %v2085_v15  ;;  %v1244_v20 = vpop.xlane.xlu0 %1243  ;;  %v1316_v25 = vsub.f32 %v5104_v10, %v5109_v30  ;;  %v5421_v45 = vld [vmem:[#allocation2 + $0xa0] sm:$0xff]  ;;  %v5430_v2 = vpop.f32.mrf.mxu1 }
 0x24d   : > { %v5411_v55 = vmax.f32 %v5402_v17, %v1244_v20  ;;  %6705 = vst [vmem:[#allocation58_spill] sm:$0xff] %v5421_v45 }
 0x24e   : > { %6703 = vst [vmem:[#allocation56_spill] sm:$0xff] %v5404_v32  ;;  %v4303_v12 = vpop.eup %4302  ;;  %2382 = vmatmul.bf16.gmra.mxu0 %v5404_v32  ;;  %2471 = vmatmul.bf16.gmra.mxu1 %v5406_v56  ;;  %v1357_v5 = vmul.f32 1.442695, %v1316_v25  ;;  %v5432_v15 = vpop.f32.mrf.mxu0  ;;  %v5441_v25 = vsel %vm1082_vm2, %v5373_v60, -1e+30 }
 0x24f   : > { %6704 = vst [vmem:[#allocation57_spill] sm:$0xff] %v5406_v56  ;;  %v4305_v4 = vpop.eup %4304 }
 0x250   : > { %3157 = vst.msk [vmem:[#allocation2 + $0xa8] sm:$0xff] %vm286_vm3, %v5411_v55  ;;  %v5423_v14 = vadd.f32 %v4305_v4, %v4303_v12  ;;  %4306 = vpow2.f32 %v1357_v5 }
 0x251   : > { %6706 = vst [vmem:[#allocation59_spill] sm:$0xff] %v5432_v15 }
 0x252   : > { %v1241_v18 = vpop.xlane.xlu2 %1240  ;;  %6708 = vst [vmem:[#allocation61_spill] sm:$0xff] %v5441_v25 }
 0x253   : > { %v5426_v33 = vmax.f32 %v5421_v45, %v1241_v18 }
 0x255   : > { %3156 = vst.msk [vmem:[#allocation2 + $0xa0] sm:$0xff] %vm286_vm3, %v5426_v33 }
 0x256   : > { %v5436_v17 = vpop.eup %4306 }
 0x257   : > { %6707 = vst [vmem:[#allocation60_spill] sm:$0xff] %v5436_v17 }
 0x25a   : > { %v1436_v20 = vpop.permute.xlu2 %1435 }
 0x25b   : > { %v1575_v10 = vsub.f32 %v4822_v11, %v1436_v20  ;;  %v1576_v30 = vsub.f32 %v4826_v13, %v1436_v20  ;;  %v5446_v13 = vpop.f32.mrf.mxu1  ;;  %v5448_v20 = vpop.f32.mrf.mxu0 }
 0x25c   : > { %6709 = vst [vmem:[#allocation62_spill] sm:$0xff] %v5448_v20 }
 0x25d   : > { %v1651_v56 = vmul.f32 1.442695, %v1575_v10  ;;  %v1653_v32 = vmul.f32 1.442695, %v1576_v30  ;;  %v1260_v10 = vmax.f32 %v5371_v1, %v5441_v25 }
 0x25f   : > { %4308 = vpow2.f32 %v1651_v56  ;;  %v1446_v18 = vpop.permute.xlu0 %1445  ;;  %2831 = vperm.xlu1 %4257, %v5436_v17   ;;  %v1987_v17 = vpack.c.bf16 %v4305_v4, %v4303_v12 }
 0x260   : > { %4310 = vpow2.f32 %v1653_v32  ;;  %v1579_v5 = vsub.f32 %v4838_v19, %v1446_v18  ;;  %v1580_v11 = vsub.f32 %v4842_v21, %v1446_v18 }
 0x261   : > { %v2090_v45 = vunpack.c.l.b16 %v1987_v17  ;;  %v2091_v63 = vunpack.c.h.b16 %v1987_v17 }
 0x262   : > { %v1659_v30 = vmul.f32 1.442695, %v1579_v5  ;;  %v1661_v60 = vmul.f32 1.442695, %v1580_v11  ;;  %v5463_v5 = vsel %vm1082_vm2, %v5364_v48, -1e+30 }
 0x263   : > { %v1257_v48 = vmax.f32 %v5362_v22, %v5463_v5 }
 0x264   : > { %4312 = vpow2.f32 %v1659_v30 }
 0x265   : > { %v4309_v56 = vpop.eup %4308  ;;  %4314 = vpow2.f32 %v1661_v60  ;;  %1261 = vmax.xlane.f32.xlu0 %v1260_v10  ;;  %v5472_v60 = vmul.f32 0.0, %v5267_v31 }
 0x266   : > { %v4311_v32 = vpop.eup %4310 }
 0x267   : > { %1470 = vperm.xlu1 %4257, %v5194_v16   ;;  %v1986_v19 = vpack.c.bf16 %v4311_v32, %v4309_v56  ;;  %v5454_v21 = vadd.f32 %v4311_v32, %v4309_v56  ;;  %6712 = vst [vmem:[#allocation65_spill] sm:$0xff] %v5472_v60  ;;  %v5474_v56 = vld [vmem:[#allocation2 + $0xb0] sm:$0xff] }
 0x269   : > { %v2088_v18 = vunpack.c.l.b16 %v1986_v19  ;;  %v2089_v58 = vunpack.c.h.b16 %v1986_v19 }
 0x26a   : > { %v5456_v25 = vpop.eup %4312 }
 0x26b   : > { %v5465_v12 = vpop.eup %4314  ;;  %v2373_v4 = vpop.f32.mrf.mxu0  ;;  %v5467_v10 = vpack.c.b16 %v2090_v45, %v2088_v18  ;;  %v5469_v30 = vpack.c.b16 %v2091_v63, %v2089_v58  ;;  %v1320_v45 = vsub.f32 %v5186_v57, %v5194_v16  ;;  %v1318_v57 = vsub.f32 %v5143_v8, %v5153_v50 }
 0x26c   : > { %v2462_v11 = vpop.f32.mrf.mxu1  ;;  %v5478_v32 = vadd.f32 %v5465_v12, %v5456_v25 }
 0x26d   : > { %6710 = vst [vmem:[#allocation63_spill] sm:$0xff] %v5467_v10  ;;  %v2463_v17 = vadd.f32 %v2462_v11, %v2373_v4  ;;  %2387 = vmatmul.bf16.gmra.mxu0 %v5467_v10  ;;  %2476 = vmatmul.bf16.gmra.mxu1 %v5469_v30  ;;  %v5496_v4 = vmul.f32 0.0, %v5313_v59  ;;  %v1361_v16 = vmul.f32 1.442695, %v1318_v57  ;;  %v5512_v59 = vsel %vm1082_vm2, %v5391_v7, -1e+30 }
 0x26e   : > { %6711 = vst [vmem:[#allocation64_spill] sm:$0xff] %v5469_v30  ;;  %v1247_v58 = vpop.xlane.xlu1 %1246  ;;  %v5550_v30 = vmul.f32 0.0, %v5377_v61 }
 0x26f   : > { %v3008_v63 = vadd.f32 %v5472_v60, %v2463_v17  ;;  %v5486_v31 = vmax.f32 %v5474_v56, %v1247_v58  ;;  %6713 = vst [vmem:[#allocation66_spill] sm:$0xff] %v5496_v4  ;;  %v1365_v17 = vmul.f32 1.442695, %v1320_v45  ;;  %v5514_v45 = vpop.permute.xlu0 %2821 }
 0x270   : > { %6714 = vst [vmem:[#allocation67_spill] sm:$0xff] %v5512_v59 }
 0x271   : > { %3072 = vst [vmem:[%s5488_s19] sm:$0xff] %v3008_v63  ;;  %1258 = vmax.xlane.f32.xlu2 %v1257_v48  ;;  %4316 = vpow2.f32 %v1365_v17  ;;  %v5522_v17 = vld [vmem:[#allocation2 + $0xc0] sm:$0xff] }
 0x272   : > { %3158 = vst.msk [vmem:[#allocation2 + $0xb0] sm:$0xff] %vm286_vm3, %v5486_v31  ;;  %4318 = vpow2.f32 %v1361_v16  ;;  %v5525_v16 = vpop.permute.xlu2 %2811 }
 0x273   : > { %v2375_v19 = vpop.f32.mrf.mxu0  ;;  %6717 = vst [vmem:[#allocation70_spill] sm:$0xff] %v5550_v30 }
 0x274   : > { %v2464_v18 = vpop.f32.mrf.mxu1 }
 0x275   : > { %v2465_v11 = vadd.f32 %v2464_v18, %v2375_v19  ;;  %v1263_v19 = vmax.f32 %v5389_v62, %v5512_v59 }
 0x277   : > { %v3010_v58 = vadd.f32 %v5496_v4, %v2465_v11  ;;  %v5501_v48 = vpop.eup %4316 }
 0x278   : > { %v5520_v50 = vpop.eup %4318 }
 0x279   : > { %3074 = vst [vmem:[%s5488_s19 + $0x10] sm:$0xff] %v3010_v58  ;;  %1475 = vperm.xlu0 %4256, %v5213_v35  }
 0x281   : > { %2851 = vperm.xlu0 %4256, %v5501_v48  }
 0x286   : > { %v5506_v63 = vpop.permute.xlu1 %2816 }
 0x289   : > { %1465 = vperm.xlu2 %4255, %v5174_v36  }
 0x28e   : > { %v1456_v18 = vpop.permute.xlu1 %1455 }
 0x28f   : > { %v1583_v11 = vsub.f32 %v4857_v34, %v1456_v18  ;;  %v1584_v8 = vsub.f32 %v4862_v37, %v1456_v18  ;;  %v5534_v37 = vld [vmem:[#allocation2 + $0xb8] sm:$0xff] }
 0x290   : > { %6715 = vst [vmem:[#allocation68_spill] sm:$0xff] %v5534_v37 }
 0x291   : > { %v1667_v58 = vmul.f32 1.442695, %v1583_v11  ;;  %v1669_v57 = vmul.f32 1.442695, %v1584_v8  ;;  %2841 = vperm.xlu2 %4255, %v5520_v50   ;;  %1264 = vmax.xlane.f32.xlu1 %v1263_v19  ;;  %v1319_v19 = vsub.f32 %v5164_v26, %v5174_v36  ;;  %v5555_v36 = vsel %vm1082_vm2, %v5430_v2, -1e+30 }
 0x292   : > { %v1253_v7 = vpop.xlane.xlu0 %1252  ;;  %6718 = vst [vmem:[#allocation71_spill] sm:$0xff] %v5555_v36 }
 0x293   : > { %4320 = vpow2.f32 %v1667_v58  ;;  %v5528_v4 = vmax.f32 %v5522_v17, %v1253_v7 }
 0x294   : > { %4322 = vpow2.f32 %v1669_v57  ;;  %v1363_v57 = vmul.f32 1.442695, %v1319_v19 }
 0x295   : > { %3160 = vst.msk [vmem:[#allocation2 + $0xc0] sm:$0xff] %vm286_vm3, %v5528_v4 }
 0x296   : > { %4324 = vpow2.f32 %v1363_v57  ;;  %v1269_v57 = vmax.f32 %v5432_v15, %v5555_v36 }
 0x299   : > { %v5532_v34 = vpop.eup %4320 }
 0x29a   : > { %v5536_v18 = vpop.eup %4322 }
 0x29b   : > { %v1250_v11 = vpop.xlane.xlu2 %1249  ;;  %v5542_v8 = vadd.f32 %v5536_v18, %v5532_v34 }
 0x29c   : > { %v5545_v58 = vmax.f32 %v5534_v37, %v1250_v11 }
 0x29e   : > { %6716 = vst [vmem:[#allocation69_spill] sm:$0xff] %v5545_v58 }
 0x29f   : > { %3159 = vst.msk [vmem:[#allocation2 + $0xb8] sm:$0xff] %vm286_vm3, %v5545_v58 }
 0x2a1   : > { %v2378_v7 = vpop.f32.mrf.mxu0  ;;  %v2467_v60 = vpop.f32.mrf.mxu1 }
 0x2a2   : > { %v2468_v10 = vadd.f32 %v2467_v60, %v2378_v7 }
 0x2a3   : > { %v1451_v26 = vpop.permute.xlu2 %1450 }
 0x2a4   : > { %v3012_v11 = vadd.f32 %v5550_v30, %v2468_v10  ;;  %v1581_v1 = vsub.f32 %v4847_v24, %v1451_v26  ;;  %v1582_v59 = vsub.f32 %v4851_v28, %v1451_v26  ;;  %v5565_v10 = vpop.eup %4324  ;;  %v5568_v26 = vmul.f32 0.0, %v5366_v54 }
 0x2a5   : > { %v1461_v19 = vpop.permute.xlu0 %1460  ;;  %6719 = vst [vmem:[#allocation72_spill] sm:$0xff] %v5565_v10 }
 0x2a6   : > { %3076 = vst [vmem:[%s5488_s19 + $0x20] sm:$0xff] %v3012_v11  ;;  %v1663_v62 = vmul.f32 1.442695, %v1581_v1  ;;  %v1665_v37 = vmul.f32 1.442695, %v1582_v59  ;;  %v1585_v61 = vsub.f32 %v4873_v40, %v1461_v19  ;;  %v1586_v60 = vsub.f32 %v4880_v44, %v1461_v19 }
 0x2a7   : > { %6720 = vst [vmem:[#allocation73_spill] sm:$0xff] %v5568_v26  ;;  %v1988_v44 = vpack.c.bf16 %v5465_v12, %v5456_v25  ;;  %v5588_v12 = vsel %vm1082_vm2, %v5408_v29, -1e+30  ;;  %v1990_v29 = vpack.c.bf16 %v5536_v18, %v5532_v34  ;;  %v5613_v18 = vmul.f32 0.0, %v5393_v9 }
 0x2a8   : > { %4326 = vpow2.f32 %v1663_v62  ;;  %v1671_v2 = vmul.f32 1.442695, %v1585_v61  ;;  %v1673_v7 = vmul.f32 1.442695, %v1586_v60  ;;  %v5624_v9 = vmul.f32 0.0, %v5525_v16 }
 0x2a9   : > { %4328 = vpow2.f32 %v1665_v37  ;;  %v2380_v24 = vpop.f32.mrf.mxu0  ;;  %v2469_v28 = vpop.f32.mrf.mxu1  ;;  %v2092_v61 = vunpack.c.l.b16 %v1988_v44  ;;  %6725 = vst [vmem:[#allocation78_spill] sm:$0xff] %v5613_v18 }
 0x2aa   : > { %4330 = vpow2.f32 %v1671_v2  ;;  %v2470_v1 = vadd.f32 %v2469_v28, %v2380_v24  ;;  %2846 = vperm.xlu1 %4257, %v5565_v10   ;;  %v2093_v2 = vunpack.c.h.b16 %v1988_v44  ;;  %v5592_v28 = vld [vmem:[#allocation2 + $0xc8] sm:$0xff]  ;;  %6726 = vst [vmem:[#allocation79_spill] sm:$0xff] %v5624_v9 }
 0x2ab   : > { %4332 = vpow2.f32 %v1673_v7  ;;  %1270 = vmax.xlane.f32.xlu0 %v1269_v57 }
 0x2ac   : > { %v3014_v40 = vadd.f32 %v5568_v26, %v2470_v1  ;;  %v1266_v1 = vmax.f32 %v5413_v52, %v5588_v12 }
 0x2ae   : > { %v4327_v62 = vpop.eup %4326  ;;  %3078 = vst [vmem:[%s5488_s19 + $0x30] sm:$0xff] %v3014_v40 }
 0x2af   : > { %v4329_v59 = vpop.eup %4328 }
 0x2b0   : > { %v4331_v37 = vpop.eup %4330  ;;  %v1989_v11 = vpack.c.bf16 %v4329_v59, %v4327_v62  ;;  %v5575_v19 = vadd.f32 %v4329_v59, %v4327_v62 }
 0x2b1   : > { %v4333_v54 = vpop.eup %4332 }
 0x2b2   : > { %1485 = vperm.xlu1 %4257, %v5243_v46   ;;  %v2094_v60 = vunpack.c.l.b16 %v1989_v11  ;;  %v2095_v7 = vunpack.c.h.b16 %v1989_v11  ;;  %v5578_v57 = vadd.f32 %v4333_v54, %v4331_v37  ;;  %v1991_v44 = vpack.c.bf16 %v4333_v54, %v4331_v37 }
 0x2b3   : > { %1820 = vadd.xlane.f32.xlu0 %v5255_v0  ;;  %v2096_v11 = vunpack.c.l.b16 %v1990_v29  ;;  %v1321_v37 = vsub.f32 %v5203_v23, %v5213_v35 }
 0x2b4   : > { %v5581_v24 = vpack.c.b16 %v2094_v60, %v2092_v61  ;;  %v5583_v25 = vpack.c.b16 %v2095_v7, %v2093_v2  ;;  %v2098_v62 = vunpack.c.l.b16 %v1991_v44  ;;  %v2099_v59 = vunpack.c.h.b16 %v1991_v44  ;;  %v5617_v44 = vpop.permute.xlu0 %2836 }
 0x2b5   : > { %v2097_v61 = vunpack.c.h.b16 %v1990_v29 }
 0x2b6   : > { %6721 = vst [vmem:[#allocation74_spill] sm:$0xff] %v5581_v24  ;;  %2392 = vmatmul.bf16.gmra.mxu0 %v5581_v24  ;;  %2481 = vmatmul.bf16.gmra.mxu1 %v5583_v25  ;;  %v5603_v60 = vpack.c.b16 %v2098_v62, %v2096_v11 }
 0x2b7   : > { %6722 = vst [vmem:[#allocation75_spill] sm:$0xff] %v5583_v25  ;;  %v5605_v2 = vpack.c.b16 %v2099_v59, %v2097_v61  ;;  %v5629_v59 = vsel %vm1082_vm2, %v5446_v13, -1e+30  ;;  %v5632_v61 = vld [vmem:[#allocation2 + $0xd8] sm:$0xff]  ;;  %v6735_v25 = vld [vmem:[#allocation9_spill] sm:$0xff] }
 0x2b8   : > { %6723 = vst [vmem:[#allocation76_spill] sm:$0xff] %v5603_v60 }
 0x2b9   : > { %v1256_v40 = vpop.xlane.xlu1 %1255  ;;  %6724 = vst [vmem:[#allocation77_spill] sm:$0xff] %v5605_v2 }
 0x2ba   : > { %1267 = vmax.xlane.f32.xlu2 %v1266_v1  ;;  %v5597_v0 = vmax.f32 %v5592_v28, %v1256_v40  ;;  %v1367_v40 = vmul.f32 1.442695, %v1321_v37  ;;  %6727 = vst [vmem:[#allocation80_spill] sm:$0xff] %v5629_v59  ;;  %v1272_v37 = vmax.f32 %v5448_v20, %v5629_v59 }
 0x2bc   : > { %3161 = vst.msk [vmem:[#allocation2 + $0xc8] sm:$0xff] %vm286_vm3, %v5597_v0  ;;  %4334 = vpow2.f32 %v1367_v40  ;;  %v5647_v40 = vpop.permute.xlu2 %2826 }
 0x2c6   : > { %2397 = vmatmul.bf16.gmra.mxu0 %v5603_v60  ;;  %2486 = vmatmul.bf16.gmra.mxu1 %v5605_v2  ;;  %v6734_v2 = vld [vmem:[#allocation8_spill] sm:$0xff] }
 0x2c7   : > { %1490 = vperm.xlu0 %4256, %v5302_v47  }
 0x2cb   : > { %v2383_v54 = vpop.f32.mrf.mxu0  ;;  %v2472_v34 = vpop.f32.mrf.mxu1 }
 0x2cc   : > { %v2473_v7 = vadd.f32 %v2472_v34, %v2383_v54  ;;  %v5637_v34 = vpop.eup %4334 }
 0x2cd   : > { %6728 = vst [vmem:[#allocation81_spill] sm:$0xff] %v5637_v34 }
 0x2ce   : > { %v3016_v1 = vadd.f32 %v5613_v18, %v2473_v7 }
 0x2cf   : > { %1505 = vperm.xlu0 %4256, %v5426_v33  }
 0x2d0   : > { %3080 = vst [vmem:[%s5488_s19 + $0x40] sm:$0xff] %v3016_v1 }
 0x2d1   : > { %v5620_v29 = vpop.permute.xlu1 %2831 }
 0x2d2   : > { %1480 = vperm.xlu2 %4255, %v5232_v51  }
 0x2d3   : > { %v2474_v23 = vpop.f32.mrf.mxu1  ;;  %v2385_v35 = vpop.f32.mrf.mxu0 }
 0x2d4   : > { %v2475_v62 = vadd.f32 %v2474_v23, %v2385_v35 }
 0x2d6   : > { %v3018_v11 = vadd.f32 %v5624_v9, %v2475_v62  ;;  %v5649_v62 = vld [vmem:[#allocation2 + $0xd0] sm:$0xff]  ;;  %v6732_v9 = vld [vmem:[#allocation11_spill] sm:$0xff] }
 0x2d7   : > { %6730 = vst [vmem:[#allocation10_spill] sm:$0xff] %v5649_v62 }
 0x2d8   : > { %3082 = vst [vmem:[%s5488_s19 + $0x50] sm:$0xff] %v3018_v11  ;;  %v1262_v54 = vpop.xlane.xlu0 %1261 }
 0x2d9   : > { %v1471_v7 = vpop.permute.xlu1 %1470  ;;  %v5640_v16 = vmax.f32 %v5632_v61, %v1262_v54 }
 0x2da   : > { %v1589_v1 = vsub.f32 %v4907_v53, %v1471_v7  ;;  %v1590_v13 = vsub.f32 %v6729_v41, %v1471_v7  ;;  %2856 = vperm.xlu2 %4255, %v5637_v34  }
 0x2db   : > { %3163 = vst.msk [vmem:[#allocation2 + $0xd8] sm:$0xff] %vm286_vm3, %v5640_v16 }
 0x2dc   : > { %v1679_v23 = vmul.f32 1.442695, %v1589_v1  ;;  %v1681_v35 = vmul.f32 1.442695, %v1590_v13  ;;  %1273 = vmax.xlane.f32.xlu1 %v1272_v37  ;;  %v5660_v13 = vmul.f32 0.0, %v5506_v63 }
 0x2de   : > { %4336 = vpow2.f32 %v1679_v23  ;;  %6731 = vst [vmem:[#allocation82_spill] sm:$0xff] %v5660_v13 }
 0x2df   : > { %4338 = vpow2.f32 %v1681_v35 }
 0x2e4   : > { %v4337_v11 = vpop.eup %4336  ;;  %v1259_v54 = vpop.xlane.xlu2 %1258  ;;  %1826 = vadd.xlane.f32.xlu1 %v5294_v27  ;;  %v6733_v27 = vld [vmem:[#allocation12_spill] sm:$0xff] }
 0x2e5   : > { %v4339_v53 = vpop.eup %4338  ;;  %v5653_v7 = vmax.f32 %v5649_v62, %v1259_v54  ;;  %v6747_v62 = vld [vmem:[#allocation18_spill] sm:$0xff] }
 0x2e6   : > { %v5655_v41 = vadd.f32 %v4339_v53, %v4337_v11 }
 0x2e7   : > { %3162 = vst.msk [vmem:[#allocation2 + $0xd0] sm:$0xff] %vm286_vm3, %v5653_v7 }
 0x2ea   : > { %v2388_v1 = vpop.f32.mrf.mxu0  ;;  %v2477_v37 = vpop.f32.mrf.mxu1 }
 0x2eb   : > { %v2478_v23 = vadd.f32 %v2477_v37, %v2388_v1  ;;  %v1476_v35 = vpop.permute.xlu0 %1475  ;;  %v5669_v37 = vmul.f32 0.0, %v5514_v45 }
 0x2ec   : > { %v1591_v18 = vsub.f32 %v6732_v9, %v1476_v35  ;;  %v1592_v26 = vsub.f32 %v6733_v27, %v1476_v35  ;;  %v1466_v30 = vpop.permute.xlu2 %1465 }
 0x2ed   : > { %v3020_v54 = vadd.f32 %v5660_v13, %v2478_v23  ;;  %v1587_v60 = vsub.f32 %v6734_v2, %v1466_v30  ;;  %v1588_v24 = vsub.f32 %v6735_v25, %v1466_v30  ;;  %6736 = vst [vmem:[#allocation11_spill] sm:$0xff] %v5669_v37  ;;  %v1993_v25 = vpack.c.bf16 %v4339_v53, %v4337_v11  ;;  %v5691_v11 = vld [vmem:[#allocation2 + $0xe0] sm:$0xff] }
 0x2ee   : > { %v1683_v36 = vmul.f32 1.442695, %v1591_v18  ;;  %v1685_v15 = vmul.f32 1.442695, %v1592_v26 }
 0x2ef   : > { %3084 = vst [vmem:[%s5488_s19 + $0x60] sm:$0xff] %v3020_v54  ;;  %v1675_v59 = vmul.f32 1.442695, %v1587_v60  ;;  %v1677_v63 = vmul.f32 1.442695, %v1588_v24  ;;  %v2102_v18 = vunpack.c.l.b16 %v1993_v25  ;;  %v2103_v27 = vunpack.c.h.b16 %v1993_v25 }
 0x2f0   : > { %4340 = vpow2.f32 %v1683_v36 }
 0x2f1   : > { %4342 = vpow2.f32 %v1685_v15 }
 0x2f2   : > { %4344 = vpow2.f32 %v1675_v59  ;;  %v2390_v1 = vpop.f32.mrf.mxu0  ;;  %v2479_v9 = vpop.f32.mrf.mxu1 }
 0x2f3   : > { %4346 = vpow2.f32 %v1677_v63  ;;  %v2480_v23 = vadd.f32 %v2479_v9, %v2390_v1  ;;  %v5700_v1 = vpop.permute.xlu0 %2851 }
 0x2f5   : > { %v3022_v2 = vadd.f32 %v5669_v37, %v2480_v23  ;;  %v5705_v23 = vld [vmem:[#allocation2 + $0xf0] sm:$0xff] }
 0x2f6   : > { %v5672_v35 = vpop.eup %4340  ;;  %6739 = vst [vmem:[#allocation9_spill] sm:$0xff] %v5705_v23 }
 0x2f7   : > { %v5674_v30 = vpop.eup %4342  ;;  %3086 = vst [vmem:[%s5488_s19 + $0x70] sm:$0xff] %v3022_v2 }
 0x2f8   : > { %v4345_v26 = vpop.eup %4344  ;;  %v5679_v15 = vadd.f32 %v5674_v30, %v5672_v35 }
 0x2f9   : > { %v4347_v36 = vpop.eup %4346  ;;  %1832 = vadd.xlane.f32.xlu0 %v5358_v39 }
 0x2fa   : > { %v1992_v45 = vpack.c.bf16 %v4347_v36, %v4345_v26  ;;  %v5682_v24 = vadd.f32 %v4347_v36, %v4345_v26  ;;  %v1755_v26 = vld [vmem:[#allocation3] sm:$0xff]  ;;  %v5712_v36 = vpop.permute.xlu2 %2841 }
 0x2fc   : > { %v2100_v60 = vunpack.c.l.b16 %v1992_v45  ;;  %v2101_v59 = vunpack.c.h.b16 %v1992_v45  ;;  %v6740_v45 = vld [vmem:[#allocation15_spill] sm:$0xff] }
 0x2fd   : > { %1500 = vperm.xlu1 %4257, %v5338_v42  }
 0x2fe   : > { %v5685_v54 = vpack.c.b16 %v2102_v18, %v2100_v60  ;;  %v5687_v63 = vpack.c.b16 %v2103_v27, %v2101_v59  ;;  %v6741_v18 = vld [vmem:[#allocation16_spill] sm:$0xff]  ;;  %v6742_v27 = vld [vmem:[#allocation17_spill] sm:$0xff] }
 0x300   : > { %6737 = vst [vmem:[#allocation12_spill] sm:$0xff] %v5685_v54  ;;  %2402 = vmatmul.bf16.gmra.mxu0 %v5685_v54  ;;  %2491 = vmatmul.bf16.gmra.mxu1 %v5687_v63 }
 0x301   : > { %6738 = vst [vmem:[#allocation8_spill] sm:$0xff] %v5687_v63 }
 0x303   : > { %1823 = vadd.xlane.f32.xlu2 %v5269_v43 }
 0x304   : > { %v1265_v39 = vpop.xlane.xlu1 %1264 }
 0x305   : > { %v5695_v53 = vmax.f32 %v5691_v11, %v1265_v39  ;;  %v1787_v39 = vmul.f32 %v6742_v27, %v1755_v26  ;;  %v6746_v27 = vld [vmem:[#allocation14_spill] sm:$0xff] }
 0x307   : > { %3164 = vst.msk [vmem:[#allocation2 + $0xe0] sm:$0xff] %vm286_vm3, %v5695_v53 }
 0x30d   : > { %1520 = vperm.xlu0 %4256, %v5545_v58  }
 0x31b   : > { %1495 = vperm.xlu2 %4255, %v5311_v6  }
 0x31c   : > { %v5703_v9 = vpop.permute.xlu1 %2846 }
 0x31e   : > { %v1271_v2 = vpop.xlane.xlu0 %1270 }
 0x31f   : > { %v5708_v43 = vmax.f32 %v5705_v23, %v1271_v2  ;;  %v5719_v2 = vld [vmem:[#allocation2 + $0xe8] sm:$0xff] }
 0x320   : > { %6743 = vst [vmem:[#allocation15_spill] sm:$0xff] %v5719_v2 }
 0x321   : > { %3166 = vst.msk [vmem:[#allocation2 + $0xf0] sm:$0xff] %vm286_vm3, %v5708_v43 }
 0x324   : > { %v1486_v25 = vpop.permute.xlu1 %1485 }
 0x325   : > { %v1595_v60 = vsub.f32 %v6740_v45, %v1486_v25  ;;  %v1596_v59 = vsub.f32 %v6741_v18, %v1486_v25  ;;  %v6745_v18 = vld [vmem:[#allocation13_spill] sm:$0xff] }
 0x326   : > { %v1821_v37 = vpop.xlane.xlu0 %1820 }
 0x327   : > { %v1691_v13 = vmul.f32 1.442695, %v1595_v60  ;;  %v1693_v63 = vmul.f32 1.442695, %v1596_v59  ;;  %v1915_v54 = vadd.f32 %v1821_v37, %v1787_v39  ;;  %1835 = vadd.xlane.f32.xlu1 %v5400_v49 }
 0x329   : > { %4348 = vpow2.f32 %v1691_v13  ;;  %1948 = vst.msk [vmem:[#allocation3] sm:$0xff] %vm286_vm3, %v1915_v54  ;;  %v5735_v54 = vmul.f32 0.0, %v5647_v40  ;;  %v6748_v40 = vld [vmem:[#allocation19_spill] sm:$0xff] }
 0x32a   : > { %4350 = vpow2.f32 %v1693_v63 }
 0x32b   : > { %6744 = vst [vmem:[#allocation16_spill] sm:$0xff] %v5735_v54 }
 0x32d   : > { %v1268_v20 = vpop.xlane.xlu2 %1267 }
 0x32e   : > { %v5722_v45 = vmax.f32 %v5719_v2, %v1268_v20 }
 0x32f   : > { %v5724_v25 = vpop.eup %4348 }
 0x330   : > { %v5726_v26 = vpop.eup %4350  ;;  %3165 = vst.msk [vmem:[#allocation2 + $0xe8] sm:$0xff] %vm286_vm3, %v5722_v45 }
 0x331   : > { %v5732_v49 = vadd.f32 %v5726_v26, %v5724_v25 }
 0x333   : > { %v2393_v13 = vpop.f32.mrf.mxu0  ;;  %v2482_v37 = vpop.f32.mrf.mxu1 }
 0x334   : > { %v2483_v63 = vadd.f32 %v2482_v37, %v2393_v13 }
 0x335   : > { %v1481_v60 = vpop.permute.xlu2 %1480 }
 0x336   : > { %v3024_v20 = vadd.f32 %v5735_v54, %v2483_v63  ;;  %v1593_v59 = vsub.f32 %v6745_v18, %v1481_v60  ;;  %v1594_v39 = vsub.f32 %v6746_v27, %v1481_v60  ;;  %v5745_v63 = vmul.f32 0.0, %v5620_v29  ;;  %v6751_v29 = vld [vmem:[#allocation33_spill] sm:$0xff] }
 0x337   : > { %1841 = vadd.xlane.f32.xlu0 %v5423_v14 }
 0x338   : > { %3088 = vst [vmem:[%s5488_s19 + $0x80] sm:$0xff] %v3024_v20  ;;  %v1687_v10 = vmul.f32 1.442695, %v1593_v59  ;;  %v1689_v34 = vmul.f32 1.442695, %v1594_v39 }
 0x339   : > { %v1491_v2 = vpop.permute.xlu0 %1490  ;;  %6749 = vst [vmem:[#allocation17_spill] sm:$0xff] %v5745_v63 }
 0x33a   : > { %4352 = vpow2.f32 %v1687_v10  ;;  %v1597_v23 = vsub.f32 %v6747_v62, %v1491_v2  ;;  %v1598_v58 = vsub.f32 %v6748_v40, %v1491_v2  ;;  %v1994_v10 = vpack.c.bf16 %v5674_v30, %v5672_v35  ;;  %v6750_v2 = vld [vmem:[#allocation29_spill] sm:$0xff] }
 0x33b   : > { %4354 = vpow2.f32 %v1689_v34  ;;  %v2395_v13 = vpop.f32.mrf.mxu0  ;;  %v2484_v37 = vpop.f32.mrf.mxu1  ;;  %v5757_v40 = vmul.f32 0.0, %v5617_v44 }
 0x33c   : > { %v1695_v18 = vmul.f32 1.442695, %v1597_v23  ;;  %v1697_v60 = vmul.f32 1.442695, %v1598_v58  ;;  %v2485_v27 = vadd.f32 %v2484_v37, %v2395_v13 }
 0x33d   : > { %6752 = vst [vmem:[#allocation13_spill] sm:$0xff] %v5757_v40 }
 0x33e   : > { %4356 = vpow2.f32 %v1695_v18  ;;  %v3026_v14 = vadd.f32 %v5745_v63, %v2485_v27  ;;  %v2104_v18 = vunpack.c.l.b16 %v1994_v10  ;;  %v2105_v63 = vunpack.c.h.b16 %v1994_v10 }
 0x33f   : > { %4358 = vpow2.f32 %v1697_v60 }
 0x340   : > { %v4353_v20 = vpop.eup %4352  ;;  %3090 = vst [vmem:[%s5488_s19 + $0x90] sm:$0xff] %v3026_v14  ;;  %1515 = vperm.xlu1 %4257, %v5486_v31  }
 0x341   : > { %v4355_v34 = vpop.eup %4354  ;;  %v1506_v62 = vpop.permute.xlu0 %1505 }
 0x342   : > { %v1603_v59 = vsub.f32 %v6750_v2, %v1506_v62  ;;  %v1604_v39 = vsub.f32 %v6751_v29, %v1506_v62  ;;  %v1995_v23 = vpack.c.bf16 %v4355_v34, %v4353_v20  ;;  %v5754_v58 = vadd.f32 %v4355_v34, %v4353_v20 }
 0x343   : > { %v2398_v13 = vpop.f32.mrf.mxu0  ;;  %v2487_v37 = vpop.f32.mrf.mxu1 }
 0x344   : > { %v4357_v35 = vpop.eup %4356  ;;  %v1707_v30 = vmul.f32 1.442695, %v1603_v59  ;;  %v1709_v60 = vmul.f32 1.442695, %v1604_v39  ;;  %v2488_v27 = vadd.f32 %v2487_v37, %v2398_v13  ;;  %1829 = vadd.xlane.f32.xlu2 %v5342_v3  ;;  %v2106_v14 = vunpack.c.l.b16 %v1995_v23  ;;  %v5778_v13 = vld [vmem:[#allocation2 + $0xf8] sm:$0xff] }
 0x345   : > { %v4359_v2 = vpop.eup %4358  ;;  %v2107_v62 = vunpack.c.h.b16 %v1995_v23  ;;  %v5774_v39 = vmul.f32 0.0, %v5712_v36  ;;  %v1996_v36 = vpack.c.bf16 %v5726_v26, %v5724_v25  ;;  %v1759_v25 = vld [vmem:[#allocation3 + $0x20] sm:$0xff]  ;;  %v6760_v26 = vld [vmem:[#allocation26_spill] sm:$0xff] }
 0x346   : > { %4360 = vpow2.f32 %v1707_v30  ;;  %v3028_v20 = vadd.f32 %v5757_v40, %v2488_v27  ;;  %v5761_v34 = vpack.c.b16 %v2106_v14, %v2104_v18  ;;  %v5765_v29 = vadd.f32 %v4359_v2, %v4357_v35 }
 0x347   : > { %4362 = vpow2.f32 %v1709_v60  ;;  %v5763_v44 = vpack.c.b16 %v2107_v62, %v2105_v63  ;;  %6755 = vst [vmem:[#allocation19_spill] sm:$0xff] %v5774_v39  ;;  %v1997_v18 = vpack.c.bf16 %v4359_v2, %v4357_v35  ;;  %v2109_v35 = vunpack.c.h.b16 %v1996_v36 }
 0x348   : > { %6753 = vst [vmem:[#allocation14_spill] sm:$0xff] %v5761_v34  ;;  %2407 = vmatmul.bf16.vlgmr.msra.gmra.mxu2 %v5761_v34 }
 0x349   : > { %6754 = vst [vmem:[#allocation18_spill] sm:$0xff] %v5763_v44  ;;  %2496 = vmatmul.bf16.vlgmr.msra.gmra.mxu3 %v5763_v44  ;;  %v2110_v14 = vunpack.c.l.b16 %v1997_v18  ;;  %v2111_v62 = vunpack.c.h.b16 %v1997_v18  ;;  %v1791_v18 = vmul.f32 %v6760_v26, %v1759_v25 }
 0x34a   : > { %3092 = vst [vmem:[%s5488_s19 + $0xa0] sm:$0xff] %v3028_v20  ;;  %v1757_v20 = vld [vmem:[#allocation3 + $0x10] sm:$0xff] }
 0x34b   : > { %v2400_v3 = vpop.f32.mrf.mxu0  ;;  %v2489_v59 = vpop.f32.mrf.mxu1  ;;  %1535 = vperm.xlu0 %4256, %v5653_v7   ;;  %v5796_v40 = vpack.c.b16 %v2111_v62, %v2109_v35 }
 0x34c   : > { %v5771_v10 = vpop.eup %4360  ;;  %v2490_v23 = vadd.f32 %v2489_v59, %v2400_v3  ;;  %v2108_v3 = vunpack.c.l.b16 %v1996_v36  ;;  %v6758_v59 = vld [vmem:[#allocation25_spill] sm:$0xff] }
 0x34d   : > { %v5776_v63 = vpop.eup %4362  ;;  %6759 = vst [vmem:[#allocation25_spill] sm:$0xff] %v5796_v40 }
 0x34e   : > { %v3030_v37 = vadd.f32 %v5774_v39, %v2490_v23  ;;  %v5783_v30 = vadd.f32 %v5776_v63, %v5771_v10  ;;  %v5793_v2 = vpack.c.b16 %v2110_v14, %v2108_v3  ;;  %v1789_v23 = vmul.f32 %v6758_v59, %v1757_v20  ;;  %v5804_v20 = vpop.permute.xlu2 %2856  ;;  %v6761_v3 = vld [vmem:[#allocation23_spill] sm:$0xff]  ;;  %v6762_v59 = vld [vmem:[#allocation22_spill] sm:$0xff]  ;;  %v1756_v39 = vld [vmem:[#allocation3 + $0x8] sm:$0xff] }
 0x34f   : > { %v1274_v60 = vpop.xlane.xlu1 %1273 }
 0x350   : > { %6756 = vst [vmem:[#allocation29_spill] sm:$0xff] %v5783_v30  ;;  %v5787_v27 = vmax.f32 %v5778_v13, %v1274_v60 }
 0x351   : > { %3094 = vst [vmem:[%s5488_s19 + $0xb0] sm:$0xff] %v3030_v37 }
 0x352   : > { %3167 = vst.msk [vmem:[#allocation2 + $0xf8] sm:$0xff] %vm286_vm3, %v5787_v27 }
 0x353   : > { %6757 = vst [vmem:[#allocation33_spill] sm:$0xff] %v5793_v2 }
 0x357   : > { %v1827_v37 = vpop.xlane.xlu1 %1826 }
 0x358   : > { %2412 = vmatmul.bf16.gmra.mxu2 %v5793_v2  ;;  %v1917_v60 = vadd.f32 %v1827_v37, %v1789_v23 }
 0x359   : > { %2501 = vmatmul.bf16.gmra.mxu3 %v5796_v40 }
 0x35a   : > { %1950 = vst.msk [vmem:[#allocation3 + $0x10] sm:$0xff] %vm286_vm3, %v1917_v60 }
 0x35c   : > { %1510 = vperm.xlu2 %4255, %v5411_v55  }
 0x36a   : > { %1844 = vadd.xlane.f32.xlu1 %v5478_v32  ;;  %v6763_v32 = vld [vmem:[#allocation24_spill] sm:$0xff] }
 0x36b   : > { %v1788_v25 = vmul.f32 %v6763_v32, %v1756_v39 }
 0x36c   : > { %v1833_v36 = vpop.xlane.xlu0 %1832 }
 0x36d   : > { %v1919_v14 = vadd.f32 %v1833_v36, %v1791_v18 }
 0x36f   : > { %1952 = vst.msk [vmem:[#allocation3 + $0x20] sm:$0xff] %vm286_vm3, %v1919_v14  ;;  %v1501_v62 = vpop.permute.xlu1 %1500 }
 0x370   : > { %v1601_v35 = vsub.f32 %v6761_v3, %v1501_v62  ;;  %v1602_v23 = vsub.f32 %v6762_v59, %v1501_v62 }
 0x372   : > { %v1703_v37 = vmul.f32 1.442695, %v1601_v35  ;;  %v1705_v60 = vmul.f32 1.442695, %v1602_v23  ;;  %v5815_v35 = vmul.f32 0.0, %v5703_v9 }
 0x374   : > { %4364 = vpow2.f32 %v1703_v37  ;;  %6764 = vst [vmem:[#allocation26_spill] sm:$0xff] %v5815_v35  ;;  %v6765_v37 = vld [vmem:[#allocation21_spill] sm:$0xff] }
 0x375   : > { %4366 = vpow2.f32 %v1705_v60  ;;  %1850 = vadd.xlane.f32.xlu0 %v5542_v8  ;;  %v6766_v60 = vld [vmem:[#allocation20_spill] sm:$0xff] }
 0x376   : > { %v1824_v26 = vpop.xlane.xlu2 %1823 }
 0x377   : > { %v1916_v18 = vadd.f32 %v1824_v26, %v1788_v25 }
 0x379   : > { %1949 = vst.msk [vmem:[#allocation3 + $0x8] sm:$0xff] %vm286_vm3, %v1916_v18  ;;  %v6767_v18 = vld [vmem:[#allocation48_spill] sm:$0xff] }
 0x37a   : > { %v4365_v36 = vpop.eup %4364 }
 0x37b   : > { %v4367_v14 = vpop.eup %4366 }
 0x37c   : > { %v5812_v54 = vadd.f32 %v4367_v14, %v4365_v36 }
 0x37d   : > { %v2403_v3 = vpop.f32.mrf.mxu0  ;;  %v2492_v62 = vpop.f32.mrf.mxu1 }
 0x37e   : > { %v2493_v59 = vadd.f32 %v2492_v62, %v2403_v3  ;;  %v1496_v23 = vpop.permute.xlu2 %1495  ;;  %v5826_v62 = vmul.f32 0.0, %v5700_v1 }
 0x37f   : > { %v1599_v8 = vsub.f32 %v6765_v37, %v1496_v23  ;;  %v1600_v39 = vsub.f32 %v6766_v60, %v1496_v23  ;;  %v1521_v32 = vpop.permute.xlu0 %1520  ;;  %v1999_v23 = vpack.c.bf16 %v4367_v14, %v4365_v36 }
 0x380   : > { %v3032_v25 = vadd.f32 %v5815_v35, %v2493_v59  ;;  %v1609_v26 = vsub.f32 %v5317_v38, %v1521_v32  ;;  %v1610_v40 = vsub.f32 %v6767_v18, %v1521_v32  ;;  %6768 = vst [vmem:[#allocation23_spill] sm:$0xff] %v5826_v62  ;;  %v1760_v32 = vld [vmem:[#allocation3 + $0x28] sm:$0xff] }
 0x381   : > { %v1699_v2 = vmul.f32 1.442695, %v1599_v8  ;;  %v1701_v44 = vmul.f32 1.442695, %v1600_v39 }
 0x382   : > { %3096 = vst [vmem:[%s5488_s19 + $0xc0] sm:$0xff] %v3032_v25  ;;  %v1719_v34 = vmul.f32 1.442695, %v1609_v26  ;;  %v1721_v30 = vmul.f32 1.442695, %v1610_v40  ;;  %v6769_v25 = vld [vmem:[#allocation39_spill] sm:$0xff] }
 0x383   : > { %4368 = vpow2.f32 %v1699_v2  ;;  %1530 = vperm.xlu1 %4257, %v5597_v0   ;;  %v1792_v26 = vmul.f32 %v6769_v25, %v1760_v32 }
 0x384   : > { %4370 = vpow2.f32 %v1701_v44 }
 0x385   : > { %4372 = vpow2.f32 %v1719_v34  ;;  %v2405_v9 = vpop.f32.mrf.mxu0  ;;  %v2494_v3 = vpop.f32.mrf.mxu1  ;;  %1838 = vadd.xlane.f32.xlu2 %v5454_v21  ;;  %v2114_v21 = vunpack.c.l.b16 %v1999_v23 }
 0x386   : > { %4374 = vpow2.f32 %v1721_v30  ;;  %v2495_v38 = vadd.f32 %v2494_v3, %v2405_v9  ;;  %v2115_v30 = vunpack.c.h.b16 %v1999_v23  ;;  %v1762_v3 = vld [vmem:[#allocation3 + $0x38] sm:$0xff] }
 0x388   : > { %v3034_v59 = vadd.f32 %v5826_v62, %v2495_v38  ;;  %v6770_v38 = vld [vmem:[#allocation36_spill] sm:$0xff] }
 0x389   : > { %v4369_v37 = vpop.eup %4368  ;;  %1550 = vperm.xlu0 %4256, %v5722_v45  }
 0x38a   : > { %v4371_v40 = vpop.eup %4370  ;;  %3098 = vst [vmem:[%s5488_s19 + $0xd0] sm:$0xff] %v3034_v59  ;;  %v1794_v59 = vmul.f32 %v6770_v38, %v1762_v3 }
 0x38b   : > { %v5831_v2 = vpop.eup %4372  ;;  %v1998_v34 = vpack.c.bf16 %v4371_v40, %v4369_v37  ;;  %v5833_v44 = vadd.f32 %v4371_v40, %v4369_v37 }
 0x38c   : > { %v5835_v8 = vpop.eup %4374 }
 0x38d   : > { %v2112_v1 = vunpack.c.l.b16 %v1998_v34  ;;  %v2113_v60 = vunpack.c.h.b16 %v1998_v34  ;;  %v5839_v39 = vadd.f32 %v5835_v8, %v5831_v2  ;;  %v6771_v34 = vld [vmem:[#allocation38_spill] sm:$0xff] }
 0x38f   : > { %v5841_v36 = vpack.c.b16 %v2114_v21, %v2112_v1  ;;  %v5843_v14 = vpack.c.b16 %v2115_v30, %v2113_v60  ;;  %v6772_v1 = vld [vmem:[#allocation37_spill] sm:$0xff]  ;;  %v1758_v30 = vld [vmem:[#allocation3 + $0x18] sm:$0xff] }
 0x391   : > { %2417 = vmatmul.bf16.gmra.mxu2 %v5841_v36  ;;  %2506 = vmatmul.bf16.gmra.mxu3 %v5843_v14 }
 0x39a   : > { %v1836_v18 = vpop.xlane.xlu1 %1835 }
 0x39b   : > { %v1920_v9 = vadd.f32 %v1836_v18, %v1792_v26  ;;  %v6773_v26 = vld [vmem:[#allocation27_spill] sm:$0xff] }
 0x39c   : > { %v1790_v18 = vmul.f32 %v6773_v26, %v1758_v30 }
 0x39d   : > { %1953 = vst.msk [vmem:[#allocation3 + $0x28] sm:$0xff] %vm286_vm3, %v1920_v9  ;;  %1525 = vperm.xlu2 %4255, %v5528_v4   ;;  %v6774_v9 = vld [vmem:[#allocation30_spill] sm:$0xff] }
 0x39e   : > { %v1323_v3 = vsub.f32 %v6774_v9, %v5243_v46 }
 0x3aa   : > { %v1842_v23 = vpop.xlane.xlu0 %1841 }
 0x3ab   : > { %v1922_v37 = vadd.f32 %v1842_v23, %v1794_v59 }
 0x3ad   : > { %1955 = vst.msk [vmem:[#allocation3 + $0x38] sm:$0xff] %vm286_vm3, %v1922_v37  ;;  %1853 = vadd.xlane.f32.xlu1 %v5578_v57  ;;  %v1371_v57 = vmul.f32 1.442695, %v1323_v3 }
 0x3b2   : > { %v1516_v40 = vpop.permute.xlu1 %1515 }
 0x3b3   : > { %v1607_v21 = vsub.f32 %v6771_v34, %v1516_v40  ;;  %v1608_v60 = vsub.f32 %v6772_v1, %v1516_v40  ;;  %1859 = vadd.xlane.f32.xlu0 %v5655_v41 }
 0x3b5   : > { %v1715_v32 = vmul.f32 1.442695, %v1607_v21  ;;  %v1717_v25 = vmul.f32 1.442695, %v1608_v60  ;;  %v6775_v21 = vld [vmem:[#allocation45_spill] sm:$0xff] }
 0x3b6   : > { %v1326_v1 = vsub.f32 %v6775_v21, %v5338_v42 }
 0x3b7   : > { %4376 = vpow2.f32 %v1715_v32  ;;  %v1830_v38 = vpop.xlane.xlu2 %1829 }
 0x3b8   : > { %4378 = vpow2.f32 %v1717_v25  ;;  %v1918_v59 = vadd.f32 %v1830_v38, %v1790_v18  ;;  %v6776_v25 = vld [vmem:[#allocation32_spill] sm:$0xff]  ;;  %v6777_v18 = vld [vmem:[#allocation31_spill] sm:$0xff] }
 0x3b9   : > { %4380 = vpow2.f32 %v1371_v57 }
 0x3ba   : > { %1951 = vst.msk [vmem:[#allocation3 + $0x18] sm:$0xff] %vm286_vm3, %v1918_v59  ;;  %v1329_v59 = vsub.f32 %v5474_v56, %v5486_v31  ;;  %v5888_v56 = vmul.f32 0.0, %v5804_v20 }
 0x3bc   : > { %6778 = vst [vmem:[#allocation22_spill] sm:$0xff] %v5888_v56 }
 0x3bd   : > { %v4377_v23 = vpop.eup %4376  ;;  %v1536_v37 = vpop.permute.xlu0 %1535 }
 0x3be   : > { %v4379_v40 = vpop.eup %4378  ;;  %v1615_v41 = vsub.f32 %v5362_v22, %v1536_v37  ;;  %v1616_v34 = vsub.f32 %v5463_v5, %v1536_v37  ;;  %v1377_v22 = vmul.f32 1.442695, %v1326_v1  ;;  %v1383_v1 = vmul.f32 1.442695, %v1329_v59 }
 0x3bf   : > { %v1511_v60 = vpop.permute.xlu2 %1510  ;;  %v5864_v46 = vadd.f32 %v4379_v40, %v4377_v23  ;;  %v5868_v5 = vpop.eup %4380 }
 0x3c0   : > { %v1731_v30 = vmul.f32 1.442695, %v1615_v41  ;;  %v1733_v32 = vmul.f32 1.442695, %v1616_v34  ;;  %v1605_v26 = vsub.f32 %v6776_v25, %v1511_v60  ;;  %v1606_v9 = vsub.f32 %v6777_v18, %v1511_v60 }
 0x3c1   : > { %v2000_v41 = vpack.c.bf16 %v5776_v63, %v5771_v10 }
 0x3c2   : > { %4382 = vpow2.f32 %v1731_v30  ;;  %v1711_v3 = vmul.f32 1.442695, %v1605_v26  ;;  %v1713_v38 = vmul.f32 1.442695, %v1606_v9 }
 0x3c3   : > { %4384 = vpow2.f32 %v1733_v32  ;;  %v2116_v26 = vunpack.c.l.b16 %v2000_v41  ;;  %v2117_v63 = vunpack.c.h.b16 %v2000_v41  ;;  %v2002_v41 = vpack.c.bf16 %v4379_v40, %v4377_v23  ;;  %v6780_v23 = vld [vmem:[#allocation51_spill] sm:$0xff] }
 0x3c4   : > { %4386 = vpow2.f32 %v1711_v3  ;;  %v1332_v3 = vsub.f32 %v5592_v28, %v5597_v0  ;;  %v1763_v28 = vld [vmem:[#allocation3 + $0x40] sm:$0xff]  ;;  %v2003_v0 = vpack.c.bf16 %v5835_v8, %v5831_v2  ;;  %v1765_v2 = vld [vmem:[#allocation3 + $0x50] sm:$0xff] }
 0x3c5   : > { %4388 = vpow2.f32 %v1713_v38  ;;  %v1797_v40 = vmul.f32 %v6780_v23, %v1765_v2 }
 0x3c6   : > { %1847 = vadd.xlane.f32.xlu2 %v5575_v19  ;;  %1545 = vperm.xlu1 %4257, %v5695_v53   ;;  %4390 = vpow2.f32 %v1377_v22  ;;  %v1389_v20 = vmul.f32 1.442695, %v1332_v3 }
 0x3c7   : > { %2866 = vperm.xlu0 %4256, %v5868_v5   ;;  %4392 = vpow2.f32 %v1383_v1 }
 0x3c8   : > { %v5873_v42 = vpop.eup %4382  ;;  %4394 = vpow2.f32 %v1389_v20  ;;  %v1761_v20 = vld [vmem:[#allocation3 + $0x30] sm:$0xff] }
 0x3c9   : > { %v5877_v57 = vpop.eup %4384 }
 0x3ca   : > { %v4387_v37 = vpop.eup %4386  ;;  %v5883_v34 = vadd.f32 %v5877_v57, %v5873_v42 }
 0x3cb   : > { %v4389_v19 = vpop.eup %4388  ;;  %v2408_v21 = vpop.f32.mrf.mxu2 }
 0x3cc   : > { %v2497_v60 = vpop.f32.mrf.mxu3  ;;  %v2001_v30 = vpack.c.bf16 %v4389_v19, %v4387_v37  ;;  %v5885_v32 = vadd.f32 %v4389_v19, %v4387_v37  ;;  %v5890_v25 = vpop.eup %4390  ;;  %v1335_v37 = vsub.f32 %v5691_v11, %v5695_v53 }
 0x3cd   : > { %v2498_v31 = vadd.f32 %v2497_v60, %v2408_v21  ;;  %v5903_v59 = vpop.eup %4392  ;;  %v6779_v21 = vld [vmem:[#allocation54_spill] sm:$0xff]  ;;  %v2120_v60 = vunpack.c.l.b16 %v2002_v41 }
 0x3ce   : > { %v2118_v10 = vunpack.c.l.b16 %v2001_v30  ;;  %v2119_v18 = vunpack.c.h.b16 %v2001_v30  ;;  %v1395_v19 = vmul.f32 1.442695, %v1335_v37  ;;  %v1795_v1 = vmul.f32 %v6779_v21, %v1763_v28 }
 0x3cf   : > { %v3036_v9 = vadd.f32 %v5888_v56, %v2498_v31  ;;  %2881 = vperm.xlu0 %4256, %v5890_v25   ;;  %v2121_v30 = vunpack.c.h.b16 %v2002_v41  ;;  %v6781_v41 = vld [vmem:[#allocation49_spill] sm:$0xff] }
 0x3d0   : > { %v5896_v38 = vpack.c.b16 %v2118_v10, %v2116_v26  ;;  %v5898_v22 = vpack.c.b16 %v2119_v18, %v2117_v63  ;;  %v5911_v26 = vpop.eup %4394  ;;  %v2122_v63 = vunpack.c.l.b16 %v2003_v0  ;;  %v2123_v18 = vunpack.c.h.b16 %v2003_v0  ;;  %v6782_v0 = vld [vmem:[#allocation52_spill] sm:$0xff] }
 0x3d1   : > { %3100 = vst [vmem:[%s5488_s19 + $0xe0] sm:$0xff] %v3036_v9  ;;  %4396 = vpow2.f32 %v1395_v19 }
 0x3d2   : > { %2422 = vmatmul.bf16.gmra.mxu2 %v5896_v38  ;;  %2511 = vmatmul.bf16.gmra.mxu3 %v5898_v22  ;;  %v5916_v11 = vpack.c.b16 %v2122_v63, %v2120_v60  ;;  %v5918_v53 = vpack.c.b16 %v2123_v18, %v2121_v30 }
 0x3d3   : > { %v5930_v21 = vpop.f32.mrf.mxu2 }
 0x3d4   : > { %v5933_v30 = vpop.f32.mrf.mxu3 }
 0x3d7   : > { %2896 = vperm.xlu0 %4256, %v5903_v59   ;;  %v5922_v8 = vpop.eup %4396 }
 0x3dd   : > { %v1845_v31 = vpop.xlane.xlu1 %1844 }
 0x3de   : > { %v1923_v10 = vadd.f32 %v1845_v31, %v1795_v1  ;;  %1540 = vperm.xlu2 %4255, %v5640_v16   ;;  %v6783_v1 = vld [vmem:[#allocation42_spill] sm:$0xff] }
 0x3df   : > { %2911 = vperm.xlu0 %4256, %v5911_v26   ;;  %v1793_v60 = vmul.f32 %v6783_v1, %v1761_v20  ;;  %v6786_v1 = vld [vmem:[#allocation28_spill] sm:$0xff] }
 0x3e0   : > { %1956 = vst.msk [vmem:[#allocation3 + $0x40] sm:$0xff] %vm286_vm3, %v1923_v10 }
 0x3e2   : > { %2427 = vmatmul.bf16.gmra.mxu2 %v5916_v11  ;;  %2516 = vmatmul.bf16.gmra.mxu3 %v5918_v53 }
 0x3e7   : > { %2926 = vperm.xlu0 %4256, %v5922_v8  }
 0x3e8   : > { %v1851_v9 = vpop.xlane.xlu0 %1850 }
 0x3e9   : > { %v1925_v3 = vadd.f32 %v1851_v9, %v1797_v40 }
 0x3eb   : > { %1958 = vst.msk [vmem:[#allocation3 + $0x50] sm:$0xff] %vm286_vm3, %v1925_v3 }
 0x3f0   : > { %1862 = vadd.xlane.f32.xlu1 %v5679_v15 }
 0x3f5   : > { %v1531_v37 = vpop.permute.xlu1 %1530 }
 0x3f6   : > { %v1613_v28 = vsub.f32 %v6781_v41, %v1531_v37  ;;  %v1614_v19 = vsub.f32 %v6782_v0, %v1531_v37  ;;  %v6784_v41 = vld [vmem:[#allocation44_spill] sm:$0xff]  ;;  %v6785_v0 = vld [vmem:[#allocation43_spill] sm:$0xff] }
 0x3f8   : > { %v1727_v31 = vmul.f32 1.442695, %v1613_v28  ;;  %v1729_v10 = vmul.f32 1.442695, %v1614_v19  ;;  %v1839_v63 = vpop.xlane.xlu2 %1838 }
 0x3f9   : > { %v1921_v18 = vadd.f32 %v1839_v63, %v1793_v60  ;;  %v1322_v60 = vsub.f32 %v6786_v1, %v5232_v51 }
 0x3fa   : > { %4398 = vpow2.f32 %v1727_v31  ;;  %v5942_v31 = vpop.f32.mrf.mxu2 }
 0x3fb   : > { %4400 = vpow2.f32 %v1729_v10  ;;  %1954 = vst.msk [vmem:[#allocation3 + $0x30] sm:$0xff] %vm286_vm3, %v1921_v18  ;;  %v1551_v15 = vpop.permute.xlu0 %1550  ;;  %v5944_v10 = vpop.f32.mrf.mxu3 }
 0x3fc   : > { %v1621_v2 = vsub.f32 %v5413_v52, %v1551_v15  ;;  %v1622_v23 = vsub.f32 %v5588_v12, %v1551_v15  ;;  %v1369_v15 = vmul.f32 1.442695, %v1322_v60 }
 0x3fe   : > { %v1743_v40 = vmul.f32 1.442695, %v1621_v2  ;;  %v1745_v9 = vmul.f32 1.442695, %v1622_v23  ;;  %v6787_v23 = vld [vmem:[#allocation41_spill] sm:$0xff] }
 0x400   : > { %v4399_v3 = vpop.eup %4398  ;;  %4402 = vpow2.f32 %v1743_v40  ;;  %v1526_v20 = vpop.permute.xlu2 %1525  ;;  %v1325_v40 = vsub.f32 %v6787_v23, %v5311_v6 }
 0x401   : > { %v4401_v37 = vpop.eup %4400  ;;  %4404 = vpow2.f32 %v1745_v9  ;;  %v1611_v28 = vsub.f32 %v6784_v41, %v1526_v20  ;;  %v1612_v19 = vsub.f32 %v6785_v0, %v1526_v20 }
 0x402   : > { %v5946_v52 = vadd.f32 %v4401_v37, %v4399_v3  ;;  %v2005_v20 = vpack.c.bf16 %v4401_v37, %v4399_v3  ;;  %v6788_v37 = vld [vmem:[#allocation55_spill] sm:$0xff] }
 0x403   : > { %v1723_v12 = vmul.f32 1.442695, %v1611_v28  ;;  %v1725_v63 = vmul.f32 1.442695, %v1612_v19  ;;  %v5960_v28 = vpop.f32.mrf.mxu2  ;;  %v5962_v0 = vpop.f32.mrf.mxu3 }
 0x404   : > { %v2127_v62 = vunpack.c.h.b16 %v2005_v20 }
 0x405   : > { %4406 = vpow2.f32 %v1723_v12  ;;  %v2126_v12 = vunpack.c.l.b16 %v2005_v20 }
 0x406   : > { %v5948_v18 = vpop.eup %4402  ;;  %4408 = vpow2.f32 %v1725_v63 }
 0x407   : > { %v5950_v2 = vpop.eup %4404  ;;  %1856 = vadd.xlane.f32.xlu2 %v5682_v24  ;;  %4410 = vpow2.f32 %v1369_v15  ;;  %v1375_v24 = vmul.f32 1.442695, %v1325_v40  ;;  %v1328_v15 = vsub.f32 %v6788_v37, %v5411_v55  ;;  %v1331_v55 = vsub.f32 %v5522_v17, %v5528_v4  ;;  %v1768_v17 = vld [vmem:[#allocation3 + $0x68] sm:$0xff] }
 0x408   : > { %v5955_v51 = vadd.f32 %v5950_v2, %v5948_v18  ;;  %v1334_v4 = vsub.f32 %v5632_v61, %v5640_v16  ;;  %v6793_v16 = vld [vmem:[#allocation69_spill] sm:$0xff] }
 0x409   : > { %1560 = vperm.xlu1 %4257, %v5787_v27   ;;  %4412 = vpow2.f32 %v1375_v24  ;;  %v1381_v20 = vmul.f32 1.442695, %v1328_v15 }
 0x40b   : > { %v4407_v9 = vpop.eup %4406  ;;  %4414 = vpow2.f32 %v1381_v20 }
 0x40c   : > { %v4409_v41 = vpop.eup %4408 }
 0x40d   : > { %v2004_v19 = vpack.c.bf16 %v4409_v41, %v4407_v9  ;;  %v5964_v1 = vadd.f32 %v4409_v41, %v4407_v9  ;;  %v5966_v35 = vpop.eup %4410 }
 0x40f   : > { %v2124_v60 = vunpack.c.l.b16 %v2004_v19  ;;  %v2125_v63 = vunpack.c.h.b16 %v2004_v19  ;;  %v5982_v41 = vpop.eup %4412 }
 0x411   : > { %1868 = vadd.xlane.f32.xlu0 %v5732_v49  ;;  %2861 = vperm.xlu1 %4257, %v5966_v35   ;;  %v5970_v6 = vpack.c.b16 %v2126_v12, %v2124_v60  ;;  %v5972_v3 = vpack.c.b16 %v2127_v62, %v2125_v63  ;;  %v1338_v49 = vsub.f32 %v5778_v13, %v5787_v27  ;;  %v6789_v62 = vld [vmem:[#allocation40_spill] sm:$0xff]  ;;  %v1766_v12 = vld [vmem:[#allocation3 + $0x58] sm:$0xff]  ;;  %v1387_v63 = vmul.f32 1.442695, %v1331_v55  ;;  %v5991_v27 = vpop.eup %4414 }
 0x412   : > { %v1324_v19 = vsub.f32 %v6789_v62, %v5302_v47  ;;  %v1798_v13 = vmul.f32 %v5520_v50, %v1766_v12  ;;  %v6790_v47 = vld [vmem:[#allocation58_spill] sm:$0xff]  ;;  %v1393_v62 = vmul.f32 1.442695, %v1334_v4 }
 0x413   : > { %2432 = vmatmul.bf16.gmra.mxu2 %v5970_v6  ;;  %2521 = vmatmul.bf16.gmra.mxu3 %v5972_v3  ;;  %v1401_v24 = vmul.f32 1.442695, %v1338_v49  ;;  %v1327_v37 = vsub.f32 %v6790_v47, %v5426_v33  ;;  %v1800_v49 = vmul.f32 %v5501_v48, %v1768_v17  ;;  %v6795_v48 = vld [vmem:[#allocation9_spill] sm:$0xff] }
 0x414   : > { %v2418_v23 = vpop.f32.mrf.mxu2  ;;  %v2507_v40 = vpop.f32.mrf.mxu3  ;;  %v1373_v60 = vmul.f32 1.442695, %v1324_v19  ;;  %v1337_v12 = vsub.f32 %v6795_v48, %v5708_v43 }
 0x415   : > { %v5978_v9 = vadd.f32 %v2507_v40, %v2418_v23  ;;  %4416 = vpow2.f32 %v1401_v24  ;;  %v3173_v40 = vld [vmem:[#allocation3 + $0x10] sm:$0xff]  ;;  %v1379_v50 = vmul.f32 1.442695, %v1327_v37  ;;  %v6794_v24 = vld [vmem:[#allocation68_spill] sm:$0xff] }
 0x416   : > { %4418 = vpow2.f32 %v1373_v60  ;;  %v1330_v60 = vsub.f32 %v6794_v24, %v6793_v16  ;;  %v1399_v37 = vmul.f32 1.442695, %v1337_v12  ;;  %v6801_v24 = vld [vmem:[#allocation53_spill] sm:$0xff] }
 0x417   : > { %4420 = vpow2.f32 %v1387_v63 }
 0x418   : > { %4422 = vrcp.f32 %v3173_v40  ;;  %v1764_v40 = vld [vmem:[#allocation3 + $0x48] sm:$0xff] }
 0x419   : > { %2876 = vperm.xlu1 %4257, %v5982_v41   ;;  %4424 = vpow2.f32 %v1379_v50 }
 0x41a   : > { %4426 = vpow2.f32 %v1393_v62 }
 0x41b   : > { %v5999_v20 = vpop.eup %4416 }
 0x41c   : > { %6791 = vst [vmem:[#allocation24_spill] sm:$0xff] %v5999_v20  ;;  %v6003_v33 = vpop.eup %4418 }
 0x41d   : > { %v6006_v61 = vpop.eup %4420 }
 0x41e   : > { %6792 = vst [vmem:[#allocation21_spill] sm:$0xff] %v6006_v61  ;;  %v4423_v63 = vpop.eup %4422 }
 0x41f   : > { %1555 = vperm.xlu2 %4255, %v5708_v43   ;;  %v6014_v47 = vpop.eup %4424 }
 0x420   : > { %v1854_v15 = vpop.xlane.xlu1 %1853 }
 0x421   : > { %v1926_v23 = vadd.f32 %v1854_v15, %v1798_v13  ;;  %2891 = vperm.xlu1 %4257, %v5991_v27   ;;  %v1385_v13 = vmul.f32 1.442695, %v1330_v60  ;;  %v6017_v15 = vpop.eup %4426  ;;  %v6802_v60 = vld [vmem:[#allocation67_spill] sm:$0xff] }
 0x422   : > { %6796 = vst [vmem:[#allocation20_spill] sm:$0xff] %v6017_v15 }
 0x423   : > { %1959 = vst.msk [vmem:[#allocation3 + $0x58] sm:$0xff] %vm286_vm3, %v1926_v23  ;;  %4428 = vpow2.f32 %v1385_v13  ;;  %v6797_v23 = vld [vmem:[#allocation10_spill] sm:$0xff]  ;;  %v2503_v13 = vadd.f32 %v5944_v10, %v5942_v31 }
 0x424   : > { %v1333_v4 = vsub.f32 %v6797_v23, %v5653_v7  ;;  %4430 = vpow2.f32 %v1399_v37 }
 0x425   : > { %2941 = vperm.xlu0 %4256, %v5999_v20   ;;  %v3171_v20 = vld [vmem:[#allocation3] sm:$0xff] }
 0x426   : > { %v1860_v19 = vpop.xlane.xlu0 %1859  ;;  %v1391_v17 = vmul.f32 1.442695, %v1333_v4 }
 0x427   : > { %v1928_v55 = vadd.f32 %v1860_v19, %v1800_v49  ;;  %2871 = vperm.xlu2 %4255, %v6003_v33   ;;  %v6799_v49 = vld [vmem:[#allocation15_spill] sm:$0xff] }
 0x428   : > { %4432 = vpow2.f32 %v1391_v17  ;;  %v1336_v62 = vsub.f32 %v6799_v49, %v5722_v45 }
 0x429   : > { %1961 = vst.msk [vmem:[#allocation3 + $0x68] sm:$0xff] %vm286_vm3, %v1928_v55  ;;  %2906 = vperm.xlu1 %4257, %v6006_v61   ;;  %v6022_v43 = vpop.eup %4428  ;;  %v6800_v55 = vld [vmem:[#allocation60_spill] sm:$0xff] }
 0x42a   : > { %v6025_v50 = vpop.eup %4430  ;;  %v1796_v16 = vmul.f32 %v6800_v55, %v1764_v40  ;;  %v1397_v17 = vmul.f32 1.442695, %v1336_v62  ;;  %v2509_v55 = vpop.f32.mrf.mxu3 }
 0x42b   : > { %6798 = vst [vmem:[#allocation48_spill] sm:$0xff] %v6025_v50 }
 0x42d   : > { %3311 = vperm.xlu0 %4256, %v4423_v63  }
 0x42e   : > { %v6039_v49 = vpop.eup %4432 }
 0x42f   : > { %2886 = vperm.xlu2 %4255, %v6014_v47   ;;  %6804 = vst [vmem:[#allocation36_spill] sm:$0xff] %v6039_v49 }
 0x431   : > { %2921 = vperm.xlu1 %4257, %v6017_v15  }
 0x437   : > { %2901 = vperm.xlu2 %4255, %v6022_v43  }
 0x438   : > { %v1546_v19 = vpop.permute.xlu1 %1545 }
 0x439   : > { %v1619_v7 = vsub.f32 %v6801_v24, %v1546_v19  ;;  %v1620_v48 = vsub.f32 %v6802_v60, %v1546_v19  ;;  %v1848_v12 = vpop.xlane.xlu2 %1847  ;;  %v2867_v63 = vpop.permute.xlu0 %2866  ;;  %2936 = vperm.xlu1 %4257, %v6025_v50   ;;  %v6805_v24 = vld [vmem:[#allocation50_spill] sm:$0xff] }
 0x43a   : > { %v1924_v37 = vadd.f32 %v1848_v12, %v1796_v16  ;;  %v6035_v23 = vmul.f32 0.0, %v2867_v63  ;;  %v2420_v19 = vpop.f32.mrf.mxu2 }
 0x43b   : > { %v1739_v4 = vmul.f32 1.442695, %v1619_v7  ;;  %v1741_v45 = vmul.f32 1.442695, %v1620_v48  ;;  %v2510_v16 = vadd.f32 %v2509_v55, %v2420_v19  ;;  %v6806_v7 = vld [vmem:[#allocation61_spill] sm:$0xff]  ;;  %v2006_v19 = vpack.c.bf16 %v5877_v57, %v5873_v42 }
 0x43c   : > { %6803 = vst [vmem:[#allocation39_spill] sm:$0xff] %v6035_v23  ;;  %v3040_v40 = vadd.f32 %v6035_v23, %v2503_v13  ;;  %v4097_v23 = vld [vmem:[%s5150_s10 + $0xf4] sm:$0xf] }
 0x43d   : > { %1957 = vst.msk [vmem:[#allocation3 + $0x48] sm:$0xff] %vm286_vm3, %v1924_v37  ;;  %4434 = vpow2.f32 %v1739_v4 }
 0x43e   : > { %4436 = vpow2.f32 %v1741_v45  ;;  %3104 = vst [vmem:[%s5488_s19 + $0x100] sm:$0xff] %v3040_v40 }
 0x43f   : > { %2916 = vperm.xlu2 %4255, %v6039_v49   ;;  %4438 = vpow2.f32 %v1397_v17 }
 0x441   : > { %v1541_v31 = vpop.permute.xlu2 %1540  ;;  %v2882_v10 = vpop.permute.xlu0 %2881 }
 0x442   : > { %v1617_v62 = vsub.f32 %v6805_v24, %v1541_v31  ;;  %v1618_v60 = vsub.f32 %v6806_v7, %v1541_v31  ;;  %v6045_v48 = vmul.f32 0.0, %v2882_v10  ;;  %v2128_v24 = vunpack.c.l.b16 %v2006_v19 }
 0x443   : > { %v4435_v12 = vpop.eup %4434 }
 0x444   : > { %6807 = vst [vmem:[#allocation38_spill] sm:$0xff] %v6045_v48  ;;  %v4437_v63 = vpop.eup %4436  ;;  %v1735_v13 = vmul.f32 1.442695, %v1617_v62  ;;  %v1737_v37 = vmul.f32 1.442695, %v1618_v60  ;;  %v3046_v4 = vadd.f32 %v6045_v48, %v2510_v16  ;;  %v2129_v16 = vunpack.c.h.b16 %v2006_v19 }
 0x445   : > { %v6048_v45 = vadd.f32 %v4437_v63, %v4435_v12  ;;  %v6050_v40 = vpop.eup %4438  ;;  %v3959_v48 = vld [vmem:[%s5150_s10 + $0x78] sm:$0xf0] }
 0x446   : > { %6808 = vst [vmem:[#allocation37_spill] sm:$0xff] %v6050_v40  ;;  %4440 = vpow2.f32 %v1735_v13  ;;  %v2008_v13 = vpack.c.bf16 %v4437_v63, %v4435_v12  ;;  %v6810_v12 = vld [vmem:[#allocation81_spill] sm:$0xff]  ;;  %v4023_v63 = vld [vmem:[%s5150_s10 + $0xf8] sm:$0xf0] }
 0x447   : > { %3110 = vst [vmem:[%s5488_s19 + $0x130] sm:$0xff] %v3046_v4  ;;  %4442 = vpow2.f32 %v1737_v37  ;;  %2931 = vperm.xlu2 %4255, %v6050_v40   ;;  %v2009_v37 = vpack.c.bf16 %v5950_v2, %v5948_v18 }
 0x448   : > { %v2132_v19 = vunpack.c.l.b16 %v2008_v13 }
 0x449   : > { %v2897_v40 = vpop.permute.xlu0 %2896 }
 0x44c   : > { %v4441_v17 = vpop.eup %4440 }
 0x44d   : > { %v4443_v55 = vpop.eup %4442 }
 0x44e   : > { %v2007_v31 = vpack.c.bf16 %v4443_v55, %v4441_v17  ;;  %v6056_v10 = vadd.f32 %v4443_v55, %v4441_v17  ;;  %v2133_v55 = vunpack.c.h.b16 %v2008_v13 }
 0x450   : > { %v2130_v62 = vunpack.c.l.b16 %v2007_v31  ;;  %v2131_v7 = vunpack.c.h.b16 %v2007_v31  ;;  %v1769_v31 = vld [vmem:[#allocation3 + $0x70] sm:$0xff] }
 0x451   : > { %v1801_v18 = vmul.f32 %v6810_v12, %v1769_v31 }
 0x452   : > { %v6058_v60 = vpack.c.b16 %v2130_v62, %v2128_v24  ;;  %v6060_v50 = vpack.c.b16 %v2131_v7, %v2129_v16  ;;  %v2134_v24 = vunpack.c.l.b16 %v2009_v37  ;;  %v2135_v62 = vunpack.c.h.b16 %v2009_v37  ;;  %v3176_v16 = vld [vmem:[#allocation3 + $0x28] sm:$0xff]  ;;  %v4081_v7 = vld [vmem:[%s5150_s10 + $0x74] sm:$0xf] }
 0x453   : > { %v3962_v2 = vor.u32 %v4081_v7, %v3959_v48  ;;  %v4026_v37 = vor.u32 %v4097_v23, %v4023_v63  ;;  %4444 = vrcp.f32 %v3176_v16  ;;  %v6087_v48 = vmul.f32 0.0, %v2897_v40  ;;  %v4095_v7 = vld [vmem:[%s5150_s10 + $0xe4] sm:$0xf]  ;;  %v4015_v16 = vld [vmem:[%s5150_s10 + $0xe8] sm:$0xf0] }
 0x454   : > { %2437 = vmatmul.bf16.gmra.mxu2 %v6058_v60  ;;  %2526 = vmatmul.bf16.gmra.mxu3 %v6060_v50  ;;  %v6078_v15 = vpack.c.b16 %v2134_v24, %v2132_v19  ;;  %v4079_v24 = vld [vmem:[%s5150_s10 + $0x64] sm:$0xf]  ;;  %v4018_v40 = vor.u32 %v4095_v7, %v4015_v16  ;;  %v3943_v63 = vld [vmem:[%s5150_s10 + $0x58] sm:$0xf0]  ;;  %v6105_v7 = vpop.permute.xlu0 %2911 }
 0x455   : > { %v6064_v42 = vpop.f32.mrf.mxu2  ;;  %v6066_v57 = vpop.f32.mrf.mxu3  ;;  %2542 = vmatpush.bf16.msrb.mxu2 %v3962_v2  ;;  %2631 = vmatpush.bf16.msrb.mxu3 %v4026_v37  ;;  %6811 = vst [vmem:[#allocation30_spill] sm:$0xff] %v6087_v48  ;;  %v4077_v2 = vld [vmem:[%s5150_s10 + $0x54] sm:$0xf] }
 0x456   : > { %v3946_v37 = vor.u32 %v4077_v2, %v3943_v63  ;;  %v3991_v63 = vld [vmem:[%s5150_s10 + $0xb8] sm:$0xf0] }
 0x457   : > { %1877 = vadd.xlane.f32.xlu0 %v5812_v54  ;;  %v6080_v54 = vpack.c.b16 %v2135_v62, %v2133_v55  ;;  %v3951_v62 = vld [vmem:[%s5150_s10 + $0x68] sm:$0xf0] }
 0x458   : > { %v3954_v12 = vor.u32 %v4079_v24, %v3951_v62  ;;  %v3999_v62 = vld [vmem:[%s5150_s10 + $0xc8] sm:$0xf0] }
 0x459   : > { %6809 = vst [vmem:[#allocation27_spill] sm:$0xff] %v6080_v54  ;;  %2632 = vmatpush.bf16.msrb.mxu3 %v4018_v40  ;;  %v3927_v40 = vld [vmem:[%s5150_s10 + $0x38] sm:$0xf0] }
 0x45a   : > { %2543 = vmatpush.bf16.msrb.mxu2 %v3954_v12  ;;  %v3172_v12 = vld [vmem:[#allocation3 + $0x8] sm:$0xff] }
 0x45b   : > { %4446 = vrcp.f32 %v3172_v12 }
 0x45c   : > { %4448 = vrcp.f32 %v3171_v20  ;;  %v2500_v20 = vadd.f32 %v5933_v30, %v5930_v21 }
 0x45d   : > { %v6071_v4 = vpop.f32.mrf.mxu2  ;;  %v6073_v17 = vpop.f32.mrf.mxu3 }
 0x45e   : > { %2544 = vmatpush.bf16.msrb.mxu2 %v3946_v37 }
 0x463   : > { %1871 = vadd.xlane.f32.xlu1 %v5765_v29  ;;  %v1863_v13 = vpop.xlane.xlu1 %1862 }
 0x464   : > { %2442 = vmatmul.bf16.gmra.mxu2 %v6078_v15  ;;  %2531 = vmatmul.bf16.gmra.mxu3 %v6080_v54  ;;  %v1929_v19 = vadd.f32 %v1863_v13, %v1801_v18  ;;  %v4445_v18 = vpop.eup %4444  ;;  %v4093_v13 = vld [vmem:[%s5150_s10 + $0xd4] sm:$0xf] }
 0x465   : > { %v2428_v55 = vpop.f32.mrf.mxu2  ;;  %v2517_v31 = vpop.f32.mrf.mxu3 }
 0x466   : > { %1962 = vst.msk [vmem:[#allocation3 + $0x70] sm:$0xff] %vm286_vm3, %v1929_v19  ;;  %v2518_v29 = vadd.f32 %v2517_v31, %v2428_v55  ;;  %v4007_v19 = vld [vmem:[%s5150_s10 + $0xd8] sm:$0xf0]  ;;  %v4075_v31 = vld [vmem:[%s5150_s10 + $0x44] sm:$0xf]  ;;  %v4447_v12 = vpop.eup %4446 }
 0x467   : > { %v4010_v55 = vor.u32 %v4093_v13, %v4007_v19  ;;  %v1767_v13 = vld [vmem:[#allocation3 + $0x60] sm:$0xff] }
 0x468   : > { %v3052_v23 = vadd.f32 %v6087_v48, %v2518_v29  ;;  %v3935_v29 = vld [vmem:[%s5150_s10 + $0x48] sm:$0xf0]  ;;  %v4071_v19 = vld [vmem:[%s5150_s10 + $0x24] sm:$0xf] }
 0x469   : > { %2633 = vmatpush.bf16.msrb.mxu3 %v4010_v55  ;;  %v3938_v24 = vor.u32 %v4075_v31, %v3935_v29  ;;  %v3919_v55 = vld [vmem:[%s5150_s10 + $0x28] sm:$0xf0]  ;;  %v4087_v31 = vld [vmem:[%s5150_s10 + $0xa4] sm:$0xf] }
 0x46a   : > { %3116 = vst [vmem:[%s5488_s19 + $0x160] sm:$0xff] %v3052_v23  ;;  %v4091_v23 = vld [vmem:[%s5150_s10 + $0xc4] sm:$0xf] }
 0x46b   : > { %3326 = vperm.xlu0 %4256, %v4445_v18   ;;  %v4002_v16 = vor.u32 %v4091_v23, %v3999_v62  ;;  %2545 = vmatpush.bf16.msrb.mxu2 %v3938_v24  ;;  %v4073_v18 = vld [vmem:[%s5150_s10 + $0x34] sm:$0xf]  ;;  %v6812_v29 = vld [vmem:[#allocation72_spill] sm:$0xff]  ;;  %v3922_v23 = vor.u32 %v4071_v19, %v3919_v55  ;;  %v3983_v24 = vld [vmem:[%s5150_s10 + $0xa8] sm:$0xf0] }
 0x46c   : > { %v3930_v2 = vor.u32 %v4073_v18, %v3927_v40  ;;  %v1799_v48 = vmul.f32 %v6812_v29, %v1767_v13  ;;  %v4069_v13 = vld [vmem:[%s5150_s10 + $0x14] sm:$0xf]  ;;  %v3911_v19 = vld [vmem:[%s5150_s10 + $0x18] sm:$0xf0] }
 0x46d   : > { %2634 = vmatpush.bf16.msrb.mxu3 %v4002_v16  ;;  %v3986_v16 = vor.u32 %v4087_v31, %v3983_v24  ;;  %v4085_v55 = vld [vmem:[%s5150_s10 + $0x94] sm:$0xf]  ;;  %v3975_v31 = vld [vmem:[%s5150_s10 + $0x98] sm:$0xf0] }
 0x46e   : > { %v3978_v24 = vor.u32 %v4085_v55, %v3975_v31  ;;  %v4449_v31 = vpop.eup %4448 }
 0x46f   : > { %2546 = vmatpush.bf16.msrb.mxu2 %v3930_v2  ;;  %v6813_v2 = vld [vmem:[#allocation62_spill] sm:$0xff] }
 0x470   : > { %1865 = vadd.xlane.f32.xlu2 %v5754_v58  ;;  %v4089_v58 = vld [vmem:[%s5150_s10 + $0xb4] sm:$0xf] }
 0x471   : > { %v3994_v37 = vor.u32 %v4089_v58, %v3991_v63  ;;  %v6116_v58 = vpop.permute.xlu0 %2926 }
 0x473   : > { %2635 = vmatpush.bf16.msrb.mxu3 %v3994_v37  ;;  %2547 = vmatpush.bf16.msrb.mxu2 %v3922_v23  ;;  %v6814_v37 = vld [vmem:[#allocation80_spill] sm:$0xff] }
 0x477   : > { %2636 = vmatpush.bf16.msrb.mxu3 %v3986_v16  ;;  %v3903_v16 = vld [vmem:[%s5150_s10 + $0x8] sm:$0xf0] }
 0x47a   : > { %v1857_v62 = vpop.xlane.xlu2 %1856 }
 0x47b   : > { %v1927_v18 = vadd.f32 %v1857_v62, %v1799_v48  ;;  %v1561_v40 = vpop.permute.xlu1 %1560  ;;  %v3914_v48 = vor.u32 %v4069_v13, %v3911_v19  ;;  %v1771_v62 = vld [vmem:[#allocation3 + $0x80] sm:$0xff]  ;;  %2637 = vmatpush.bf16.msrb.mxu3 %v3978_v24  ;;  %v6816_v13 = vld [vmem:[#allocation71_spill] sm:$0xff] }
 0x47c   : > { %v1625_v63 = vsub.f32 %v6813_v2, %v1561_v40  ;;  %v1626_v61 = vsub.f32 %v6814_v37, %v1561_v40  ;;  %3306 = vperm.xlu1 %4257, %v4447_v12   ;;  %v4067_v12 = vld [vmem:[%s5150_s10 + $0x4] sm:$0xf]  ;;  %v3967_v37 = vld [vmem:[%s5150_s10 + $0x88] sm:$0xf0] }
 0x47d   : > { %1960 = vst.msk [vmem:[#allocation3 + $0x60] sm:$0xff] %vm286_vm3, %v1927_v18  ;;  %2548 = vmatpush.bf16.msrb.mxu2 %v3914_v48  ;;  %v4083_v40 = vld [vmem:[%s5150_s10 + $0x84] sm:$0xf]  ;;  %v3906_v2 = vor.u32 %v4067_v12, %v3903_v16  ;;  %v6815_v18 = vld [vmem:[#allocation59_spill] sm:$0xff] }
 0x47e   : > { %v1751_v29 = vmul.f32 1.442695, %v1625_v63  ;;  %v1753_v23 = vmul.f32 1.442695, %v1626_v61  ;;  %v3970_v56 = vor.u32 %v4083_v40, %v3967_v37  ;;  %v1803_v61 = vmul.f32 %v5868_v5, %v1771_v62 }
 0x480   : > { %4450 = vpow2.f32 %v1751_v29  ;;  %2638 = vmatpush.bf16.msrb.mxu3 %v3970_v56  ;;  %v2505_v56 = vadd.f32 %v5962_v0, %v5960_v28 }
 0x481   : > { %4452 = vpow2.f32 %v1753_v23  ;;  %2549 = vmatpush.bf16.msrb.mxu2 %v3906_v2 }
 0x482   : > { %v1556_v49 = vpop.permute.xlu2 %1555 }
 0x483   : > { %v1623_v54 = vsub.f32 %v6815_v18, %v1556_v49  ;;  %v1624_v19 = vsub.f32 %v6816_v13, %v1556_v49  ;;  %v2862_v63 = vpop.permute.xlu1 %2861  ;;  %v6148_v13 = vpop.f32.mrf.mxu2 }
 0x484   : > { %v6134_v55 = vmul.f32 0.0, %v2862_v63  ;;  %v1869_v48 = vpop.xlane.xlu0 %1868 }
 0x485   : > { %v1747_v29 = vmul.f32 1.442695, %v1623_v54  ;;  %v1749_v23 = vmul.f32 1.442695, %v1624_v19  ;;  %v1931_v24 = vadd.f32 %v1869_v48, %v1803_v61  ;;  %v6150_v19 = vpop.f32.mrf.mxu3 }
 0x486   : > { %v4451_v12 = vpop.eup %4450  ;;  %v3038_v16 = vadd.f32 %v6134_v55, %v2500_v20 }
 0x487   : > { %v4453_v49 = vpop.eup %4452  ;;  %4454 = vpow2.f32 %v1747_v29  ;;  %1964 = vst.msk [vmem:[#allocation3 + $0x80] sm:$0xff] %vm286_vm3, %v1931_v24 }
 0x488   : > { %4456 = vpow2.f32 %v1749_v23  ;;  %3102 = vst [vmem:[%s5488_s19 + $0xf0] sm:$0xff] %v3038_v16  ;;  %3301 = vperm.xlu2 %4255, %v4449_v31   ;;  %v6139_v5 = vadd.f32 %v4453_v49, %v4451_v12  ;;  %v2011_v37 = vpack.c.bf16 %v4453_v49, %v4451_v12  ;;  %v2513_v23 = vadd.f32 %v6066_v57, %v6064_v42 }
 0x489   : > { %v2515_v49 = vadd.f32 %v6073_v17, %v6071_v4 }
 0x48a   : > { %v2872_v21 = vpop.permute.xlu2 %2871  ;;  %v2138_v20 = vunpack.c.l.b16 %v2011_v37  ;;  %v2139_v31 = vunpack.c.h.b16 %v2011_v37 }
 0x48b   : > { %v6143_v30 = vmul.f32 0.0, %v2872_v21  ;;  %v2877_v54 = vpop.permute.xlu1 %2876 }
 0x48c   : > { %v6145_v62 = vmul.f32 0.0, %v2877_v54 }
 0x48d   : > { %v4455_v40 = vpop.eup %4454  ;;  %v3042_v2 = vadd.f32 %v6143_v30, %v2505_v56 }
 0x48e   : > { %v4457_v18 = vpop.eup %4456  ;;  %v3044_v63 = vadd.f32 %v6145_v62, %v5978_v9 }
 0x48f   : > { %3106 = vst [vmem:[%s5488_s19 + $0x110] sm:$0xff] %v3042_v2  ;;  %v2010_v61 = vpack.c.bf16 %v4457_v18, %v4455_v40  ;;  %v6155_v28 = vadd.f32 %v4457_v18, %v4455_v40 }
 0x490   : > { %3108 = vst [vmem:[%s5488_s19 + $0x120] sm:$0xff] %v3044_v63 }
 0x491   : > { %v2136_v0 = vunpack.c.l.b16 %v2010_v61  ;;  %v2137_v48 = vunpack.c.h.b16 %v2010_v61  ;;  %v6183_v61 = vmul.f32 0.0, %v6105_v7 }
 0x492   : > { %v2887_v29 = vpop.permute.xlu2 %2886 }
 0x493   : > { %v6160_v24 = vmul.f32 0.0, %v2887_v29  ;;  %v2892_v12 = vpop.permute.xlu1 %2891  ;;  %v6162_v16 = vpack.c.b16 %v2138_v20, %v2136_v0  ;;  %v6164_v9 = vpack.c.b16 %v2139_v31, %v2137_v48  ;;  %v3239_v20 = vld [vmem:[%s5488_s19 + $0x20] sm:$0xff] }
 0x494   : > { %v6168_v21 = vmul.f32 0.0, %v2892_v12  ;;  %v3179_v31 = vld [vmem:[#allocation3 + $0x40] sm:$0xff]  ;;  %v6818_v12 = vld [vmem:[#allocation35_spill] sm:$0xff] }
 0x495   : > { %v3048_v56 = vadd.f32 %v6160_v24, %v2513_v23  ;;  %2447 = vmatmul.bf16.gmra.mxu2 %v6162_v16  ;;  %2536 = vmatmul.bf16.gmra.mxu3 %v6164_v9  ;;  %4458 = vrcp.f32 %v3179_v31  ;;  %v6817_v23 = vld [vmem:[#allocation34_spill] sm:$0xff] }
 0x496   : > { %v3050_v42 = vadd.f32 %v6168_v21, %v2515_v49  ;;  %1886 = vadd.xlane.f32.xlu0 %v5864_v46  ;;  %v2433_v57 = vpop.f32.mrf.mxu2  ;;  %v2522_v54 = vpop.f32.mrf.mxu3  ;;  %v6819_v49 = vld [vmem:[#allocation29_spill] sm:$0xff] }
 0x497   : > { %3112 = vst [vmem:[%s5488_s19 + $0x140] sm:$0xff] %v3048_v56  ;;  %v6176_v40 = vpop.permute.xlu0 %2941  ;;  %v2523_v17 = vadd.f32 %v2522_v54, %v2433_v57  ;;  %v6820_v56 = vld [vmem:[#allocation46_spill] sm:$0xff]  ;;  %v3175_v57 = vld [vmem:[#allocation3 + $0x20] sm:$0xff] }
 0x498   : > { %3114 = vst [vmem:[%s5488_s19 + $0x150] sm:$0xff] %v3050_v42  ;;  %v6821_v42 = vld [vmem:[#allocation47_spill] sm:$0xff]  ;;  %4460 = vrcp.f32 %v3175_v57 }
 0x49b   : > { %v2907_v4 = vpop.permute.xlu1 %2906  ;;  %v4459_v7 = vpop.eup %4458 }
 0x49c   : > { %v6179_v2 = vmul.f32 0.0, %v2907_v4  ;;  %v3174_v4 = vld [vmem:[#allocation3 + $0x18] sm:$0xff] }
 0x49d   : > { %4462 = vrcp.f32 %v3174_v4 }
 0x49e   : > { %v3056_v37 = vadd.f32 %v6179_v2, %v2523_v17  ;;  %v2435_v18 = vpop.f32.mrf.mxu2  ;;  %v2524_v63 = vpop.f32.mrf.mxu3 }
 0x49f   : > { %v2525_v46 = vadd.f32 %v2524_v63, %v2435_v18  ;;  %v6185_v0 = vpop.permute.xlu0 %3311  ;;  %v4461_v54 = vpop.eup %4460  ;;  %v6823_v18 = vld [vmem:[#allocation57_spill] sm:$0xff]  ;;  %v1774_v63 = vld [vmem:[#allocation3 + $0x98] sm:$0xff] }
 0x4a0   : > { %3120 = vst [vmem:[%s5488_s19 + $0x180] sm:$0xff] %v3056_v37  ;;  %v3463_v48 = vmul.f32 %v6185_v0, %v3239_v20  ;;  %v6822_v37 = vld [vmem:[#allocation56_spill] sm:$0xff] }
 0x4a1   : > { %v3058_v29 = vadd.f32 %v6183_v61, %v2525_v46  ;;  %v6201_v46 = vpop.permute.xlu2 %2901 }
 0x4a2   : > { %3527 = vst [vmem:[%s5488_s19 + $0x20] sm:$0xff] %v3463_v48 }
 0x4a3   : > { %3122 = vst [vmem:[%s5488_s19 + $0x190] sm:$0xff] %v3058_v29  ;;  %v2922_v17 = vpop.permute.xlu1 %2921  ;;  %v4463_v20 = vpop.eup %4462 }
 0x4a5   : > { %2550 = vmatmul.bf16.vlgmr.msrb.gmra.mxu2 %v6817_v23  ;;  %2639 = vmatmul.bf16.vlgmr.msrb.gmra.mxu3 %v6818_v12  ;;  %v1772_v12 = vld [vmem:[#allocation3 + $0x88] sm:$0xff] }
 0x4a6   : > { %1880 = vadd.xlane.f32.xlu1 %v6819_v49  ;;  %v6824_v49 = vld [vmem:[#allocation63_spill] sm:$0xff] }
 0x4a9   : > { %v2917_v23 = vpop.permute.xlu2 %2916 }
 0x4aa   : > { %3341 = vperm.xlu0 %4256, %v4459_v7   ;;  %v6825_v7 = vld [vmem:[#allocation64_spill] sm:$0xff]  ;;  %v6211_v4 = vmul.f32 0.0, %v2917_v23 }
 0x4ab   : > { %v6205_v29 = vpop.permute.xlu1 %2936 }
 0x4b1   : > { %1874 = vadd.xlane.f32.xlu2 %v5833_v44  ;;  %v1806_v44 = vmul.f32 %v5890_v25, %v1774_v63  ;;  %v2932_v63 = vpop.permute.xlu2 %2931 }
 0x4b5   : > { %2555 = vmatmul.bf16.gmra.mxu2 %v6820_v56  ;;  %2644 = vmatmul.bf16.gmra.mxu3 %v6821_v42  ;;  %v1804_v56 = vmul.f32 %v6003_v33, %v1772_v12  ;;  %v1770_v12 = vld [vmem:[#allocation3 + $0x78] sm:$0xff] }
 0x4bf   : > { %3321 = vperm.xlu1 %4257, %v4461_v54  }
 0x4c5   : > { %2560 = vmatmul.bf16.gmra.mxu2 %v6822_v37  ;;  %2649 = vmatmul.bf16.gmra.mxu3 %v6823_v18 }
 0x4c9   : > { %3316 = vperm.xlu2 %4255, %v4463_v20   ;;  %v3245_v20 = vld [vmem:[%s5488_s19 + $0x50] sm:$0xff] }
 0x4ca   : > { %v1878_v48 = vpop.xlane.xlu0 %1877 }
 0x4cb   : > { %v1934_v31 = vadd.f32 %v1878_v48, %v1806_v44  ;;  %v3182_v44 = vld [vmem:[#allocation3 + $0x58] sm:$0xff] }
 0x4cc   : > { %4464 = vrcp.f32 %v3182_v44 }
 0x4cd   : > { %1967 = vst.msk [vmem:[#allocation3 + $0x98] sm:$0xff] %vm286_vm3, %v1934_v31 }
 0x4d4   : > { %1895 = vadd.xlane.f32.xlu0 %v5946_v52 }
 0x4d5   : > { %2565 = vmatmul.bf16.gmra.mxu2 %v6824_v49  ;;  %2654 = vmatmul.bf16.gmra.mxu3 %v6825_v7  ;;  %v6220_v49 = vmul.f32 0.0, %v2922_v17  ;;  %v4465_v17 = vpop.eup %4464 }
 0x4d6   : > { %v1872_v42 = vpop.xlane.xlu1 %1871 }
 0x4d7   : > { %v2438_v25 = vpop.f32.mrf.mxu2  ;;  %v2527_v57 = vpop.f32.mrf.mxu3  ;;  %v1932_v54 = vadd.f32 %v1872_v42, %v1804_v56  ;;  %v1802_v56 = vmul.f32 %v5966_v35, %v1770_v12 }
 0x4d8   : > { %v2528_v37 = vadd.f32 %v2527_v57, %v2438_v25  ;;  %v6826_v57 = vld [vmem:[#allocation74_spill] sm:$0xff] }
 0x4d9   : > { %1965 = vst.msk [vmem:[#allocation3 + $0x88] sm:$0xff] %vm286_vm3, %v1932_v54  ;;  %v6827_v54 = vld [vmem:[#allocation75_spill] sm:$0xff] }
 0x4da   : > { %v3060_v18 = vadd.f32 %v6211_v4, %v2528_v37 }
 0x4dc   : > { %3124 = vst [vmem:[%s5488_s19 + $0x1a0] sm:$0xff] %v3060_v18 }
 0x4dd   : > { %v6216_v52 = vpop.permute.xlu0 %3326 }
 0x4de   : > { %v3469_v33 = vmul.f32 %v6216_v52, %v3245_v20  ;;  %v6230_v20 = vmul.f32 0.0, %v6116_v58 }
 0x4df   : > { %v2440_v48 = vpop.f32.mrf.mxu2  ;;  %v2529_v31 = vpop.f32.mrf.mxu3 }
 0x4e0   : > { %3533 = vst [vmem:[%s5488_s19 + $0x50] sm:$0xff] %v3469_v33  ;;  %v2530_v23 = vadd.f32 %v2529_v31, %v2440_v48  ;;  %v3235_v48 = vld [vmem:[%s5488_s19] sm:$0xff] }
 0x4e2   : > { %v3062_v7 = vadd.f32 %v6220_v49, %v2530_v23  ;;  %v3237_v23 = vld [vmem:[%s5488_s19 + $0x10] sm:$0xff] }
 0x4e3   : > { %v1866_v42 = vpop.xlane.xlu2 %1865 }
 0x4e4   : > { %3126 = vst [vmem:[%s5488_s19 + $0x1b0] sm:$0xff] %v3062_v7  ;;  %v1930_v25 = vadd.f32 %v1866_v42, %v1802_v56  ;;  %v6245_v42 = vmul.f32 0.0, %v2932_v63  ;;  %v6831_v63 = vld [vmem:[#allocation8_spill] sm:$0xff] }
 0x4e5   : > { %2570 = vmatmul.bf16.gmra.mxu2 %v6826_v57  ;;  %2659 = vmatmul.bf16.gmra.mxu3 %v6827_v54  ;;  %v6828_v57 = vld [vmem:[#allocation76_spill] sm:$0xff]  ;;  %v6829_v54 = vld [vmem:[#allocation77_spill] sm:$0xff] }
 0x4e6   : > { %1963 = vst.msk [vmem:[#allocation3 + $0x78] sm:$0xff] %vm286_vm3, %v1930_v25 }
 0x4e7   : > { %v2443_v37 = vpop.f32.mrf.mxu2  ;;  %v2532_v18 = vpop.f32.mrf.mxu3 }
 0x4e8   : > { %v2533_v35 = vadd.f32 %v2532_v18, %v2443_v37  ;;  %3356 = vperm.xlu0 %4256, %v4465_v17   ;;  %v3178_v17 = vld [vmem:[#allocation3 + $0x38] sm:$0xff]  ;;  %v3177_v37 = vld [vmem:[#allocation3 + $0x30] sm:$0xff] }
 0x4e9   : > { %1889 = vadd.xlane.f32.xlu1 %v5839_v39  ;;  %4466 = vrcp.f32 %v3178_v17 }
 0x4ea   : > { %v6234_v33 = vadd.f32 %v6230_v20, %v2533_v35  ;;  %4468 = vrcp.f32 %v3177_v37  ;;  %v6830_v35 = vld [vmem:[#allocation12_spill] sm:$0xff] }
 0x4eb   : > { %v6236_v44 = vpop.permute.xlu2 %3301 }
 0x4ec   : > { %v3459_v31 = vmul.f32 %v6236_v44, %v3235_v48  ;;  %v1777_v48 = vld [vmem:[#allocation3 + $0xb0] sm:$0xff] }
 0x4ee   : > { %3523 = vst [vmem:[%s5488_s19] sm:$0xff] %v3459_v31  ;;  %v6241_v12 = vpop.permute.xlu1 %3306  ;;  %v1809_v31 = vmul.f32 %v5903_v59, %v1777_v48  ;;  %v3185_v48 = vld [vmem:[#allocation3 + $0x70] sm:$0xff] }
 0x4ef   : > { %v2445_v58 = vpop.f32.mrf.mxu2  ;;  %v2534_v7 = vpop.f32.mrf.mxu3  ;;  %v3461_v56 = vmul.f32 %v6241_v12, %v3237_v23  ;;  %4470 = vrcp.f32 %v3185_v48  ;;  %v3241_v48 = vld [vmem:[%s5488_s19 + $0x30] sm:$0xff] }
 0x4f0   : > { %v2535_v39 = vadd.f32 %v2534_v7, %v2445_v58  ;;  %v4467_v18 = vpop.eup %4466  ;;  %v6832_v7 = vld [vmem:[#allocation14_spill] sm:$0xff] }
 0x4f1   : > { %3525 = vst [vmem:[%s5488_s19 + $0x10] sm:$0xff] %v3461_v56  ;;  %v4469_v23 = vpop.eup %4468  ;;  %v6833_v56 = vld [vmem:[#allocation18_spill] sm:$0xff] }
 0x4f2   : > { %v3066_v25 = vadd.f32 %v6245_v42, %v2535_v39  ;;  %1883 = vadd.xlane.f32.xlu2 %v5885_v32  ;;  %v1775_v39 = vld [vmem:[#allocation3 + $0xa0] sm:$0xff] }
 0x4f3   : > { %v1807_v59 = vmul.f32 %v6014_v47, %v1775_v39 }
 0x4f4   : > { %3130 = vst [vmem:[%s5488_s19 + $0x1d0] sm:$0xff] %v3066_v25 }
 0x4f5   : > { %2575 = vmatmul.bf16.gmra.mxu2 %v6828_v57  ;;  %2664 = vmatmul.bf16.gmra.mxu3 %v6829_v54  ;;  %v6262_v54 = vmul.f32 0.0, %v6205_v29  ;;  %v1773_v29 = vld [vmem:[#allocation3 + $0x90] sm:$0xff] }
 0x502   : > { %3336 = vperm.xlu1 %4257, %v4467_v18  }
 0x505   : > { %2580 = vmatmul.bf16.gmra.mxu2 %v6830_v35  ;;  %2669 = vmatmul.bf16.gmra.mxu3 %v6831_v63  ;;  %v3251_v63 = vld [vmem:[%s5488_s19 + $0x80] sm:$0xff] }
 0x509   : > { %v1887_v32 = vpop.xlane.xlu0 %1886 }
 0x50a   : > { %v1937_v58 = vadd.f32 %v1887_v32, %v1809_v31  ;;  %3331 = vperm.xlu2 %4255, %v4469_v23   ;;  %v6273_v32 = vmul.f32 0.0, %v6176_v40 }
 0x50c   : > { %1970 = vst.msk [vmem:[#allocation3 + $0xb0] sm:$0xff] %vm286_vm3, %v1937_v58 }
 0x512   : > { %1904 = vadd.xlane.f32.xlu0 %v6048_v45 }
 0x515   : > { %2585 = vmatmul.bf16.gmra.mxu2 %v6832_v7  ;;  %2674 = vmatmul.bf16.gmra.mxu3 %v6833_v56  ;;  %v1805_v56 = vmul.f32 %v5982_v41, %v1773_v29 }
 0x518   : > { %v2448_v25 = vpop.f32.mrf.mxu2  ;;  %v2537_v57 = vpop.f32.mrf.mxu3 }
 0x519   : > { %v2538_v17 = vadd.f32 %v2537_v57, %v2448_v25  ;;  %v1881_v37 = vpop.xlane.xlu1 %1880  ;;  %v4471_v25 = vpop.eup %4470 }
 0x51a   : > { %v1935_v18 = vadd.f32 %v1881_v37, %v1807_v59  ;;  %v6834_v59 = vld [vmem:[#allocation33_spill] sm:$0xff] }
 0x51b   : > { %v3068_v35 = vadd.f32 %v6262_v54, %v2538_v17  ;;  %v6835_v17 = vld [vmem:[#allocation25_spill] sm:$0xff] }
 0x51c   : > { %1968 = vst.msk [vmem:[#allocation3 + $0xa0] sm:$0xff] %vm286_vm3, %v1935_v18  ;;  %v6266_v45 = vpop.permute.xlu0 %3341 }
 0x51d   : > { %3132 = vst [vmem:[%s5488_s19 + $0x1e0] sm:$0xff] %v3068_v35  ;;  %v3475_v31 = vmul.f32 %v6266_v45, %v3251_v63  ;;  %v6836_v35 = vld [vmem:[#allocation65_spill] sm:$0xff] }
 0x51f   : > { %3539 = vst [vmem:[%s5488_s19 + $0x80] sm:$0xff] %v3475_v31 }
 0x520   : > { %v2450_v47 = vpop.f32.mrf.mxu2  ;;  %v2539_v23 = vpop.f32.mrf.mxu3 }
 0x521   : > { %v2540_v58 = vadd.f32 %v2539_v23, %v2450_v47 }
 0x523   : > { %v6276_v7 = vadd.f32 %v6273_v32, %v2540_v58 }
 0x524   : > { %v1875_v39 = vpop.xlane.xlu2 %1874 }
 0x525   : > { %v1933_v57 = vadd.f32 %v1875_v39, %v1805_v56  ;;  %2590 = vmatmul.bf16.gmra.mxu2 %v6834_v59  ;;  %2679 = vmatmul.bf16.gmra.mxu3 %v6835_v17  ;;  %v3243_v39 = vld [vmem:[%s5488_s19 + $0x40] sm:$0xff] }
 0x526   : > { %3371 = vperm.xlu0 %4256, %v4471_v25  }
 0x527   : > { %1966 = vst.msk [vmem:[#allocation3 + $0x90] sm:$0xff] %vm286_vm3, %v1933_v57  ;;  %v6837_v57 = vld [vmem:[#allocation66_spill] sm:$0xff] }
 0x528   : > { %v2551_v40 = vpop.f32.mrf.mxu2  ;;  %v2640_v37 = vpop.f32.mrf.mxu3 }
 0x529   : > { %v2641_v18 = vadd.f32 %v2640_v37, %v2551_v40  ;;  %v6838_v37 = vld [vmem:[#allocation70_spill] sm:$0xff] }
 0x52b   : > { %v3009_v63 = vadd.f32 %v6836_v35, %v2641_v18  ;;  %v3181_v35 = vld [vmem:[#allocation3 + $0x50] sm:$0xff] }
 0x52c   : > { %v3317_v41 = vpop.permute.xlu2 %3316  ;;  %1898 = vadd.xlane.f32.xlu1 %v5883_v34  ;;  %4472 = vrcp.f32 %v3181_v35 }
 0x52d   : > { %v3460_v31 = vmul.f32 %v6236_v44, %v3009_v63  ;;  %v3465_v47 = vmul.f32 %v3317_v41, %v3241_v48 }
 0x52f   : > { %3524 = vst [vmem:[%s5488_s19 + $0x8] sm:$0xff] %v3460_v31 }
 0x530   : > { %3529 = vst [vmem:[%s5488_s19 + $0x30] sm:$0xff] %v3465_v47  ;;  %v2553_v23 = vpop.f32.mrf.mxu2  ;;  %v2642_v29 = vpop.f32.mrf.mxu3  ;;  %v6839_v47 = vld [vmem:[#allocation73_spill] sm:$0xff] }
 0x531   : > { %v2643_v58 = vadd.f32 %v2642_v29, %v2553_v23  ;;  %v3322_v56 = vpop.permute.xlu1 %3321  ;;  %v1780_v23 = vld [vmem:[#allocation3 + $0xc8] sm:$0xff] }
 0x532   : > { %v3467_v25 = vmul.f32 %v3322_v56, %v3243_v39 }
 0x533   : > { %v3011_v59 = vadd.f32 %v6837_v57, %v2643_v58  ;;  %1892 = vadd.xlane.f32.xlu2 %v5964_v1 }
 0x534   : > { %3531 = vst [vmem:[%s5488_s19 + $0x40] sm:$0xff] %v3467_v25 }
 0x535   : > { %v3462_v34 = vmul.f32 %v6241_v12, %v3011_v59  ;;  %2595 = vmatmul.bf16.gmra.mxu2 %v5841_v36  ;;  %2684 = vmatmul.bf16.gmra.mxu3 %v5843_v14  ;;  %v3180_v12 = vld [vmem:[#allocation3 + $0x48] sm:$0xff]  ;;  %v4473_v14 = vpop.eup %4472 }
 0x536   : > { %4474 = vrcp.f32 %v3180_v12 }
 0x537   : > { %3526 = vst [vmem:[%s5488_s19 + $0x18] sm:$0xff] %v3462_v34 }
 0x538   : > { %v2556_v44 = vpop.f32.mrf.mxu2  ;;  %v2645_v17 = vpop.f32.mrf.mxu3 }
 0x539   : > { %v2646_v40 = vadd.f32 %v2645_v17, %v2556_v44  ;;  %v6840_v44 = vld [vmem:[#allocation78_spill] sm:$0xff] }
 0x53b   : > { %v3013_v18 = vadd.f32 %v6838_v37, %v2646_v40  ;;  %v6841_v40 = vld [vmem:[#allocation79_spill] sm:$0xff] }
 0x53c   : > { %v4475_v34 = vpop.eup %4474 }
 0x53d   : > { %v3464_v63 = vmul.f32 %v6185_v0, %v3013_v18  ;;  %v1812_v0 = vmul.f32 %v5911_v26, %v1780_v23  ;;  %v3191_v23 = vld [vmem:[#allocation3 + $0xa0] sm:$0xff] }
 0x53f   : > { %3528 = vst [vmem:[%s5488_s19 + $0x28] sm:$0xff] %v3464_v63 }
 0x540   : > { %v2558_v1 = vpop.f32.mrf.mxu2  ;;  %v2647_v48 = vpop.f32.mrf.mxu3 }
 0x541   : > { %v2648_v31 = vadd.f32 %v2647_v48, %v2558_v1  ;;  %v1778_v1 = vld [vmem:[#allocation3 + $0xb8] sm:$0xff]  ;;  %v3257_v48 = vld [vmem:[%s5488_s19 + $0xb0] sm:$0xff] }
 0x542   : > { %v1810_v12 = vmul.f32 %v6022_v43, %v1778_v1 }
 0x543   : > { %v3015_v36 = vadd.f32 %v6839_v47, %v2648_v31  ;;  %v3188_v31 = vld [vmem:[#allocation3 + $0x88] sm:$0xff] }
 0x544   : > { %4476 = vrcp.f32 %v3188_v31 }
 0x545   : > { %v3466_v29 = vmul.f32 %v3317_v41, %v3015_v36  ;;  %2600 = vmatmul.bf16.gmra.mxu2 %v5896_v38  ;;  %2689 = vmatmul.bf16.gmra.mxu3 %v5898_v22  ;;  %4478 = vrcp.f32 %v3191_v23  ;;  %v6845_v23 = vld [vmem:[#allocation19_spill] sm:$0xff] }
 0x546   : > { %3351 = vperm.xlu1 %4257, %v4473_v14  }
 0x547   : > { %3530 = vst [vmem:[%s5488_s19 + $0x38] sm:$0xff] %v3466_v29  ;;  %v1896_v58 = vpop.xlane.xlu0 %1895 }
 0x548   : > { %v1940_v39 = vadd.f32 %v1896_v58, %v1812_v0  ;;  %v2561_v25 = vpop.f32.mrf.mxu2  ;;  %v2650_v57 = vpop.f32.mrf.mxu3 }
 0x549   : > { %v2651_v59 = vadd.f32 %v2650_v57, %v2561_v25 }
 0x54a   : > { %1973 = vst.msk [vmem:[#allocation3 + $0xc8] sm:$0xff] %vm286_vm3, %v1940_v39  ;;  %v4477_v14 = vpop.eup %4476 }
 0x54b   : > { %v3017_v41 = vadd.f32 %v6840_v44, %v2651_v59  ;;  %3346 = vperm.xlu2 %4255, %v4475_v34   ;;  %v4479_v34 = vpop.eup %4478  ;;  %v6842_v44 = vld [vmem:[#allocation16_spill] sm:$0xff] }
 0x54d   : > { %v3468_v38 = vmul.f32 %v3322_v56, %v3017_v41 }
 0x54f   : > { %3532 = vst [vmem:[%s5488_s19 + $0x48] sm:$0xff] %v3468_v38 }
 0x550   : > { %v2563_v22 = vpop.f32.mrf.mxu2  ;;  %v2652_v17 = vpop.f32.mrf.mxu3  ;;  %1913 = vadd.xlane.f32.xlu0 %v6139_v5 }
 0x551   : > { %v2653_v26 = vadd.f32 %v2652_v17, %v2563_v22  ;;  %v3247_v22 = vld [vmem:[%s5488_s19 + $0x60] sm:$0xff] }
 0x553   : > { %v3019_v37 = vadd.f32 %v6841_v40, %v2653_v26 }
 0x555   : > { %v3470_v18 = vmul.f32 %v6216_v52, %v3019_v37  ;;  %2605 = vmatmul.bf16.gmra.mxu2 %v5916_v11  ;;  %2694 = vmatmul.bf16.gmra.mxu3 %v5918_v53  ;;  %v1776_v52 = vld [vmem:[#allocation3 + $0xa8] sm:$0xff] }
 0x556   : > { %v1808_v29 = vmul.f32 %v5991_v27, %v1776_v52  ;;  %v3183_v52 = vld [vmem:[#allocation3 + $0x60] sm:$0xff] }
 0x557   : > { %3534 = vst [vmem:[%s5488_s19 + $0x58] sm:$0xff] %v3470_v18 }
 0x558   : > { %v2566_v35 = vpop.f32.mrf.mxu2  ;;  %v2655_v63 = vpop.f32.mrf.mxu3 }
 0x559   : > { %v2656_v58 = vadd.f32 %v2655_v63, %v2566_v35 }
 0x55a   : > { %v6313_v56 = vpop.permute.xlu0 %3356 }
 0x55b   : > { %v3481_v5 = vmul.f32 %v6313_v56, %v3257_v48  ;;  %v3249_v48 = vld [vmem:[%s5488_s19 + $0x70] sm:$0xff] }
 0x55c   : > { %v1890_v47 = vpop.xlane.xlu1 %1889 }
 0x55d   : > { %3545 = vst [vmem:[%s5488_s19 + $0xb0] sm:$0xff] %v3481_v5  ;;  %v1938_v36 = vadd.f32 %v1890_v47, %v1810_v12  ;;  %v3184_v47 = vld [vmem:[#allocation3 + $0x68] sm:$0xff] }
 0x55f   : > { %1971 = vst.msk [vmem:[#allocation3 + $0xb8] sm:$0xff] %vm286_vm3, %v1938_v36 }
 0x560   : > { %v2568_v11 = vpop.f32.mrf.mxu2  ;;  %v2657_v53 = vpop.f32.mrf.mxu3 }
 0x561   : > { %v2658_v40 = vadd.f32 %v2657_v53, %v2568_v11 }
 0x564   : > { %3386 = vperm.xlu0 %4256, %v4477_v14  }
 0x565   : > { %2610 = vmatmul.bf16.gmra.mxu2 %v5970_v6  ;;  %2699 = vmatmul.bf16.gmra.mxu3 %v5972_v3  ;;  %v1884_v43 = vpop.xlane.xlu2 %1883  ;;  %v6843_v6 = vld [vmem:[#allocation82_spill] sm:$0xff] }
 0x566   : > { %v1936_v0 = vadd.f32 %v1884_v43, %v1808_v29  ;;  %v3194_v59 = vld [vmem:[#allocation3 + $0xb8] sm:$0xff]  ;;  %v3021_v41 = vadd.f32 %v6843_v6, %v2656_v58  ;;  %v3187_v58 = vld [vmem:[#allocation3 + $0x80] sm:$0xff]  ;;  %v3193_v6 = vld [vmem:[#allocation3 + $0xb0] sm:$0xff] }
 0x567   : > { %4480 = vrcp.f32 %v3194_v59  ;;  %v6846_v43 = vld [vmem:[#allocation27_spill] sm:$0xff] }
 0x568   : > { %1969 = vst.msk [vmem:[#allocation3 + $0xa8] sm:$0xff] %vm286_vm3, %v1936_v0  ;;  %v2571_v39 = vpop.f32.mrf.mxu2  ;;  %v2660_v25 = vpop.f32.mrf.mxu3  ;;  %4482 = vrcp.f32 %v3184_v47 }
 0x569   : > { %v2661_v57 = vadd.f32 %v2660_v25, %v2571_v39  ;;  %4484 = vrcp.f32 %v3183_v52  ;;  %v6849_v52 = vld [vmem:[#allocation21_spill] sm:$0xff] }
 0x56a   : > { %4486 = vrcp.f32 %v3187_v58 }
 0x56b   : > { %v3025_v27 = vadd.f32 %v6842_v44, %v2661_v57 }
 0x56c   : > { %3401 = vperm.xlu0 %4256, %v4479_v34  }
 0x56d   : > { %v3476_v3 = vmul.f32 %v6266_v45, %v3025_v27  ;;  %v3332_v38 = vpop.permute.xlu2 %3331  ;;  %v4481_v35 = vpop.eup %4480  ;;  %v6844_v45 = vld [vmem:[#allocation11_spill] sm:$0xff] }
 0x56e   : > { %v3471_v17 = vmul.f32 %v3332_v38, %v3247_v22  ;;  %v3472_v26 = vmul.f32 %v3332_v38, %v3021_v41  ;;  %v3023_v63 = vadd.f32 %v6844_v45, %v2658_v40  ;;  %v4483_v39 = vpop.eup %4482  ;;  %v3263_v38 = vld [vmem:[%s5488_s19 + $0xe0] sm:$0xff]  ;;  %v6847_v45 = vld [vmem:[#allocation22_spill] sm:$0xff] }
 0x56f   : > { %3540 = vst [vmem:[%s5488_s19 + $0x88] sm:$0xff] %v3476_v3 }
 0x570   : > { %3535 = vst [vmem:[%s5488_s19 + $0x60] sm:$0xff] %v3471_v17  ;;  %1907 = vadd.xlane.f32.xlu1 %v5955_v51  ;;  %v6331_v37 = vpop.f32.mrf.mxu2  ;;  %v6333_v18 = vpop.f32.mrf.mxu3 }
 0x571   : > { %3536 = vst [vmem:[%s5488_s19 + $0x68] sm:$0xff] %v3472_v26 }
 0x574   : > { %3416 = vperm.xlu0 %4256, %v4481_v35   ;;  %1901 = vadd.xlane.f32.xlu2 %v6056_v10  ;;  %v3337_v1 = vpop.permute.xlu1 %3336  ;;  %v1783_v10 = vld [vmem:[#allocation3 + $0xe0] sm:$0xff]  ;;  %v1781_v35 = vld [vmem:[#allocation3 + $0xd0] sm:$0xff] }
 0x575   : > { %2615 = vmatmul.bf16.gmra.mxu2 %v6058_v60  ;;  %2704 = vmatmul.bf16.gmra.mxu3 %v6060_v50  ;;  %v3473_v31 = vmul.f32 %v3337_v1, %v3249_v48  ;;  %v3474_v5 = vmul.f32 %v3337_v1, %v3023_v63  ;;  %v1815_v50 = vmul.f32 %v5922_v8, %v1783_v10  ;;  %v4485_v8 = vpop.eup %4484  ;;  %v6848_v48 = vld [vmem:[#allocation36_spill] sm:$0xff] }
 0x576   : > { %v1779_v10 = vld [vmem:[#allocation3 + $0xc0] sm:$0xff] }
 0x577   : > { %3537 = vst [vmem:[%s5488_s19 + $0x70] sm:$0xff] %v3473_v31 }
 0x578   : > { %3538 = vst [vmem:[%s5488_s19 + $0x78] sm:$0xff] %v3474_v5  ;;  %v6343_v51 = vpop.f32.mrf.mxu2  ;;  %v6345_v12 = vpop.f32.mrf.mxu3 }
 0x580   : > { %v2578_v36 = vpop.f32.mrf.mxu2  ;;  %v2667_v11 = vpop.f32.mrf.mxu3 }
 0x581   : > { %v2668_v53 = vadd.f32 %v2667_v11, %v2578_v36 }
 0x583   : > { %v3031_v60 = vadd.f32 %v6845_v23, %v2668_v53  ;;  %v1811_v23 = vmul.f32 %v6849_v52, %v1779_v10  ;;  %v3189_v10 = vld [vmem:[#allocation3 + $0x90] sm:$0xff] }
 0x585   : > { %v3482_v14 = vmul.f32 %v6313_v56, %v3031_v60  ;;  %v1905_v29 = vpop.xlane.xlu0 %1904  ;;  %2620 = vmatmul.bf16.gmra.mxu2 %v6078_v15  ;;  %2709 = vmatmul.bf16.gmra.mxu3 %v6846_v43  ;;  %v3190_v56 = vld [vmem:[#allocation3 + $0x98] sm:$0xff]  ;;  %v4487_v15 = vpop.eup %4486 }
 0x586   : > { %v1943_v0 = vadd.f32 %v1905_v29, %v1815_v50  ;;  %4488 = vrcp.f32 %v3190_v56 }
 0x587   : > { %3546 = vst [vmem:[%s5488_s19 + $0xb8] sm:$0xff] %v3482_v14  ;;  %4490 = vrcp.f32 %v3193_v6 }
 0x588   : > { %1976 = vst.msk [vmem:[#allocation3 + $0xe0] sm:$0xff] %vm286_vm3, %v1943_v0  ;;  %v2581_v25 = vpop.f32.mrf.mxu2  ;;  %v2670_v57 = vpop.f32.mrf.mxu3  ;;  %v2663_v0 = vadd.f32 %v6333_v18, %v6331_v37 }
 0x589   : > { %v6354_v59 = vadd.f32 %v2670_v57, %v2581_v25  ;;  %3366 = vperm.xlu1 %4257, %v4483_v39   ;;  %v6850_v57 = vld [vmem:[#allocation17_spill] sm:$0xff] }
 0x58c   : > { %3361 = vperm.xlu2 %4255, %v4485_v8   ;;  %v4489_v41 = vpop.eup %4488  ;;  %v3027_v8 = vadd.f32 %v6850_v57, %v2663_v0  ;;  %v3192_v0 = vld [vmem:[#allocation3 + $0xa8] sm:$0xff] }
 0x58d   : > { %v4491_v5 = vpop.eup %4490 }
 0x58f   : > { %v3199_v50 = vld [vmem:[#allocation3 + $0xe0] sm:$0xff] }
 0x590   : > { %v2583_v34 = vpop.f32.mrf.mxu2  ;;  %v2672_v44 = vpop.f32.mrf.mxu3 }
 0x591   : > { %v6356_v27 = vadd.f32 %v2672_v44, %v2583_v34  ;;  %3381 = vperm.xlu1 %4257, %v4487_v15   ;;  %v3253_v15 = vld [vmem:[%s5488_s19 + $0x90] sm:$0xff] }
 0x595   : > { %2625 = vmatmul.bf16.gmra.mxu2 %v6162_v16  ;;  %2714 = vmatmul.bf16.gmra.mxu3 %v6164_v9  ;;  %v1813_v16 = vmul.f32 %v6848_v48, %v1781_v35  ;;  %v3196_v9 = vld [vmem:[#allocation3 + $0xc8] sm:$0xff]  ;;  %v1786_v48 = vld [vmem:[#allocation3 + $0xf8] sm:$0xff] }
 0x596   : > { %4492 = vrcp.f32 %v3196_v9 }
 0x597   : > { %4494 = vrcp.f32 %v3199_v50 }
 0x598   : > { %v3372_v3 = vpop.permute.xlu0 %3371  ;;  %v2586_v22 = vpop.f32.mrf.mxu2 }
 0x599   : > { %v3487_v17 = vmul.f32 %v3372_v3, %v3263_v38  ;;  %v2675_v26 = vpop.f32.mrf.mxu3  ;;  %3396 = vperm.xlu1 %4257, %v4489_v41   ;;  %v6851_v38 = vld [vmem:[#allocation13_spill] sm:$0xff] }
 0x59a   : > { %v2676_v40 = vadd.f32 %v2675_v26, %v2586_v22 }
 0x59b   : > { %3551 = vst [vmem:[%s5488_s19 + $0xe0] sm:$0xff] %v3487_v17 }
 0x59c   : > { %v3037_v63 = vadd.f32 %v6847_v45, %v2676_v40  ;;  %v4493_v29 = vpop.eup %4492  ;;  %v3255_v40 = vld [vmem:[%s5488_s19 + $0xa0] sm:$0xff] }
 0x59d   : > { %v4495_v34 = vpop.eup %4494 }
 0x59e   : > { %v3488_v1 = vmul.f32 %v3372_v3, %v3037_v63  ;;  %v2666_v3 = vadd.f32 %v6345_v12, %v6343_v51  ;;  %v6852_v51 = vld [vmem:[#allocation24_spill] sm:$0xff] }
 0x59f   : > { %v1899_v31 = vpop.xlane.xlu1 %1898  ;;  %v1818_v12 = vmul.f32 %v6852_v51, %v1786_v48 }
 0x5a0   : > { %3552 = vst [vmem:[%s5488_s19 + $0xe8] sm:$0xff] %v3488_v1  ;;  %v2588_v47 = vpop.f32.mrf.mxu2  ;;  %v1941_v36 = vadd.f32 %v1899_v31, %v1813_v16  ;;  %v3029_v22 = vadd.f32 %v6851_v38, %v2666_v3  ;;  %v3275_v3 = vld [vmem:[%s5488_s19 + $0x140] sm:$0xff] }
 0x5a1   : > { %v2677_v11 = vpop.f32.mrf.mxu3  ;;  %3411 = vperm.xlu1 %4257, %v4491_v5   ;;  %v3186_v5 = vld [vmem:[#allocation3 + $0x78] sm:$0xff] }
 0x5a2   : > { %v6365_v53 = vadd.f32 %v2677_v11, %v2588_v47  ;;  %1974 = vst.msk [vmem:[#allocation3 + $0xd0] sm:$0xff] %vm286_vm3, %v1941_v36 }
 0x5a6   : > { %v1893_v60 = vpop.xlane.xlu2 %1892 }
 0x5a7   : > { %v1939_v14 = vadd.f32 %v1893_v60, %v1811_v23 }
 0x5a8   : > { %v2591_v43 = vpop.f32.mrf.mxu2 }
 0x5a9   : > { %1972 = vst.msk [vmem:[#allocation3 + $0xc0] sm:$0xff] %vm286_vm3, %v1939_v14  ;;  %v2680_v58 = vpop.f32.mrf.mxu3  ;;  %3426 = vperm.xlu1 %4257, %v4493_v29   ;;  %v3197_v39 = vld [vmem:[#allocation3 + $0xd0] sm:$0xff] }
 0x5aa   : > { %v6372_v25 = vadd.f32 %v2680_v58, %v2591_v43  ;;  %4496 = vrcp.f32 %v3197_v39 }
 0x5ab   : > { %4498 = vrcp.f32 %v3186_v5 }
 0x5ac   : > { %4500 = vrcp.f32 %v3189_v10 }
 0x5ae   : > { %v3347_v56 = vpop.permute.xlu2 %3346 }
 0x5af   : > { %v3477_v44 = vmul.f32 %v3347_v56, %v3253_v15  ;;  %v3478_v6 = vmul.f32 %v3347_v56, %v3027_v8  ;;  %v3269_v8 = vld [vmem:[%s5488_s19 + $0x110] sm:$0xff] }
 0x5b0   : > { %v4497_v37 = vpop.eup %4496  ;;  %v2593_v18 = vpop.f32.mrf.mxu2 }
 0x5b1   : > { %3541 = vst [vmem:[%s5488_s19 + $0x90] sm:$0xff] %v3477_v44  ;;  %v2682_v41 = vpop.f32.mrf.mxu3  ;;  %3441 = vperm.xlu1 %4257, %v4495_v34   ;;  %3431 = vperm.xlu0 %4256, %v4497_v37   ;;  %v4499_v52 = vpop.eup %4498  ;;  %v3195_v37 = vld [vmem:[#allocation3 + $0xc0] sm:$0xff] }
 0x5b2   : > { %3542 = vst [vmem:[%s5488_s19 + $0x98] sm:$0xff] %v3478_v6  ;;  %v2683_v50 = vadd.f32 %v2682_v41, %v2593_v18  ;;  %v4501_v43 = vpop.eup %4500 }
 0x5b4   : > { %v3043_v39 = vadd.f32 %v6143_v30, %v2683_v50 }
 0x5b5   : > { %1910 = vadd.xlane.f32.xlu2 %v6155_v28 }
 0x5b8   : > { %v2596_v17 = vpop.f32.mrf.mxu2  ;;  %v3352_v26 = vpop.permute.xlu1 %3351 }
 0x5b9   : > { %v2685_v35 = vpop.f32.mrf.mxu3  ;;  %v3479_v45 = vmul.f32 %v3352_v26, %v3255_v40  ;;  %v3480_v63 = vmul.f32 %v3352_v26, %v3029_v22  ;;  %v2990_v40 = vmul.f32 0.0, %v6201_v46 }
 0x5ba   : > { %v6383_v1 = vadd.f32 %v2685_v35, %v2596_v17  ;;  %v1784_v17 = vld [vmem:[#allocation3 + $0xe8] sm:$0xff] }
 0x5bb   : > { %3543 = vst [vmem:[%s5488_s19 + $0xa0] sm:$0xff] %v3479_v45 }
 0x5bc   : > { %3544 = vst [vmem:[%s5488_s19 + $0xa8] sm:$0xff] %v3480_v63  ;;  %v6853_v63 = vld [vmem:[#allocation37_spill] sm:$0xff] }
 0x5bd   : > { %v1816_v48 = vmul.f32 %v6853_v63, %v1784_v17 }
 0x5c0   : > { %v2598_v16 = vpop.f32.mrf.mxu2 }
 0x5c1   : > { %v2687_v31 = vpop.f32.mrf.mxu3 }
 0x5c2   : > { %v6387_v9 = vadd.f32 %v2687_v31, %v2598_v16  ;;  %v2520_v16 = vadd.f32 %v6150_v19, %v6148_v13  ;;  %v1782_v31 = vld [vmem:[#allocation3 + $0xd8] sm:$0xff] }
 0x5c3   : > { %v1914_v28 = vpop.xlane.xlu0 %1913 }
 0x5c4   : > { %v1946_v47 = vadd.f32 %v1914_v28, %v1818_v12  ;;  %v3054_v28 = vadd.f32 %v2990_v40, %v2520_v16 }
 0x5c6   : > { %1979 = vst.msk [vmem:[#allocation3 + $0xf8] sm:$0xff] %vm286_vm3, %v1946_v47  ;;  %v6854_v47 = vld [vmem:[#allocation20_spill] sm:$0xff] }
 0x5c8   : > { %v2601_v36 = vpop.f32.mrf.mxu2 }
 0x5c9   : > { %v2690_v11 = vpop.f32.mrf.mxu3 }
 0x5ca   : > { %v2691_v44 = vadd.f32 %v2690_v11, %v2601_v36  ;;  %v1814_v36 = vmul.f32 %v6854_v47, %v1782_v31 }
 0x5cc   : > { %v3049_v30 = vadd.f32 %v6160_v24, %v2691_v44 }
 0x5cd   : > { %3376 = vperm.xlu2 %4255, %v4499_v52   ;;  %v3202_v23 = vld [vmem:[#allocation3 + $0xf8] sm:$0xff] }
 0x5ce   : > { %4502 = vrcp.f32 %v3202_v23 }
 0x5cf   : > { %4504 = vrcp.f32 %v3192_v0 }
 0x5d0   : > { %v2603_v60 = vpop.f32.mrf.mxu2  ;;  %4506 = vrcp.f32 %v3195_v37 }
 0x5d1   : > { %v2692_v14 = vpop.f32.mrf.mxu3 }
 0x5d2   : > { %v6391_v29 = vadd.f32 %v2692_v14, %v2603_v60  ;;  %v6855_v14 = vld [vmem:[#allocation26_spill] sm:$0xff] }
 0x5d4   : > { %v4503_v58 = vpop.eup %4502 }
 0x5d5   : > { %3456 = vperm.xlu1 %4257, %v4503_v58   ;;  %3391 = vperm.xlu2 %4255, %v4501_v43   ;;  %v4505_v18 = vpop.eup %4504  ;;  %v3033_v43 = vadd.f32 %v6855_v14, %v6354_v59  ;;  %v3259_v58 = vld [vmem:[%s5488_s19 + $0xc0] sm:$0xff] }
 0x5d6   : > { %v3387_v57 = vpop.permute.xlu0 %3386  ;;  %v4507_v51 = vpop.eup %4506 }
 0x5d7   : > { %v3493_v56 = vmul.f32 %v3387_v57, %v3269_v8  ;;  %v3494_v15 = vmul.f32 %v3387_v57, %v3043_v39 }
 0x5d8   : > { %v6395_v34 = vpop.f32.mrf.mxu2 }
 0x5d9   : > { %3557 = vst [vmem:[%s5488_s19 + $0x110] sm:$0xff] %v3493_v56  ;;  %v6398_v6 = vpop.f32.mrf.mxu3 }
 0x5da   : > { %3558 = vst [vmem:[%s5488_s19 + $0x118] sm:$0xff] %v3494_v15 }
 0x5dd   : > { %3406 = vperm.xlu2 %4255, %v4505_v18  }
 0x5de   : > { %v3402_v41 = vpop.permute.xlu0 %3401 }
 0x5df   : > { %v3499_v38 = vmul.f32 %v3402_v41, %v3275_v3  ;;  %v3500_v22 = vmul.f32 %v3402_v41, %v3049_v30  ;;  %v6856_v30 = vld [vmem:[#allocation23_spill] sm:$0xff] }
 0x5e0   : > { %v2608_v26 = vpop.f32.mrf.mxu2  ;;  %v3035_v41 = vadd.f32 %v6856_v30, %v6356_v27  ;;  %v3267_v27 = vld [vmem:[%s5488_s19 + $0x100] sm:$0xff] }
 0x5e1   : > { %3563 = vst [vmem:[%s5488_s19 + $0x140] sm:$0xff] %v3499_v38  ;;  %v2697_v35 = vpop.f32.mrf.mxu3  ;;  %v3261_v38 = vld [vmem:[%s5488_s19 + $0xd0] sm:$0xff]  ;;  %v3287_v30 = vld [vmem:[%s5488_s19 + $0x1a0] sm:$0xff] }
 0x5e2   : > { %3564 = vst [vmem:[%s5488_s19 + $0x148] sm:$0xff] %v3500_v22  ;;  %v2698_v45 = vadd.f32 %v2697_v35, %v2608_v26  ;;  %v6857_v35 = vld [vmem:[#allocation39_spill] sm:$0xff] }
 0x5e3   : > { %v1908_v24 = vpop.xlane.xlu1 %1907 }
 0x5e4   : > { %v1944_v12 = vadd.f32 %v1908_v24, %v1816_v48  ;;  %v3055_v5 = vadd.f32 %v2990_v40, %v2698_v45  ;;  %v3041_v45 = vadd.f32 %v6857_v35, %v6372_v25  ;;  %v2696_v25 = vadd.f32 %v6398_v6, %v6395_v34 }
 0x5e5   : > { %3421 = vperm.xlu2 %4255, %v4507_v51   ;;  %v6858_v51 = vld [vmem:[#allocation38_spill] sm:$0xff] }
 0x5e6   : > { %1977 = vst.msk [vmem:[#allocation3 + $0xe8] sm:$0xff] %vm286_vm3, %v1944_v12  ;;  %v3417_v46 = vpop.permute.xlu0 %3416  ;;  %v3047_v12 = vadd.f32 %v6858_v51, %v6387_v9  ;;  %v3279_v9 = vld [vmem:[%s5488_s19 + $0x160] sm:$0xff] }
 0x5e7   : > { %v3505_v11 = vmul.f32 %v3417_v46, %v3054_v28  ;;  %v3506_v10 = vmul.f32 %v3417_v46, %v3055_v5  ;;  %v1902_v52 = vpop.xlane.xlu2 %1901  ;;  %v3273_v5 = vld [vmem:[%s5488_s19 + $0x130] sm:$0xff] }
 0x5e8   : > { %v1942_v23 = vadd.f32 %v1902_v52, %v1814_v36  ;;  %v2611_v13 = vpop.f32.mrf.mxu2 }
 0x5e9   : > { %3569 = vst [vmem:[%s5488_s19 + $0x170] sm:$0xff] %v3505_v11  ;;  %v2700_v19 = vpop.f32.mrf.mxu3 }
 0x5ea   : > { %3570 = vst [vmem:[%s5488_s19 + $0x178] sm:$0xff] %v3506_v10  ;;  %v6413_v60 = vadd.f32 %v2700_v19, %v2611_v13  ;;  %v6859_v10 = vld [vmem:[#allocation30_spill] sm:$0xff] }
 0x5eb   : > { %1975 = vst.msk [vmem:[#allocation3 + $0xd8] sm:$0xff] %vm286_vm3, %v1942_v23  ;;  %v3053_v52 = vadd.f32 %v6859_v10, %v2696_v25 }
 0x5ed   : > { %v3200_v50 = vld [vmem:[#allocation3 + $0xe8] sm:$0xff] }
 0x5ee   : > { %4508 = vrcp.f32 %v3200_v50 }
 0x5ef   : > { %v3362_v0 = vpop.permute.xlu2 %3361 }
 0x5f0   : > { %v3483_v39 = vmul.f32 %v3362_v0, %v3259_v58  ;;  %v3484_v57 = vmul.f32 %v3362_v0, %v3033_v43  ;;  %v2613_v8 = vpop.f32.mrf.mxu2  ;;  %v3285_v58 = vld [vmem:[%s5488_s19 + $0x190] sm:$0xff] }
 0x5f1   : > { %v2702_v56 = vpop.f32.mrf.mxu3 }
 0x5f2   : > { %3547 = vst [vmem:[%s5488_s19 + $0xc0] sm:$0xff] %v3483_v39  ;;  %v3198_v15 = vld [vmem:[#allocation3 + $0xd8] sm:$0xff]  ;;  %v2703_v50 = vadd.f32 %v2702_v56, %v2613_v8 }
 0x5f3   : > { %3548 = vst [vmem:[%s5488_s19 + $0xc8] sm:$0xff] %v3484_v57  ;;  %4510 = vrcp.f32 %v3198_v15 }
 0x5f4   : > { %v4509_v44 = vpop.eup %4508  ;;  %v3059_v6 = vadd.f32 %v6183_v61, %v2703_v50 }
 0x5f5   : > { %3446 = vperm.xlu0 %4256, %v4509_v44  }
 0x5f8   : > { %v2616_v37 = vpop.f32.mrf.mxu2 }
 0x5f9   : > { %v4511_v18 = vpop.eup %4510  ;;  %v2705_v59 = vpop.f32.mrf.mxu3 }
 0x5fa   : > { %3436 = vperm.xlu2 %4255, %v4511_v18   ;;  %v2706_v44 = vadd.f32 %v2705_v59, %v2616_v37  ;;  %v6860_v37 = vld [vmem:[#allocation48_spill] sm:$0xff] }
 0x5fb   : > { %v3367_v3 = vpop.permute.xlu1 %3366 }
 0x5fc   : > { %v3485_v22 = vmul.f32 %v3367_v3, %v3261_v38  ;;  %v3486_v17 = vmul.f32 %v3367_v3, %v3035_v41  ;;  %v3061_v56 = vadd.f32 %v6211_v4, %v2706_v44 }
 0x5fe   : > { %3549 = vst [vmem:[%s5488_s19 + $0xd0] sm:$0xff] %v3485_v22  ;;  %v1785_v22 = vld [vmem:[#allocation3 + $0xf0] sm:$0xff] }
 0x5ff   : > { %3550 = vst [vmem:[%s5488_s19 + $0xd8] sm:$0xff] %v3486_v17  ;;  %v1817_v59 = vmul.f32 %v6860_v37, %v1785_v22 }
 0x600   : > { %v6426_v26 = vpop.f32.mrf.mxu2 }
 0x601   : > { %v6428_v40 = vpop.f32.mrf.mxu3 }
 0x603   : > { %v3382_v63 = vpop.permute.xlu1 %3381 }
 0x604   : > { %v3491_v48 = vmul.f32 %v3382_v63, %v3267_v27  ;;  %v3492_v16 = vmul.f32 %v3382_v63, %v3041_v45  ;;  %v3265_v45 = vld [vmem:[%s5488_s19 + $0xf0] sm:$0xff] }
 0x606   : > { %3555 = vst [vmem:[%s5488_s19 + $0x100] sm:$0xff] %v3491_v48 }
 0x607   : > { %3556 = vst [vmem:[%s5488_s19 + $0x108] sm:$0xff] %v3492_v16  ;;  %v3045_v16 = vadd.f32 %v6145_v62, %v6383_v1 }
 0x608   : > { %v2621_v24 = vpop.f32.mrf.mxu2 }
 0x609   : > { %v2710_v31 = vpop.f32.mrf.mxu3 }
 0x60a   : > { %v2711_v15 = vadd.f32 %v2710_v31, %v2621_v24  ;;  %v3271_v31 = vld [vmem:[%s5488_s19 + $0x120] sm:$0xff] }
 0x60b   : > { %v3397_v28 = vpop.permute.xlu1 %3396 }
 0x60c   : > { %v3497_v46 = vmul.f32 %v3397_v28, %v3273_v5  ;;  %v3498_v47 = vmul.f32 %v3397_v28, %v3047_v12  ;;  %v3065_v8 = vadd.f32 %v6230_v20, %v2711_v15  ;;  %v3051_v12 = vadd.f32 %v6168_v21, %v6391_v29 }
 0x60d   : > { %v3057_v21 = vadd.f32 %v6179_v2, %v6413_v60  ;;  %v2708_v2 = vadd.f32 %v6428_v40, %v6426_v26  ;;  %v3289_v60 = vld [vmem:[%s5488_s19 + $0x1b0] sm:$0xff] }
 0x60e   : > { %3561 = vst [vmem:[%s5488_s19 + $0x130] sm:$0xff] %v3497_v46 }
 0x60f   : > { %3562 = vst [vmem:[%s5488_s19 + $0x138] sm:$0xff] %v3498_v47  ;;  %v3277_v47 = vld [vmem:[%s5488_s19 + $0x150] sm:$0xff] }
 0x610   : > { %v6442_v36 = vpop.f32.mrf.mxu2 }
 0x611   : > { %v6444_v11 = vpop.f32.mrf.mxu3 }
 0x613   : > { %v3412_v23 = vpop.permute.xlu1 %3411 }
 0x614   : > { %v3503_v13 = vmul.f32 %v3412_v23, %v3279_v9  ;;  %v3504_v19 = vmul.f32 %v3412_v23, %v3053_v52 }
 0x616   : > { %3567 = vst [vmem:[%s5488_s19 + $0x160] sm:$0xff] %v3503_v13  ;;  %v3283_v13 = vld [vmem:[%s5488_s19 + $0x180] sm:$0xff] }
 0x617   : > { %3568 = vst [vmem:[%s5488_s19 + $0x168] sm:$0xff] %v3504_v19 }
 0x618   : > { %v2626_v14 = vpop.f32.mrf.mxu2 }
 0x619   : > { %v2715_v34 = vpop.f32.mrf.mxu3 }
 0x61a   : > { %v6451_v43 = vadd.f32 %v2715_v34, %v2626_v14 }
 0x61b   : > { %v3427_v0 = vpop.permute.xlu1 %3426 }
 0x61c   : > { %v3509_v39 = vmul.f32 %v3427_v0, %v3285_v58  ;;  %v3510_v57 = vmul.f32 %v3427_v0, %v3059_v6  ;;  %v2713_v6 = vadd.f32 %v6444_v11, %v6442_v36  ;;  %v3295_v36 = vld [vmem:[%s5488_s19 + $0x1e0] sm:$0xff] }
 0x61e   : > { %3573 = vst [vmem:[%s5488_s19 + $0x190] sm:$0xff] %v3509_v39  ;;  %v3067_v0 = vadd.f32 %v6245_v42, %v2713_v6  ;;  %v3293_v39 = vld [vmem:[%s5488_s19 + $0x1d0] sm:$0xff] }
 0x61f   : > { %3574 = vst [vmem:[%s5488_s19 + $0x198] sm:$0xff] %v3510_v57 }
 0x620   : > { %v2628_v28 = vpop.f32.mrf.mxu2 }
 0x621   : > { %v2717_v5 = vpop.f32.mrf.mxu3 }
 0x622   : > { %v2718_v25 = vadd.f32 %v2717_v5, %v2628_v28 }
 0x623   : > { %v3442_v18 = vpop.permute.xlu1 %3441  ;;  %v3432_v61 = vpop.permute.xlu0 %3431 }
 0x624   : > { %v3515_v41 = vmul.f32 %v3442_v18, %v6234_v33  ;;  %v3516_v3 = vmul.f32 %v3442_v18, %v3065_v8  ;;  %v3511_v38 = vmul.f32 %v3432_v61, %v3287_v30  ;;  %v3512_v17 = vmul.f32 %v3432_v61, %v3061_v56 }
 0x625   : > { %v3039_v33 = vadd.f32 %v6134_v55, %v6365_v53  ;;  %v3071_v10 = vadd.f32 %v6273_v32, %v2718_v25  ;;  %v3063_v32 = vadd.f32 %v6220_v49, %v2708_v2  ;;  %v3069_v49 = vadd.f32 %v6262_v54, %v6451_v43 }
 0x626   : > { %3579 = vst [vmem:[%s5488_s19 + $0x1c0] sm:$0xff] %v3515_v41 }
 0x627   : > { %3580 = vst [vmem:[%s5488_s19 + $0x1c8] sm:$0xff] %v3516_v3 }
 0x628   : > { %3575 = vst [vmem:[%s5488_s19 + $0x1a0] sm:$0xff] %v3511_v38  ;;  %v1911_v20 = vpop.xlane.xlu2 %1910 }
 0x629   : > { %3576 = vst [vmem:[%s5488_s19 + $0x1a8] sm:$0xff] %v3512_v17  ;;  %v1945_v4 = vadd.f32 %v1911_v20, %v1817_v59 }
 0x62b   : > { %1978 = vst.msk [vmem:[#allocation3 + $0xf0] sm:$0xff] %vm286_vm3, %v1945_v4 }
 0x630   : > { %v3377_v35 = vpop.permute.xlu2 %3376 }
 0x631   : > { %v3489_v63 = vmul.f32 %v3377_v35, %v3265_v45  ;;  %v3490_v27 = vmul.f32 %v3377_v35, %v3039_v33 }
 0x632   : > { %v3201_v48 = vld [vmem:[#allocation3 + $0xf0] sm:$0xff] }
 0x633   : > { %3553 = vst [vmem:[%s5488_s19 + $0xf0] sm:$0xff] %v3489_v63  ;;  %4512 = vrcp.f32 %v3201_v48 }
 0x634   : > { %3554 = vst [vmem:[%s5488_s19 + $0xf8] sm:$0xff] %v3490_v27 }
 0x638   : > { %v3392_v24 = vpop.permute.xlu2 %3391 }
 0x639   : > { %v4513_v51 = vpop.eup %4512  ;;  %v3495_v55 = vmul.f32 %v3392_v24, %v3271_v31  ;;  %v3496_v53 = vmul.f32 %v3392_v24, %v3045_v16 }
 0x63a   : > { %3451 = vperm.xlu2 %4255, %v4513_v51  }
 0x63b   : > { %3559 = vst [vmem:[%s5488_s19 + $0x120] sm:$0xff] %v3495_v55 }
 0x63c   : > { %3560 = vst [vmem:[%s5488_s19 + $0x128] sm:$0xff] %v3496_v53 }
 0x640   : > { %v3407_v46 = vpop.permute.xlu2 %3406 }
 0x641   : > { %v3501_v62 = vmul.f32 %v3407_v46, %v3277_v47  ;;  %v3502_v1 = vmul.f32 %v3407_v46, %v3051_v12 }
 0x643   : > { %3565 = vst [vmem:[%s5488_s19 + $0x150] sm:$0xff] %v3501_v62 }
 0x644   : > { %3566 = vst [vmem:[%s5488_s19 + $0x158] sm:$0xff] %v3502_v1 }
 0x647   : > { %v3457_v29 = vpop.permute.xlu1 %3456 }
 0x648   : > { %v3521_v52 = vmul.f32 %v3457_v29, %v6276_v7  ;;  %v3522_v23 = vmul.f32 %v3457_v29, %v3071_v10  ;;  %v3422_v9 = vpop.permute.xlu2 %3421 }
 0x649   : > { %v3507_v19 = vmul.f32 %v3422_v9, %v3283_v13  ;;  %v3508_v50 = vmul.f32 %v3422_v9, %v3057_v21 }
 0x64a   : > { %3585 = vst [vmem:[%s5488_s19 + $0x1f0] sm:$0xff] %v3521_v52 }
 0x64b   : > { %3586 = vst [vmem:[%s5488_s19 + $0x1f8] sm:$0xff] %v3522_v23 }
 0x64c   : > { %3571 = vst [vmem:[%s5488_s19 + $0x180] sm:$0xff] %v3507_v19 }
 0x64d   : > { %3572 = vst [vmem:[%s5488_s19 + $0x188] sm:$0xff] %v3508_v50 }
 0x654   : > { %v3437_v7 = vpop.permute.xlu2 %3436 }
 0x655   : > { %v3513_v14 = vmul.f32 %v3437_v7, %v3289_v60  ;;  %v3514_v34 = vmul.f32 %v3437_v7, %v3063_v32 }
 0x657   : > { %3577 = vst [vmem:[%s5488_s19 + $0x1b0] sm:$0xff] %v3513_v14 }
 0x658   : > { %3578 = vst [vmem:[%s5488_s19 + $0x1b8] sm:$0xff] %v3514_v34 }
 0x667   : > { %v3447_v58 = vpop.permute.xlu0 %3446 }
 0x668   : > { %v3517_v26 = vmul.f32 %v3447_v58, %v3293_v39  ;;  %v3518_v40 = vmul.f32 %v3447_v58, %v3067_v0 }
 0x66a   : > { %3581 = vst [vmem:[%s5488_s19 + $0x1d0] sm:$0xff] %v3517_v26 }
 0x66b   : > { %3582 = vst [vmem:[%s5488_s19 + $0x1d8] sm:$0xff] %v3518_v40 }
 0x694   : > { %v3452_v42 = vpop.permute.xlu2 %3451 }
 0x695   : > { %v3519_v11 = vmul.f32 %v3452_v42, %v3295_v36  ;;  %v3520_v57 = vmul.f32 %v3452_v42, %v3069_v49 }
 0x697   : > { %3583 = vst [vmem:[%s5488_s19 + $0x1e0] sm:$0xff] %v3519_v11 }
 0x698   : > { %3584 = vst [vmem:[%s5488_s19 + $0x1e8] sm:$0xff] %v3520_v57 }
 0x699   : > { %4541 = shalt.err (!%p4538_p5)
}
 0x69a   : > { %s4597_s10 = smov 256   ;;  %s4598_s11 = smov 16  }
 0x69b   : > { %4195 = dma.vmem_to_hbm [thread:$0]  (%p4659_p4), %s3604_s28, 8192, %s3606_s29, %s3588_s15, %s4597_s10, %s4597_s10, %s4598_s11  }
 0x69c PF: > { %p4201_p6 = scmp.ge.s32.totalorder %s4592_s17, 2  ;;  %s3620_s18 = sand.u32 1, %s4572_s12  }
 0x69d   : > { %s3621_s19 = scalar_lea.sflag [#allocation6], %s3620_s18 }
 0x69e   : > { %p4198_p7 = pnand %p4201_p6, %p4666_p8 }
 0x6a0   : > { %p4199_p9 = pneg %p4198_p7 }
 0x6a2   : > { %4567 = dma.done.wait (%p4199_p9), %s3621_s19, 8192  }
 0x6a3   : > { %4569 = vsyncadd (%p4199_p9), %s3621_s19, 4294959104  ;;  %s16_s17 = sadd.s32 1, %s4592_s17   ;;  %s6861_s12 = smov %s4576_s13 }
 0x6a4   : > { %p13_p10 = scmp.ge.s32.totalorder %s16_s17, 4   ;;  %s6862_s13 = smov %s4580_s14 }
 0x6a5   : > { %s6863_s14 = smov %s4672_s25  ;;  %s6864_s15 = smov %s4588_s16 }
 0x6a6   : > { %s6865_s16 = smov %s6867_s20  ;;  %15 = sbr.rel (!%p13_p10) target bundleno = 4 (0x4), region = 81 }
 0x6ab   :  { %3627 = vsyncpa [#allocation6], 1 }
 0x6ac   :  { %3629 = vsyncpa [#allocation6 + $0x1], 1 }

</bundles_post_ra>
